<compile_context>
chip_gen: v5e
topology: v5e:2x2
jax: 0.10.0
libtpu: 0.0.40
codegen_flags: <defaults>
</compile_context>

<pallas_src>
import jax
import jax.numpy as jnp
from jax.experimental import pallas as pl
from jax.experimental.pallas import tpu as pltpu

EPS = 1e-5


def _fused_kernel(x_ref, w_ref, g1_ref, g2_ref, b2_ref, o_ref):
    # x_ref : (Cin, M)   channel-major flattened activations (full, resident)
    # w_ref : (Ct, Cin)  Cout-tile of the 1x1-conv weight
    # g1_ref: (Cin, 1)   BN1 gamma   (b1 not needed: cancels in BN2 centering)
    # g2_ref: (Ct, 1)    BN2 gamma (tile)
    # b2_ref: (Ct, 1)    BN2 beta  (tile)
    # o_ref : (Ct, M)
    x = x_ref[...].astype(jnp.float32)
    w = w_ref[...].astype(jnp.float32)
    cin, m = x.shape
    inv_m = 1.0 / float(m)

    # ---- BN1 statistics, single pass; sum-of-squares via the MXU Gram ----
    sum1 = jnp.sum(x, axis=1, keepdims=True)                       # (Cin, 1)
    gram = jax.lax.dot_general(                                    # x @ x^T  (Cin, Cin)
        x, x, dimension_numbers=(((1,), (1,)), ((), ())),
        preferred_element_type=jnp.float32)

    rows = jax.lax.broadcasted_iota(jnp.int32, (cin, cin), 0)
    cols = jax.lax.broadcasted_iota(jnp.int32, (cin, cin), 1)
    eye = rows == cols
    sumsq1 = jnp.sum(jnp.where(eye, gram, 0.0), axis=1, keepdims=True)  # diag(G)

    mean1 = sum1 * inv_m
    # TODO(synk): one-pass variance (E[x^2]-E[x]^2) can cancel badly if the
    # input is far from zero-mean; switch to a shifted accumulation if needed.
    var1 = sumsq1 * inv_m - mean1 * mean1
    scale1 = g1_ref[...].astype(jnp.float32) * jax.lax.rsqrt(var1 + EPS)  # (Cin,1)

    # Fold BN1 scale into the weight (W_s = W @ diag(scale1)); mean1/b1 offsets
    # cancel exactly under BN2's re-centering so they never touch the data path.
    d1 = jnp.where(eye, scale1, 0.0)                               # diag(scale1)
    w_s = jnp.dot(w, d1, preferred_element_type=jnp.float32)       # (Ct, Cin)

    # ---- Conv2d 1x1 (no bias) == matmul over channels -> MXU ----
    z = jnp.dot(w_s, x, preferred_element_type=jnp.float32)        # (Ct, M)

    # ---- BN2 statistics, algebraically on the MXU (no reductions over z) ----
    sum2 = jnp.dot(w_s, sum1, preferred_element_type=jnp.float32)  # (Ct, 1)
    wsg = jnp.dot(w_s, gram, preferred_element_type=jnp.float32)   # (Ct, Cin)
    sumsq2 = jnp.sum(wsg * w_s, axis=1, keepdims=True)             # (Ct, 1)

    mean2 = sum2 * inv_m
    var2 = sumsq2 * inv_m - mean2 * mean2
    s2 = g2_ref[...].astype(jnp.float32) * jax.lax.rsqrt(var2 + EPS)   # (Ct, 1)
    bias2 = b2_ref[...].astype(jnp.float32) - mean2 * s2               # (Ct, 1)

    o_ref[...] = (z * s2 + bias2).astype(o_ref.dtype)


def fused_bn_conv_bn(x_nchw, w_conv, g1, b1, g2, b2):
    """x_nchw: (N, Cin, H, W); w_conv: (Cout, Cin, 1, 1). Returns (N, Cout, H, W)."""
    N, Cin, H, W = x_nchw.shape
    Cout = w_conv.shape[0]
    M = N * H * W

    del b1  # b1's contribution is a per-Cout constant removed by BN2 centering.

    if N == 1:
        x2d = x_nchw.reshape(Cin, M)            # free reshape, no transpose
    else:
        x2d = jnp.transpose(x_nchw, (1, 0, 2, 3)).reshape(Cin, M)

    w2d = w_conv.reshape(Cout, Cin)
    g1c = g1.reshape(Cin, 1)
    g2c = g2.reshape(Cout, 1)
    b2c = b2.reshape(Cout, 1)

    # Tile Cout so output writeback pipelines and shards across v7x's 2 TCs.
    n_tiles = 1
    for cand in (4, 2):
        if Cout % cand == 0 and (Cout // cand) % 8 == 0:
            n_tiles = cand
            break
    ct = Cout // n_tiles

    # TODO(synk): for much larger N*H*W, tile M with a two-pass (stats-then-
    # normalize) scheme using the global M; the single-block-M scheme here
    # relies on the whole spatial extent being in one block.
    flops = (2 * Cout * Cin * M            # main 1x1-conv matmul
             + n_tiles * 2 * Cin * Cin * M  # per-tile Gram recompute
             + 2 * Cout * Cin * Cin)        # W_s + W_s@G
    bytes_accessed = 4 * (Cin * M + Cout * Cin + Cout * M + Cin + 2 * Cout)
    cost = pl.CostEstimate(flops=flops,
                           transcendentals=n_tiles * Cin + Cout,
                           bytes_accessed=bytes_accessed)

    out2d = pl.pallas_call(
        _fused_kernel,
        out_shape=jax.ShapeDtypeStruct((Cout, M), x_nchw.dtype),
        grid=(n_tiles,),
        in_specs=[
            pl.BlockSpec((Cin, M), lambda i: (0, 0)),    # x: resident across tiles
            pl.BlockSpec((ct, Cin), lambda i: (i, 0)),   # weight tile
            pl.BlockSpec((Cin, 1), lambda i: (0, 0)),    # g1: resident
            pl.BlockSpec((ct, 1), lambda i: (i, 0)),     # g2 tile
            pl.BlockSpec((ct, 1), lambda i: (i, 0)),     # b2 tile
        ],
        out_specs=pl.BlockSpec((ct, M), lambda i: (i, 0)),
        compiler_params=pltpu.CompilerParams(
            dimension_semantics=("parallel",),
            vmem_limit_bytes=32 << 20,
        ),
        cost_estimate=cost,
    )(x2d, w2d, g1c, g2c, b2c)

    if N == 1:
        return out2d.reshape(1, Cout, H, W)
    return jnp.transpose(out2d.reshape(Cout, N, H, W), (1, 0, 2, 3))


def _reference(x_nchw, w_conv, g1, b1, g2, b2):
    """Plain-JAX reference mirroring PyTorch training-mode semantics."""
    N, Cin, H, W = x_nchw.shape
    Cout = w_conv.shape[0]
    x = x_nchw.astype(jnp.float32)
    mean1 = jnp.mean(x, axis=(0, 2, 3), keepdims=True)
    var1 = jnp.mean((x - mean1) ** 2, axis=(0, 2, 3), keepdims=True)
    y = (x - mean1) / jnp.sqrt(var1 + EPS) * g1.reshape(1, Cin, 1, 1) + b1.reshape(1, Cin, 1, 1)
    z = jnp.einsum("nchw,oc->nohw", y, w_conv.reshape(Cout, Cin))
    mean2 = jnp.mean(z, axis=(0, 2, 3), keepdims=True)
    var2 = jnp.mean((z - mean2) ** 2, axis=(0, 2, 3), keepdims=True)
    return (z - mean2) / jnp.sqrt(var2 + EPS) * g2.reshape(1, Cout, 1, 1) + b2.reshape(1, Cout, 1, 1)


if __name__ == "__main__":
    key = jax.random.PRNGKey(0)
    k_x, k_w, k_g1, k_b1, k_g2, k_b2 = jax.random.split(key, 6)

    N, Cin, Cout, H, W = 1, 80, 480, 28, 28

    x = jax.random.normal(k_x, (N, Cin, H, W), dtype=jnp.float32)
    # Deterministic synthetic parameters (shapes from the module's __init__).
    w_conv = jax.random.normal(k_w, (Cout, Cin, 1, 1), dtype=jnp.float32) * 0.05
    g1 = 1.0 + 0.1 * jax.random.normal(k_g1, (Cin,), dtype=jnp.float32)
    b1 = 0.1 * jax.random.normal(k_b1, (Cin,), dtype=jnp.float32)
    g2 = 1.0 + 0.1 * jax.random.normal(k_g2, (Cout,), dtype=jnp.float32)
    b2 = 0.1 * jax.random.normal(k_b2, (Cout,), dtype=jnp.float32)

    out = fused_bn_conv_bn(x, w_conv, g1, b1, g2, b2)
    out = jax.block_until_ready(out)

    ref = _reference(x, w_conv, g1, b1, g2, b2)
    assert out.shape == (N, Cout, H, W), out.shape
    assert jnp.allclose(out, ref, atol=1e-3, rtol=1e-3), float(jnp.max(jnp.abs(out - ref)))

    print("KERNEL_OK")
</pallas_src>

<mosaic_0001>
module attributes {stable_mosaic.version = 11 : i64} {
  func.func @_fused_kernel(%arg0: i32, %arg1: memref<80x784xf32, #tpu.memory_space<vmem>>, %arg2: memref<120x80xf32, #tpu.memory_space<vmem>>, %arg3: memref<80x1xf32, #tpu.memory_space<vmem>>, %arg4: memref<120x1xf32, #tpu.memory_space<vmem>>, %arg5: memref<120x1xf32, #tpu.memory_space<vmem>>, %arg6: memref<120x784xf32, #tpu.memory_space<vmem>>) attributes {dimension_semantics = [#tpu.dimension_semantics<parallel>], iteration_bounds = array<i64: 4>, scalar_prefetch = 0 : i64, scratch_operands = 0 : i64, tpu.core_type = #tpu.core_type<tc>, window_params = [{pipeline_mode = #tpu.pipeline_mode<synchronous>, transform_indices = @transform_0, window_bounds = array<i64: 80, 784>}, {transform_indices = @transform_1, window_bounds = array<i64: 120, 80>}, {pipeline_mode = #tpu.pipeline_mode<synchronous>, transform_indices = @transform_2, window_bounds = array<i64: 80, 1>}, {transform_indices = @transform_3, window_bounds = array<i64: 120, 1>}, {transform_indices = @transform_4, window_bounds = array<i64: 120, 1>}, {transform_indices = @transform_5, window_bounds = array<i64: 120, 784>}]} {
    %c0 = arith.constant 0 : index
    %c0_0 = arith.constant 0 : index
    %0 = vector.load %arg1[%c0, %c0_0] : memref<80x784xf32, #tpu.memory_space<vmem>>, vector<80x784xf32>
    %c0_1 = arith.constant 0 : index
    %c0_2 = arith.constant 0 : index
    %1 = vector.load %arg2[%c0_1, %c0_2] : memref<120x80xf32, #tpu.memory_space<vmem>>, vector<120x80xf32>
    %cst = arith.constant dense<0.000000e+00> : vector<80xf32>
    %2 = vector.multi_reduction <add>, %0, %cst [1] : vector<80x784xf32> to vector<80xf32>
    %3 = vector.shape_cast %2 : vector<80xf32> to vector<80x1xf32>
    %cst_3 = arith.constant dense<0.000000e+00> : vector<80x80xf32>
    %4 = tpu.matmul %0, %0, %cst_3 {dimension_numbers = #tpu.dot_dimension_numbers<[1], [1], [0], [0], [0, 0, 1, 0], [], []>} : vector<80x784xf32>, vector<80x784xf32>, vector<80x80xf32> -> vector<80x80xf32>
    %5 = tpu.iota {dimensions = array<i32: 0>} : vector<80x80xi32>
    %6 = tpu.iota {dimensions = array<i32: 1>} : vector<80x80xi32>
    %7 = arith.cmpi eq, %5, %6 : vector<80x80xi32>
    %cst_4 = arith.constant 0.000000e+00 : f32
    %8 = vector.broadcast %cst_4 : f32 to vector<80x80xf32>
    %9 = arith.select %7, %4, %8 : vector<80x80xi1>, vector<80x80xf32>
    %cst_5 = arith.constant dense<0.000000e+00> : vector<80xf32>
    %10 = vector.multi_reduction <add>, %9, %cst_5 [1] : vector<80x80xf32> to vector<80xf32>
    %11 = vector.shape_cast %10 : vector<80xf32> to vector<80x1xf32>
    %cst_6 = arith.constant 0.00127551018 : f32
    %12 = vector.broadcast %cst_6 : f32 to vector<80x1xf32>
    %13 = arith.mulf %3, %12 : vector<80x1xf32>
    %cst_7 = arith.constant 0.00127551018 : f32
    %14 = vector.broadcast %cst_7 : f32 to vector<80x1xf32>
    %15 = arith.mulf %11, %14 : vector<80x1xf32>
    %16 = arith.mulf %13, %13 : vector<80x1xf32>
    %17 = arith.subf %15, %16 : vector<80x1xf32>
    %c0_8 = arith.constant 0 : index
    %c0_9 = arith.constant 0 : index
    %18 = vector.load %arg3[%c0_8, %c0_9] : memref<80x1xf32, #tpu.memory_space<vmem>>, vector<80x1xf32>
    %cst_10 = arith.constant 9.99999974E-6 : f32
    %19 = vector.broadcast %cst_10 : f32 to vector<80x1xf32>
    %20 = arith.addf %17, %19 : vector<80x1xf32>
    %21 = math.rsqrt %20 : vector<80x1xf32>
    %22 = arith.mulf %18, %21 : vector<80x1xf32>
    %cst_11 = arith.constant 0.000000e+00 : f32
    %23 = vector.shape_cast %22 : vector<80x1xf32> to vector<80x1xf32>
    %24 = vector.broadcast %23 : vector<80x1xf32> to vector<80x80xf32>
    %25 = vector.broadcast %cst_11 : f32 to vector<80x80xf32>
    %26 = arith.select %7, %24, %25 : vector<80x80xi1>, vector<80x80xf32>
    %cst_12 = arith.constant dense<0.000000e+00> : vector<120x80xf32>
    %27 = tpu.matmul %1, %26, %cst_12 {dimension_numbers = #tpu.dot_dimension_numbers<[1], [0], [0], [1], [0, 0, 1, 1], [], []>} : vector<120x80xf32>, vector<80x80xf32>, vector<120x80xf32> -> vector<120x80xf32>
    %cst_13 = arith.constant dense<0.000000e+00> : vector<120x784xf32>
    %28 = tpu.matmul %27, %0, %cst_13 {dimension_numbers = #tpu.dot_dimension_numbers<[1], [0], [0], [1], [0, 0, 1, 1], [], []>} : vector<120x80xf32>, vector<80x784xf32>, vector<120x784xf32> -> vector<120x784xf32>
    %cst_14 = arith.constant dense<0.000000e+00> : vector<120x1xf32>
    %29 = tpu.matmul %27, %3, %cst_14 {dimension_numbers = #tpu.dot_dimension_numbers<[1], [0], [0], [1], [0, 0, 1, 1], [], []>} : vector<120x80xf32>, vector<80x1xf32>, vector<120x1xf32> -> vector<120x1xf32>
    %cst_15 = arith.constant dense<0.000000e+00> : vector<120x80xf32>
    %30 = tpu.matmul %27, %4, %cst_15 {dimension_numbers = #tpu.dot_dimension_numbers<[1], [0], [0], [1], [0, 0, 1, 1], [], []>} : vector<120x80xf32>, vector<80x80xf32>, vector<120x80xf32> -> vector<120x80xf32>
    %31 = arith.mulf %30, %27 : vector<120x80xf32>
    %cst_16 = arith.constant dense<0.000000e+00> : vector<120xf32>
    %32 = vector.multi_reduction <add>, %31, %cst_16 [1] : vector<120x80xf32> to vector<120xf32>
    %33 = vector.shape_cast %32 : vector<120xf32> to vector<120x1xf32>
    %cst_17 = arith.constant 0.00127551018 : f32
    %34 = vector.broadcast %cst_17 : f32 to vector<120x1xf32>
    %35 = arith.mulf %29, %34 : vector<120x1xf32>
    %cst_18 = arith.constant 0.00127551018 : f32
    %36 = vector.broadcast %cst_18 : f32 to vector<120x1xf32>
    %37 = arith.mulf %33, %36 : vector<120x1xf32>
    %38 = arith.mulf %35, %35 : vector<120x1xf32>
    %39 = arith.subf %37, %38 : vector<120x1xf32>
    %c0_19 = arith.constant 0 : index
    %c0_20 = arith.constant 0 : index
    %40 = vector.load %arg4[%c0_19, %c0_20] : memref<120x1xf32, #tpu.memory_space<vmem>>, vector<120x1xf32>
    %cst_21 = arith.constant 9.99999974E-6 : f32
    %41 = vector.broadcast %cst_21 : f32 to vector<120x1xf32>
    %42 = arith.addf %39, %41 : vector<120x1xf32>
    %43 = math.rsqrt %42 : vector<120x1xf32>
    %44 = arith.mulf %40, %43 : vector<120x1xf32>
    %c0_22 = arith.constant 0 : index
    %c0_23 = arith.constant 0 : index
    %45 = vector.load %arg5[%c0_22, %c0_23] : memref<120x1xf32, #tpu.memory_space<vmem>>, vector<120x1xf32>
    %46 = arith.mulf %35, %44 : vector<120x1xf32>
    %47 = arith.subf %45, %46 : vector<120x1xf32>
    %48 = vector.broadcast %44 : vector<120x1xf32> to vector<120x784xf32>
    %49 = arith.mulf %28, %48 : vector<120x784xf32>
    %50 = vector.broadcast %47 : vector<120x1xf32> to vector<120x784xf32>
    %51 = arith.addf %49, %50 : vector<120x784xf32>
    %c0_24 = arith.constant 0 : index
    %c0_25 = arith.constant 0 : index
    %52 = vector.load %arg6[%c0_24, %c0_25] : memref<120x784xf32, #tpu.memory_space<vmem>>, vector<120x784xf32>
    tpu.vector_store %arg6[%c0_24, %c0_25], %51 {strides = array<i32>} : memref<120x784xf32, #tpu.memory_space<vmem>>, vector<120x784xf32>,
    return
  }
  func.func @transform_0(%arg0: i32) -> (i32, i32) {
    %c0_i32 = arith.constant 0 : i32
    %c0_i32_0 = arith.constant 0 : i32
    %c0_i32_1 = arith.constant 0 : i32
    return %c0_i32, %c0_i32_0 : i32, i32
  }
  func.func @transform_1(%arg0: i32) -> (i32, i32) {
    %c0_i32 = arith.constant 0 : i32
    %c0_i32_0 = arith.constant 0 : i32
    return %arg0, %c0_i32 : i32, i32
  }
  func.func @transform_2(%arg0: i32) -> (i32, i32) {
    %c0_i32 = arith.constant 0 : i32
    %c0_i32_0 = arith.constant 0 : i32
    %c0_i32_1 = arith.constant 0 : i32
    return %c0_i32, %c0_i32_0 : i32, i32
  }
  func.func @transform_3(%arg0: i32) -> (i32, i32) {
    %c0_i32 = arith.constant 0 : i32
    %c0_i32_0 = arith.constant 0 : i32
    return %arg0, %c0_i32 : i32, i32
  }
  func.func @transform_4(%arg0: i32) -> (i32, i32) {
    %c0_i32 = arith.constant 0 : i32
    %c0_i32_0 = arith.constant 0 : i32
    return %arg0, %c0_i32 : i32, i32
  }
  func.func @transform_5(%arg0: i32) -> (i32, i32) {
    %c0_i32 = arith.constant 0 : i32
    %c0_i32_0 = arith.constant 0 : i32
    return %arg0, %c0_i32 : i32, i32
  }
}

</mosaic_0001>

<bundles_post_ra>
// kernel: tpu_custom_call.1
= control target key start
LH: loop header
LB: loop body
LE: loop exit
PB: predicated region body
PF: predicated region fallthrough
CT: control target
= control target key end

     0   :  { %10 = vsyncpa [#allocation3], 0  ;;  %s3124_s18 = smov 0   ;;  %s4966_s0 = inlined_call_operand.hbm [shape: f32[80,784], index: 0, kind: input, shape index: {}]   ;;  %s4967_s1 = inlined_call_operand.vmem [shape: f32[480,80], index: 1, kind: input, shape index: {}]   ;;  %s4968_s2 = inlined_call_operand.vmem [shape: f32[80,1], index: 2, kind: input, shape index: {}]   ;;  %s4969_s3 = inlined_call_operand.vmem [shape: f32[480,1], index: 3, kind: input, shape index: {}]   ;;  %s4970_s4 = inlined_call_operand.vmem [shape: f32[480,1], index: 4, kind: input, shape index: {}]   ;;  %s4971_s5 = inlined_call_operand.vmem [shape: f32[480,784], index: 5, kind: output, shape index: {}]  }
   0x1 LB: > { %s178_s21 = sshll.u32 %s4966_s0, 4  ;;  %s2749_s22 = sadd.s32 4294967295, %s3088_s18   ;;  %s3088_s18 = sphi %s3124_s18, %s16_s18   ;;  %s179_s21 = int_to_ptr.hbm [resolvable:$true] %s178_s21 }
   0x2   : > { %p2751_p0 = scmp.ge.s32.totalorder %s3088_s18, 1  ;;  %p167_p1 = scmp.lt.s32.totalorder %s3088_s18, 5 }
   0x3   : > { %p2971_p2 = scmp.eq.s32.totalorder %s2749_s22, 0  ;;  %s3090_s23 = smov [#allocation2]  }
   0x4   : > { %p168_p3 = pnand %p2751_p0, %p167_p1  ;;  %s180_s24 = sshll.u32 %s3090_s23, 4  ;;  %s181_s24 = int_to_ptr.vmem [resolvable:$true] %s180_s24 }
   0x5   : > { %s3091_s25 = smov 896   ;;  %s3092_s26 = smov 56  }
   0x6   : > { %p2967_p4 = pneg %p168_p3  ;;  %226 = sbr.rel (%p168_p3) target bundleno = 1539 (0x603), region = 40 }
   0x8   : > { %p2968_p5 = pnand %p2971_p2, %p2967_p4 }
   0xa   : > { %2970 = dma.hbm_to_vmem [thread:$0]  (!%p2968_p5), %s179_s21, 8960, %s181_s24, [#allocation3], %s3091_s25, %s3091_s25, %s3092_s26  }
   0xb   : > { %3083 = dma.done.wait (%p2971_p2), [#allocation3], 8960  }
   0xc   : > { %3085 = vsyncadd (%p2971_p2), [#allocation3], 4294958336  ;;  %v3137_v0 = vld [vmem:[#allocation2 + $0x1f8] sm:$0xff]  ;;  %v3139_v1 = vld [vmem:[#allocation2 + $0x200] sm:$0xff]  ;;  %vm4993_vm0 = vcmask 130048   ;;  %vm4994_vm2 = vcmask 654336  }
   0xd   : > { %2942 = vmatpush.xpose.msra.mxu2 %v3137_v0  ;;  %550 = vmatpush.xpose.msra.mxu1 %v3139_v1  ;;  %v3144_v2 = vld [vmem:[#allocation2 + $0x1c0] sm:$0xff]  ;;  %v3146_v3 = vld [vmem:[#allocation2 + $0x1c8] sm:$0xff]  ;;  %v3153_v5 = vld [vmem:[#allocation2 + $0x190] sm:$0xff]  ;;  %s266_s24 = smul.u32 15, %s2749_s22 }
   0xe   : > { %503 = vmatpush.xpose.msra.mxu0 %v3137_v0  ;;  %v3151_v4 = vld [vmem:[#allocation2 + $0x188] sm:$0xff]  ;;  %v3155_v6 = vld [vmem:[#allocation2 + $0x210] sm:$0xff]  ;;  %v3162_v8 = vld [vmem:[#allocation2 + $0x158] sm:$0xff] }
   0xf   : > { %v3160_v7 = vld [vmem:[#allocation2 + $0x150] sm:$0xff]  ;;  %644 = vmatpush.xpose.msra.mxu3 %v3155_v6  ;;  %v3165_v9 = vld [vmem:[#allocation2 + $0x1d8] sm:$0xff]  ;;  %v3172_v11 = vld [vmem:[#allocation2 + $0x120] sm:$0xff]  ;;  %p267_p6 = scmp.lt.s32.totalorder %s266_s24, 59 }
  0x10   : > { %v3170_v10 = vld [vmem:[#allocation2 + $0x118] sm:$0xff]  ;;  %v3175_v12 = vld [vmem:[#allocation2 + $0x1a0] sm:$0xff]  ;;  %v3182_v14 = vld [vmem:[#allocation2 + $0xe8] sm:$0xff] }
  0x11   : > { %2943 = vmatpush.xpose.msra.mxu2 %v3144_v2  ;;  %551 = vmatpush.xpose.msra.mxu1 %v3146_v3  ;;  %v3180_v13 = vld [vmem:[#allocation2 + $0xe0] sm:$0xff]  ;;  %v3185_v15 = vld [vmem:[#allocation2 + $0x168] sm:$0xff]  ;;  %v3192_v17 = vld [vmem:[#allocation2 + $0xb0] sm:$0xff]  ;;  %s5341_s24 = smov (!%p267_p6, %s266_s24), 59 }
  0x12   : > { %504 = vmatpush.xpose.msra.mxu0 %v3144_v2  ;;  %v3190_v16 = vld [vmem:[#allocation2 + $0xa8] sm:$0xff]  ;;  %v3195_v18 = vld [vmem:[#allocation2 + $0x130] sm:$0xff]  ;;  %v3202_v20 = vld [vmem:[#allocation2 + $0x78] sm:$0xff]  ;;  %s4014_s25 = sshll.u32 %s5341_s24, 3  ;;  %s2962_s9 = smul.u32 56, %s5341_s24 }
  0x13   : > { %645 = vmatpush.xpose.msra.mxu3 %v3165_v9  ;;  %v3200_v19 = vld [vmem:[#allocation2 + $0x70] sm:$0xff]  ;;  %4997 = vst [vmem:[#allocation6_spill] sm:$0xff] %v3202_v20  ;;  %v3205_v21 = vld [vmem:[#allocation2 + $0xf8] sm:$0xff]  ;;  %v3212_v23 = vld [vmem:[#allocation2 + $0x40] sm:$0xff]  ;;  %s4020_s28 = scalar_lea.vmem %s4967_s1, %s4014_s25  ;;  %s4547_s30 = scalar_lea.vmem %s4969_s3, %s4014_s25 }
  0x14   : > { %4996 = vst [vmem:[#allocation5_spill] sm:$0xff] %v3200_v19  ;;  %v3210_v22 = vld [vmem:[#allocation2 + $0x38] sm:$0xff]  ;;  %v3215_v24 = vld [vmem:[#allocation2 + $0xc0] sm:$0xff]  ;;  %v3222_v26 = vld [vmem:[#allocation2 + $0x8] sm:$0xff]  ;;  %s4560_s8 = scalar_lea.vmem %s4970_s4, %s4014_s25  ;;  %s4712_s12 = scalar_lea.vmem %s4971_s5, %s2962_s9 }
  0x15   : > { %2944 = vmatpush.xpose.msra.mxu2 %v3151_v4  ;;  %552 = vmatpush.xpose.msra.mxu1 %v3153_v5  ;;  %4998 = vst [vmem:[#allocation7_spill] sm:$0xff] %v3210_v22  ;;  %v3220_v25 = vld [vmem:[#allocation2] sm:$0xff]  ;;  %v3225_v27 = vld [vmem:[#allocation2 + $0x208] sm:$0xff]  ;;  %v3227_v28 = vld [vmem:[#allocation2 + $0x218] sm:$0xff] }
  0x16   : > { %505 = vmatpush.xpose.msra.mxu0 %v3151_v4  ;;  %4999 = vst [vmem:[#allocation8_spill] sm:$0xff] %v3212_v23  ;;  %v3229_v29 = vld [vmem:[#allocation2 + $0x88] sm:$0xff]  ;;  %v3235_v30 = vld [vmem:[#allocation2 + $0x1d0] sm:$0xff]  ;;  %v3241_v31 = vld [vmem:[#allocation2 + $0x1e0] sm:$0xff] }
  0x17   : > { %646 = vmatpush.xpose.msra.mxu3 %v3175_v12  ;;  %5000 = vst [vmem:[#allocation9_spill] sm:$0xff] %v3220_v25  ;;  %v3243_v32 = vld [vmem:[#allocation2 + $0x50] sm:$0xff]  ;;  %v3248_v33 = vld [vmem:[#allocation2 + $0x198] sm:$0xff]  ;;  %v3252_v34 = vld [vmem:[#allocation2 + $0x1a8] sm:$0xff] }
  0x18   : > { %5001 = vst [vmem:[#allocation10_spill] sm:$0xff] %v3222_v26  ;;  %v3254_v35 = vld [vmem:[#allocation2 + $0x18] sm:$0xff]  ;;  %v3258_v36 = vld [vmem:[#allocation2 + $0x160] sm:$0xff]  ;;  %v3264_v37 = vld [vmem:[#allocation2 + $0x170] sm:$0xff] }
  0x19   : > { %2945 = vmatpush.xpose.msra.mxu2 %v3160_v7  ;;  %553 = vmatpush.xpose.msra.mxu1 %v3162_v8  ;;  %5002 = vst [vmem:[#allocation11_spill] sm:$0xff] %v3229_v29  ;;  %v3270_v38 = vld [vmem:[#allocation2 + $0x128] sm:$0xff]  ;;  %v3273_v39 = vld [vmem:[#allocation2 + $0x138] sm:$0xff]  ;;  %v3277_v40 = vld [vmem:[#allocation2 + $0xf0] sm:$0xff] }
  0x1a   : > { %506 = vmatpush.xpose.msra.mxu0 %v3160_v7  ;;  %5003 = vst [vmem:[#allocation12_spill] sm:$0xff] %v3243_v32  ;;  %v3282_v41 = vld [vmem:[#allocation2 + $0x100] sm:$0xff]  ;;  %v3288_v42 = vld [vmem:[#allocation2 + $0xb8] sm:$0xff]  ;;  %v3291_v43 = vld [vmem:[#allocation2 + $0xc8] sm:$0xff] }
  0x1b   : > { %647 = vmatpush.xpose.msra.mxu3 %v3185_v15  ;;  %5004 = vst [vmem:[#allocation13_spill] sm:$0xff] %v3254_v35  ;;  %v3295_v44 = vld [vmem:[#allocation2 + $0x80] sm:$0xff]  ;;  %v3300_v45 = vld [vmem:[#allocation2 + $0x90] sm:$0xff]  ;;  %v3306_v46 = vld [vmem:[#allocation2 + $0x48] sm:$0xff] }
  0x1c   : > { %5005 = vst [vmem:[#allocation14_spill] sm:$0xff] %v3295_v44  ;;  %v3309_v47 = vld [vmem:[#allocation2 + $0x58] sm:$0xff]  ;;  %v3313_v48 = vld [vmem:[#allocation2 + $0x10] sm:$0xff]  ;;  %v3318_v49 = vld [vmem:[#allocation2 + $0x20] sm:$0xff] }
  0x1d   : > { %2946 = vmatpush.xpose.msra.mxu2 %v3170_v10  ;;  %554 = vmatpush.xpose.msra.mxu1 %v3172_v11  ;;  %5006 = vst [vmem:[#allocation15_spill] sm:$0xff] %v3300_v45  ;;  %v3337_v50 = vld [vmem:[#allocation2 + $0x220] sm:$0xff]  ;;  %v3339_v51 = vld [vmem:[#allocation2 + $0x228] sm:$0xff]  ;;  %v3348_v53 = vld [vmem:[#allocation2 + $0x1f0] sm:$0xff] }
  0x1e   : > { %507 = vmatpush.xpose.msra.mxu0 %v3170_v10  ;;  %5007 = vst [vmem:[#allocation16_spill] sm:$0xff] %v3306_v46  ;;  %v3346_v52 = vld [vmem:[#allocation2 + $0x1e8] sm:$0xff]  ;;  %v3358_v54 = vld [vmem:[#allocation2 + $0x1b0] sm:$0xff]  ;;  %v3360_v55 = vld [vmem:[#allocation2 + $0x1b8] sm:$0xff] }
  0x1f   : > { %648 = vmatpush.xpose.msra.mxu3 %v3195_v18  ;;  %5008 = vst [vmem:[#allocation17_spill] sm:$0xff] %v3309_v47  ;;  %v3367_v56 = vld [vmem:[#allocation2 + $0x178] sm:$0xff]  ;;  %v3369_v57 = vld [vmem:[#allocation2 + $0x180] sm:$0xff]  ;;  %v3381_v59 = vld [vmem:[#allocation2 + $0x148] sm:$0xff] }
  0x20   : > { %5009 = vst [vmem:[#allocation18_spill] sm:$0xff] %v3313_v48  ;;  %v3379_v58 = vld [vmem:[#allocation2 + $0x140] sm:$0xff]  ;;  %v3388_v60 = vld [vmem:[#allocation2 + $0x108] sm:$0xff]  ;;  %v3390_v61 = vld [vmem:[#allocation2 + $0x110] sm:$0xff] }
  0x21   : > { %2947 = vmatpush.xpose.msra.mxu2 %v3180_v13  ;;  %555 = vmatpush.xpose.msra.mxu1 %v3182_v14  ;;  %5010 = vst [vmem:[#allocation19_spill] sm:$0xff] %v3318_v49  ;;  %v3400_v62 = vld [vmem:[#allocation2 + $0xd0] sm:$0xff]  ;;  %v3402_v63 = vld [vmem:[#allocation2 + $0xd8] sm:$0xff] }
  0x22   : > { %508 = vmatpush.xpose.msra.mxu0 %v3180_v13 }
  0x23   : > { %649 = vmatpush.xpose.msra.mxu3 %v3205_v21 }
  0x25   : > { %2948 = vmatpush.xpose.msra.mxu2 %v3190_v16  ;;  %556 = vmatpush.xpose.msra.mxu1 %v3192_v17 }
  0x26   : > { %509 = vmatpush.xpose.msra.mxu0 %v3190_v16 }
  0x27   : > { %650 = vmatpush.xpose.msra.mxu3 %v3215_v24 }
  0x29   : > { %2949 = vmatpush.xpose.msra.mxu2 %v3200_v19  ;;  %557 = vmatpush.xpose.msra.mxu1 %v3202_v20 }
  0x2a   : > { %510 = vmatpush.xpose.msra.mxu0 %v3200_v19 }
  0x2b   : > { %651 = vmatpush.xpose.msra.mxu3 %v3229_v29 }
  0x2d   : > { %2950 = vmatpush.xpose.msra.mxu2 %v3210_v22  ;;  %558 = vmatpush.xpose.msra.mxu1 %v3212_v23 }
  0x2e   : > { %511 = vmatpush.xpose.msra.mxu0 %v3210_v22 }
  0x2f   : > { %652 = vmatpush.xpose.msra.mxu3 %v3243_v32 }
  0x31   : > { %2951 = vmatpush.xpose.msra.mxu2 %v3220_v25  ;;  %559 = vmatpush.xpose.msra.mxu1 %v3222_v26 }
  0x32   : > { %512 = vmatpush.xpose.msra.mxu0 %v3220_v25 }
  0x33   : > { %653 = vmatpush.xpose.msra.mxu3 %v3254_v35 }
  0x34   : > { %528 = vmatmul.f32.vlgmr.msra.gmra.mxu2 %v3170_v10  ;;  %560 = vmatmul.f32.vlgmr.msra.gmra.mxu1 %v3222_v26 }
  0x35   : > { %597 = vmatpush.xpose.msrb.mxu2 %v3225_v27  ;;  %513 = vmatmul.f32.vlgmr.msra.gmra.mxu0 %v3220_v25 }
  0x36   : > { %691 = vmatpush.xpose.msrb.mxu0 %v3227_v28  ;;  %2952 = vmatpush.xpose.msrb.mxu1 %v3227_v28 }
  0x37   : > { %654 = vmatmul.f32.vlgmr.msra.gmra.mxu3 %v3254_v35  ;;  %v3409_v35 = vld [vmem:[#allocation2 + $0x98] sm:$0xff] }
  0x38   : > { %5011 = vst [vmem:[#allocation20_spill] sm:$0xff] %v3409_v35 }
  0x39   : > { %598 = vmatpush.xpose.msrb.mxu2 %v3235_v30 }
  0x3a   : > { %692 = vmatpush.xpose.msrb.mxu0 %v3241_v31  ;;  %2953 = vmatpush.xpose.msrb.mxu1 %v3241_v31 }
  0x3c   : > { %531 = vmatmul.f32.gmra.mxu2 %v3160_v7  ;;  %563 = vmatmul.f32.gmra.mxu1 %v3212_v23 }
  0x3d   : > { %599 = vmatpush.xpose.msrb.mxu2 %v3248_v33  ;;  %516 = vmatmul.f32.gmra.mxu0 %v3210_v22 }
  0x3e   : > { %693 = vmatpush.xpose.msrb.mxu0 %v3252_v34  ;;  %2954 = vmatpush.xpose.msrb.mxu1 %v3252_v34 }
  0x3f   : > { %657 = vmatmul.f32.gmra.mxu3 %v3243_v32  ;;  %v3430_v32 = vld [vmem:[#allocation2 + $0x28] sm:$0xff] }
  0x40   : > { %5015 = vst [vmem:[#allocation24_spill] sm:$0xff] %v3430_v32 }
  0x41   : > { %600 = vmatpush.xpose.msrb.mxu2 %v3258_v36 }
  0x42   : > { %694 = vmatpush.xpose.msrb.mxu0 %v3264_v37  ;;  %2955 = vmatpush.xpose.msrb.mxu1 %v3264_v37 }
  0x44   : > { %534 = vmatmul.f32.gmra.mxu2 %v3151_v4  ;;  %566 = vmatmul.f32.gmra.mxu1 %v3202_v20 }
  0x45   : > { %601 = vmatpush.xpose.msrb.mxu2 %v3270_v38  ;;  %519 = vmatmul.f32.gmra.mxu0 %v3200_v19 }
  0x46   : > { %695 = vmatpush.xpose.msrb.mxu0 %v3273_v39  ;;  %2956 = vmatpush.xpose.msrb.mxu1 %v3273_v39 }
  0x47   : > { %660 = vmatmul.f32.gmra.mxu3 %v3229_v29  ;;  %v3411_v29 = vld [vmem:[#allocation2 + $0xa0] sm:$0xff] }
  0x48   : > { %5012 = vst [vmem:[#allocation21_spill] sm:$0xff] %v3411_v29 }
  0x49   : > { %602 = vmatpush.xpose.msrb.mxu2 %v3277_v40 }
  0x4a   : > { %696 = vmatpush.xpose.msrb.mxu0 %v3282_v41  ;;  %2957 = vmatpush.xpose.msrb.mxu1 %v3282_v41 }
  0x4c   : > { %537 = vmatmul.f32.gmra.mxu2 %v3144_v2  ;;  %569 = vmatmul.f32.gmra.mxu1 %v3192_v17 }
  0x4d   : > { %603 = vmatpush.xpose.msrb.mxu2 %v3288_v42  ;;  %522 = vmatmul.f32.gmra.mxu0 %v3190_v16 }
  0x4e   : > { %697 = vmatpush.xpose.msrb.mxu0 %v3291_v43  ;;  %2958 = vmatpush.xpose.msrb.mxu1 %v3291_v43 }
  0x4f   : > { %663 = vmatmul.f32.gmra.mxu3 %v3215_v24 }
  0x51   : > { %604 = vmatpush.xpose.msrb.mxu2 %v3295_v44 }
  0x52   : > { %698 = vmatpush.xpose.msrb.mxu0 %v3300_v45  ;;  %2959 = vmatpush.xpose.msrb.mxu1 %v3300_v45 }
  0x54   : > { %540 = vmatmul.f32.gmra.mxu2 %v3137_v0  ;;  %572 = vmatmul.f32.gmra.mxu1 %v3182_v14 }
  0x55   : > { %605 = vmatpush.xpose.msrb.mxu2 %v3306_v46  ;;  %525 = vmatmul.f32.gmra.mxu0 %v3180_v13 }
  0x56   : > { %699 = vmatpush.xpose.msrb.mxu0 %v3309_v47  ;;  %2960 = vmatpush.xpose.msrb.mxu1 %v3309_v47 }
  0x57   : > { %666 = vmatmul.f32.gmra.mxu3 %v3205_v21 }
  0x59   : > { %606 = vmatpush.xpose.msrb.mxu2 %v3313_v48 }
  0x5a   : > { %700 = vmatpush.xpose.msrb.mxu0 %v3318_v49  ;;  %2961 = vmatpush.xpose.msrb.mxu1 %v3318_v49 }
  0x5c   : > { %575 = vmatmul.f32.gmra.mxu1 %v3172_v11  ;;  %607 = vmatmul.f32.vlgmr.msrb.gmra.mxu2 %v3313_v48 }
  0x5d   : > { %701 = vmatmul.f32.vlgmr.msrb.gmra.mxu0 %v3318_v49  ;;  %2760 = vmatpush.xpose.msk.msra.mxu2 %vm4993_vm0, %v3339_v51 }
  0x5e   : > { %1278 = vmatpush.msra.mxu0 %v3137_v0  ;;  %738 = vmatpush.xpose.msra.mxu1 %v3337_v50 }
  0x5f   : > { %669 = vmatmul.f32.gmra.mxu3 %v3195_v18 }
  0x60   : > { %1279 = vmatpush.msra.mxu0 %v3144_v2 }
  0x61   : > { %2761 = vmatpush.xpose.msk.msra.mxu2 %vm4993_vm0, %v3348_v53 }
  0x62   : > { %1280 = vmatpush.msra.mxu0 %v3151_v4  ;;  %739 = vmatpush.xpose.msra.mxu1 %v3346_v52 }
  0x64   : > { %1281 = vmatpush.msra.mxu0 %v3160_v7  ;;  %578 = vmatmul.f32.gmra.mxu1 %v3162_v8 }
  0x65   : > { %610 = vmatmul.f32.gmra.mxu2 %v3306_v46  ;;  %704 = vmatmul.f32.gmra.mxu0 %v3309_v47 }
  0x66   : > { %1282 = vmatpush.msra.mxu0 %v3170_v10  ;;  %740 = vmatpush.xpose.msra.mxu1 %v3358_v54 }
  0x67   : > { %2762 = vmatpush.xpose.msk.msra.mxu2 %vm4993_vm0, %v3360_v55  ;;  %672 = vmatmul.f32.gmra.mxu3 %v3185_v15 }
  0x68   : > { %1283 = vmatpush.msra.mxu0 %v3180_v13 }
  0x6a   : > { %1284 = vmatpush.msra.mxu0 %v3190_v16  ;;  %741 = vmatpush.xpose.msra.mxu1 %v3367_v56 }
  0x6b   : > { %2763 = vmatpush.xpose.msk.msra.mxu2 %vm4993_vm0, %v3369_v57 }
  0x6c   : > { %1285 = vmatpush.msra.mxu0 %v3200_v19  ;;  %581 = vmatmul.f32.gmra.mxu1 %v3153_v5  ;;  %v3423_v19 = vld [vmem:[#allocation2 + $0x68] sm:$0xff] }
  0x6d   : > { %613 = vmatmul.f32.gmra.mxu2 %v3295_v44  ;;  %707 = vmatmul.f32.gmra.mxu0 %v3300_v45  ;;  %5014 = vst [vmem:[#allocation23_spill] sm:$0xff] %v3423_v19 }
  0x6e   : > { %1286 = vmatpush.msra.mxu0 %v3210_v22  ;;  %742 = vmatpush.xpose.msra.mxu1 %v3379_v58  ;;  %v3432_v22 = vld [vmem:[#allocation2 + $0x30] sm:$0xff] }
  0x6f   : > { %2764 = vmatpush.xpose.msk.msra.mxu2 %vm4993_vm0, %v3381_v59  ;;  %675 = vmatmul.f32.gmra.mxu3 %v3175_v12  ;;  %5016 = vst [vmem:[#allocation25_spill] sm:$0xff] %v3432_v22 }
  0x70   : > { %1287 = vmatpush.msra.mxu0 %v3220_v25  ;;  %v3421_v25 = vld [vmem:[#allocation2 + $0x60] sm:$0xff] }
  0x71   : > { %5013 = vst [vmem:[#allocation22_spill] sm:$0xff] %v3421_v25 }
  0x72   : > { %1526 = vmatpush.msrb.mxu0 %v3227_v28  ;;  %743 = vmatpush.xpose.msra.mxu1 %v3388_v60 }
  0x73   : > { %2765 = vmatpush.xpose.msk.msra.mxu2 %vm4993_vm0, %v3390_v61 }
  0x74   : > { %584 = vmatmul.f32.gmra.mxu1 %v3146_v3  ;;  %1527 = vmatpush.msrb.mxu0 %v3241_v31 }
  0x75   : > { %616 = vmatmul.f32.gmra.mxu2 %v3288_v42  ;;  %710 = vmatmul.f32.gmra.mxu0 %v3291_v43 }
  0x76   : > { %1528 = vmatpush.msrb.mxu0 %v3252_v34  ;;  %744 = vmatpush.xpose.msra.mxu1 %v3400_v62 }
  0x77   : > { %2766 = vmatpush.xpose.msk.msra.mxu2 %vm4993_vm0, %v3402_v63  ;;  %678 = vmatmul.f32.gmra.mxu3 %v3165_v9 }
  0x78   : > { %1529 = vmatpush.msrb.mxu0 %v3264_v37 }
  0x7a   : > { %1530 = vmatpush.msrb.mxu0 %v3273_v39  ;;  %745 = vmatpush.xpose.msra.mxu1 %v3409_v35 }
  0x7b   : > { %2767 = vmatpush.xpose.msk.msra.mxu2 %vm4993_vm0, %v3411_v29 }
  0x7c   : > { %587 = vmatmul.f32.gmra.mxu1 %v3139_v1  ;;  %1531 = vmatpush.msrb.mxu0 %v3282_v41 }
  0x7d   : > { %619 = vmatmul.f32.gmra.mxu2 %v3277_v40  ;;  %713 = vmatmul.f32.gmra.mxu0 %v3282_v41 }
  0x7e   : > { %1532 = vmatpush.msrb.mxu0 %v3291_v43  ;;  %746 = vmatpush.xpose.msra.mxu1 %v3421_v25 }
  0x7f   : > { %2768 = vmatpush.xpose.msk.msra.mxu2 %vm4993_vm0, %v3423_v19  ;;  %681 = vmatmul.f32.gmra.mxu3 %v3155_v6 }
  0x80   : > { %1533 = vmatpush.msrb.mxu0 %v3300_v45 }
  0x82   : > { %1534 = vmatpush.msrb.mxu0 %v3309_v47  ;;  %747 = vmatpush.xpose.msra.mxu1 %v3430_v32 }
  0x83   : > { %2769 = vmatpush.xpose.msk.msra.mxu2 %vm4993_vm0, %v3432_v22 }
  0x84   : > { %716 = vmatmul.f32.vlgmr.msrb.gmra.mxu1 %v3273_v39  ;;  %1535 = vmatpush.msrb.mxu0 %v3318_v49 }
  0x85   : > { %622 = vmatmul.f32.gmra.mxu2 %v3270_v38 }
  0x86   : > { %1340 = vmatpush.msrb.mxu1 %v3139_v1 }
  0x87   : > { %1402 = vmatpush.msrb.mxu2 %v3225_v27 }
  0x88   : > { %1341 = vmatpush.msrb.mxu1 %v3146_v3 }
  0x89   : > { %1403 = vmatpush.msrb.mxu2 %v3235_v30 }
  0x8a   : > { %1342 = vmatpush.msrb.mxu1 %v3153_v5 }
  0x8b   : > { %1404 = vmatpush.msrb.mxu2 %v3248_v33 }
  0x8c   : > { %719 = vmatmul.f32.gmra.mxu1 %v3264_v37 }
  0x8d   : > { %625 = vmatmul.f32.gmra.mxu2 %v3258_v36  ;;  %1343 = vmatpush.msrb.mxu1 %v3162_v8 }
  0x8e   : > { %1405 = vmatpush.msrb.mxu2 %v3258_v36 }
  0x8f   : > { %1344 = vmatpush.msrb.mxu1 %v3172_v11 }
  0x90   : > { %1406 = vmatpush.msrb.mxu2 %v3270_v38 }
  0x91   : > { %1345 = vmatpush.msrb.mxu1 %v3182_v14 }
  0x92   : > { %1407 = vmatpush.msrb.mxu2 %v3277_v40 }
  0x93   : > { %1346 = vmatpush.msrb.mxu1 %v3192_v17 }
  0x94   : > { %722 = vmatmul.f32.gmra.mxu1 %v3252_v34  ;;  %1408 = vmatpush.msrb.mxu2 %v3288_v42 }
  0x95   : > { %628 = vmatmul.f32.gmra.mxu2 %v3248_v33  ;;  %1347 = vmatpush.msrb.mxu1 %v3202_v20 }
  0x96   : > { %1409 = vmatpush.msrb.mxu2 %v3295_v44 }
  0x97   : > { %1348 = vmatpush.msrb.mxu1 %v3212_v23 }
  0x98   : > { %1410 = vmatpush.msrb.mxu2 %v3306_v46 }
  0x99   : > { %1349 = vmatpush.msrb.mxu1 %v3222_v26 }
  0x9a   : > { %1411 = vmatpush.msrb.mxu2 %v3313_v48 }
  0x9c   : > { %725 = vmatmul.f32.gmra.mxu1 %v3241_v31 }
  0x9d   : > { %631 = vmatmul.f32.gmra.mxu2 %v3235_v30 }
  0xa4   : > { %728 = vmatmul.f32.gmra.mxu1 %v3227_v28 }
  0xa5   : > { %634 = vmatmul.f32.gmra.mxu2 %v3225_v27 }
  0xac   : > { %748 = vmatmul.f32.vlgmr.msra.gmra.mxu1 %v3430_v32 }
  0xad   : > { %2770 = vmatmul.msk.f32.vlgmr.msra.gmra.mxu2 %vm4993_vm0, %v3432_v22  ;;  %1588 = vmatpush.msra.mxu1 %v3337_v50 }
  0xae   : > { %1650 = vmatpush.msra.mxu2 %v3339_v51 }
  0xaf   : > { %1589 = vmatpush.msra.mxu1 %v3346_v52 }
  0xb0   : > { %1651 = vmatpush.msra.mxu2 %v3348_v53 }
  0xb1   : > { %v3474_v49 = vpop.f32.mrf.mxu1  ;;  %1590 = vmatpush.msra.mxu1 %v3358_v54 }
  0xb2   : > { %5017 = vst [vmem:[#allocation26_spill] sm:$0xff] %v3474_v49  ;;  %1652 = vmatpush.msra.mxu2 %v3360_v55 }
  0xb3   : > { %1591 = vmatpush.msra.mxu1 %v3367_v56 }
  0xb4   : > { %1653 = vmatpush.msra.mxu2 %v3369_v57  ;;  %751 = vmatmul.f32.gmra.mxu1 %v3421_v25 }
  0xb5   : > { %2771 = vmatmul.msk.f32.gmra.mxu2 %vm4993_vm0, %v3423_v19  ;;  %1592 = vmatpush.msra.mxu1 %v3379_v58 }
  0xb6   : > { %1654 = vmatpush.msra.mxu2 %v3381_v59 }
  0xb7   : > { %v3485_v45 = vpop.f32.mrf.mxu2  ;;  %1593 = vmatpush.msra.mxu1 %v3388_v60 }
  0xb8   : > { %1655 = vmatpush.msra.mxu2 %v3390_v61 }
  0xb9   : > { %v3489_v49 = vpop.f32.mrf.mxu1  ;;  %1594 = vmatpush.msra.mxu1 %v3400_v62 }
  0xba   : > { %5018 = vst [vmem:[#allocation27_spill] sm:$0xff] %v3489_v49  ;;  %1656 = vmatpush.msra.mxu2 %v3402_v63  ;;  %v3546_v49 = vpop.f32.mrf.mxu0 }
  0xbb   : > { %1595 = vmatpush.msra.mxu1 %v3409_v35  ;;  %5030 = vst [vmem:[#allocation39_spill] sm:$0xff] %v3546_v49 }
  0xbc   : > { %1657 = vmatpush.msra.mxu2 %v3411_v29  ;;  %754 = vmatmul.f32.gmra.mxu1 %v3409_v35 }
  0xbd   : > { %2772 = vmatmul.msk.f32.gmra.mxu2 %vm4993_vm0, %v3411_v29  ;;  %1596 = vmatpush.msra.mxu1 %v3421_v25 }
  0xbe   : > { %1658 = vmatpush.msra.mxu2 %v3423_v19 }
  0xbf   : > { %v3500_v48 = vpop.f32.mrf.mxu2  ;;  %1597 = vmatpush.msra.mxu1 %v3430_v32 }
  0xc0   : > { %5019 = vst [vmem:[#allocation28_spill] sm:$0xff] %v3500_v48  ;;  %1659 = vmatpush.msra.mxu2 %v3432_v22 }
  0xc1   : > { %v3504_v44 = vpop.f32.mrf.mxu1 }
  0xc2   : > { %5020 = vst [vmem:[#allocation29_spill] sm:$0xff] %v3504_v44 }
  0xc4   : > { %757 = vmatmul.f32.gmra.mxu1 %v3400_v62 }
  0xc5   : > { %2773 = vmatmul.msk.f32.gmra.mxu2 %vm4993_vm0, %v3402_v63 }
  0xc7   : > { %v3509_v35 = vpop.f32.mrf.mxu2 }
  0xc8   : > { %5021 = vst [vmem:[#allocation30_spill] sm:$0xff] %v3509_v35 }
  0xc9   : > { %v3511_v29 = vpop.f32.mrf.mxu1 }
  0xca   : > { %5022 = vst [vmem:[#allocation31_spill] sm:$0xff] %v3511_v29 }
  0xcc   : > { %760 = vmatmul.f32.gmra.mxu1 %v3388_v60 }
  0xcd   : > { %2774 = vmatmul.msk.f32.gmra.mxu2 %vm4993_vm0, %v3390_v61 }
  0xcf   : > { %v3516_v19 = vpop.f32.mrf.mxu2 }
  0xd0   : > { %5023 = vst [vmem:[#allocation32_spill] sm:$0xff] %v3516_v19  ;;  %v3557_v19 = vpop.f32.mrf.mxu0 }
  0xd1   : > { %v3518_v32 = vpop.f32.mrf.mxu1  ;;  %5034 = vst [vmem:[#allocation43_spill] sm:$0xff] %v3557_v19 }
  0xd4   : > { %763 = vmatmul.f32.gmra.mxu1 %v3379_v58 }
  0xd5   : > { %2775 = vmatmul.msk.f32.gmra.mxu2 %vm4993_vm0, %v3381_v59 }
  0xd7   : > { %v3523_v22 = vpop.f32.mrf.mxu2 }
  0xd8   : > { %5024 = vst [vmem:[#allocation33_spill] sm:$0xff] %v3523_v22 }
  0xd9   : > { %v3525_v44 = vpop.f32.mrf.mxu1 }
  0xdc   : > { %766 = vmatmul.f32.gmra.mxu1 %v3367_v56 }
  0xdd   : > { %2776 = vmatmul.msk.f32.gmra.mxu2 %vm4993_vm0, %v3369_v57 }
  0xdf   : > { %v3530_v25 = vpop.f32.mrf.mxu2 }
  0xe0   : > { %5025 = vst [vmem:[#allocation34_spill] sm:$0xff] %v3530_v25 }
  0xe1   : > { %v3532_v26 = vpop.f32.mrf.mxu1 }
  0xe2   : > { %5026 = vst [vmem:[#allocation35_spill] sm:$0xff] %v3532_v26  ;;  %v3578_v26 = vpop.f32.mrf.mxu3 }
  0xe3   : > { %5039 = vst [vmem:[#allocation48_spill] sm:$0xff] %v3578_v26 }
  0xe4   : > { %769 = vmatmul.f32.gmra.mxu1 %v3358_v54 }
  0xe5   : > { %2777 = vmatmul.msk.f32.gmra.mxu2 %vm4993_vm0, %v3360_v55 }
  0xe8   : > { %v3537_v20 = vpop.f32.mrf.mxu2 }
  0xe9   : > { %5027 = vst [vmem:[#allocation36_spill] sm:$0xff] %v3537_v20  ;;  %v3539_v47 = vpop.f32.mrf.mxu1 }
  0xea   : > { %5028 = vst [vmem:[#allocation37_spill] sm:$0xff] %v3539_v47  ;;  %v458_v47 = vadd.f32 %v3139_v1, %v3137_v0 }
  0xec   : > { %772 = vmatmul.f32.gmra.mxu1 %v3346_v52 }
  0xed   : > { %2778 = vmatmul.msk.f32.gmra.mxu2 %vm4993_vm0, %v3348_v53 }
  0xf0   : > { %v3544_v22 = vpop.f32.mrf.mxu2 }
  0xf1   : > { %5029 = vst [vmem:[#allocation38_spill] sm:$0xff] %v3544_v22  ;;  %v3548_v25 = vpop.f32.mrf.mxu1  ;;  %v3563_v22 = vpop.f32.mrf.mxu0 }
  0xf2   : > { %5031 = vst [vmem:[#allocation40_spill] sm:$0xff] %v3548_v25 }
  0xf3   : > { %5036 = vst [vmem:[#allocation45_spill] sm:$0xff] %v3563_v22  ;;  %v449_v22 = vadd.f32 %v3146_v3, %v3144_v2  ;;  %v440_v2 = vadd.f32 %v3153_v5, %v3151_v4  ;;  %v413_v3 = vadd.f32 %v3182_v14, %v3180_v13  ;;  %v454_v5 = vsel %vm4993_vm0, %v3348_v53, 0.0 }
  0xf4   : > { %775 = vmatmul.f32.gmra.mxu1 %v3337_v50  ;;  %v422_v14 = vadd.f32 %v3172_v11, %v3170_v10 }
  0xf5   : > { %2779 = vmatmul.msk.f32.gmra.mxu2 %vm4993_vm0, %v3339_v51  ;;  %v450_v0 = vadd.f32 %v449_v22, %v3235_v30 }
  0xf8   : > { %v3553_v29 = vpop.f32.mrf.mxu2 }
  0xf9   : > { %5032 = vst [vmem:[#allocation41_spill] sm:$0xff] %v3553_v29  ;;  %v3555_v20 = vpop.f32.mrf.mxu1  ;;  %v3571_v35 = vpop.f32.mrf.mxu0 }
  0xfa   : > { %5033 = vst [vmem:[#allocation42_spill] sm:$0xff] %v3555_v20  ;;  %v459_v20 = vadd.f32 %v458_v47, %v3225_v27  ;;  %v463_v47 = vsel %vm4993_vm0, %v3339_v51, 0.0 }
  0xfb   : > { %5038 = vst [vmem:[#allocation47_spill] sm:$0xff] %v3571_v35 }
 0x100   : > { %v3559_v46 = vpop.f32.mrf.mxu2 }
 0x101   : > { %v3561_v23 = vpop.f32.mrf.mxu1  ;;  %v3588_v35 = vpop.f32.mrf.mxu0 }
 0x102   : > { %5035 = vst [vmem:[#allocation44_spill] sm:$0xff] %v3561_v23  ;;  %v460_v23 = vadd.f32 %v459_v20, %v3155_v6  ;;  %v3598_v6 = vpop.f32.mrf.mxu3  ;;  %v451_v20 = vadd.f32 %v450_v0, %v3165_v9  ;;  %v431_v9 = vadd.f32 %v3162_v8, %v3160_v7  ;;  %v423_v7 = vadd.f32 %v422_v14, %v3270_v38 }
 0x104   : > { %v452_v22 = vadd.f32 %v451_v20, %v3241_v31  ;;  %v432_v53 = vadd.f32 %v431_v9, %v3258_v36  ;;  %v404_v36 = vadd.f32 %v3192_v17, %v3190_v16 }
 0x106   : > { %v453_v30 = vadd.f32 %v452_v22, %v3346_v52  ;;  %v433_v38 = vadd.f32 %v432_v53, %v3185_v15  ;;  %v436_v15 = vsel %vm4993_vm0, %v3369_v57, 0.0  ;;  %v409_v57 = vsel %vm4993_vm0, %v3402_v63, 0.0 }
 0x108   : > { %v3565_v49 = vpop.f32.mrf.mxu2  ;;  %v455_v13 = vadd.f32 %v454_v5, %v453_v30 }
 0x109   : > { %v3567_v25 = vpop.f32.mrf.mxu1 }
 0x10a   : > { %5037 = vst [vmem:[#allocation46_spill] sm:$0xff] %v3567_v25  ;;  %v461_v25 = vadd.f32 %v460_v23, %v3227_v28  ;;  %v414_v28 = vadd.f32 %v413_v3, %v3277_v40 }
 0x10c   : > { %v462_v1 = vadd.f32 %v461_v25, %v3337_v50  ;;  %v441_v25 = vadd.f32 %v440_v2, %v3248_v33  ;;  %v3607_v50 = vpop.f32.mrf.mxu0  ;;  %v415_v31 = vadd.f32 %v414_v28, %v3205_v21  ;;  %v3619_v33 = vpop.f32.mrf.mxu3  ;;  %v418_v21 = vsel %vm4993_vm0, %v3390_v61, 0.0 }
 0x10d   : > { %v405_v61 = vadd.f32 %v404_v36, %v3288_v42 }
 0x10e   : > { %v464_v26 = vadd.f32 %v463_v47, %v462_v1  ;;  %v416_v51 = vadd.f32 %v415_v31, %v3282_v41 }
 0x10f   : > { %v406_v42 = vadd.f32 %v405_v61, %v3215_v24 }
 0x110   : > { %v3573_v29 = vpop.f32.mrf.mxu2  ;;  %465 = vadd.xlane.f32.xlu0 %v464_v26  ;;  %v442_v26 = vadd.f32 %v441_v25, %v3175_v12  ;;  %v417_v10 = vadd.f32 %v416_v51, %v3388_v60  ;;  %v445_v12 = vsel %vm4993_vm0, %v3360_v55, 0.0  ;;  %v434_v60 = vadd.f32 %v433_v38, %v3264_v37 }
 0x111   : > { %v3576_v19 = vpop.f32.mrf.mxu1 }
 0x112   : > { %v443_v40 = vadd.f32 %v442_v26, %v3252_v34  ;;  %v419_v41 = vadd.f32 %v418_v21, %v417_v10  ;;  %v435_v2 = vadd.f32 %v434_v60, %v3367_v56  ;;  %v407_v56 = vadd.f32 %v406_v42, %v3291_v43 }
 0x113   : > { %v574_v43 = vadd.f32 %v3518_v32, %v3588_v35 }
 0x114   : > { %v444_v8 = vadd.f32 %v443_v40, %v3358_v54  ;;  %v3635_v0 = vpop.f32.mrf.mxu0  ;;  %v424_v54 = vadd.f32 %v423_v7, %v3195_v18  ;;  %v3646_v47 = vpop.f32.mrf.mxu3  ;;  %v427_v18 = vsel %vm4993_vm0, %v3381_v59, 0.0  ;;  %v437_v37 = vadd.f32 %v436_v15, %v435_v2 }
 0x115   : > { %v621_v5 = vadd.f32 %v3559_v46, %v574_v43  ;;  %v577_v40 = vadd.f32 %v3525_v44, %v3485_v45  ;;  %v5041_v44 = vld [vmem:[#allocation35_spill] sm:$0xff] }
 0x116   : > { %v446_v34 = vadd.f32 %v445_v12, %v444_v8  ;;  %v425_v55 = vadd.f32 %v424_v54, %v3273_v39  ;;  %438 = vadd.xlane.f32.xlu2 %v437_v37  ;;  %v5042_v54 = vld [vmem:[#allocation44_spill] sm:$0xff]  ;;  %v5043_v37 = vld [vmem:[#allocation30_spill] sm:$0xff] }
 0x117   : > { %v624_v32 = vadd.f32 %v3565_v49, %v577_v40 }
 0x118   : > { %v3584_v48 = vpop.f32.mrf.mxu2  ;;  %456 = vadd.xlane.f32.xlu0 %v455_v13  ;;  %447 = vadd.xlane.f32.xlu1 %v446_v34  ;;  %v426_v16 = vadd.f32 %v425_v55, %v3379_v58  ;;  %v408_v58 = vadd.f32 %v407_v56, %v3400_v62  ;;  %v826_v13 = vlaneseq  ;;  %v5040_v34 = vld [vmem:[#allocation28_spill] sm:$0xff] }
 0x119   : > { %v3590_v27 = vpop.f32.mrf.mxu1  ;;  %v580_v45 = vadd.f32 %v5041_v44, %v5040_v34 }
 0x11a   : > { %v428_v39 = vadd.f32 %v427_v18, %v426_v16  ;;  %v410_v25 = vadd.f32 %v409_v57, %v408_v58  ;;  %v3678_v31 = vshrl.u32 %v826_v13, 7  ;;  %v3686_v35 = vand.u32 127, %v826_v13  ;;  %v5045_v57 = vld [vmem:[#allocation7_spill] sm:$0xff] }
 0x11b   : > { %v627_v38 = vadd.f32 %v3573_v29, %v580_v45 }
 0x11c   : > { %v3657_v3 = vpop.f32.mrf.mxu0  ;;  %v667_v59 = vpop.f32.mrf.mxu3  ;;  %v3683_v51 = vadd.s32 32, %v3678_v31  ;;  %v3700_v36 = vadd.s32 40, %v3678_v31  ;;  %v3716_v58 = vadd.s32 48, %v3678_v31  ;;  %v3735_v34 = vadd.s32 56, %v3678_v31 }
 0x11d   : > { %v668_v14 = vadd.f32 %v667_v59, %v621_v5  ;;  %v5046_v59 = vld [vmem:[#allocation8_spill] sm:$0xff]  ;;  %v5047_v5 = vld [vmem:[#allocation46_spill] sm:$0xff]  ;;  %vm4995_vm11 = vcmp.eq.s32.totalorder %v3678_v31, %v3686_v35 }
 0x11e   : > { %411 = vadd.xlane.f32.xlu2 %v410_v25  ;;  %vm843_vm1 = vcmp.eq.s32.totalorder %v3683_v51, %v3686_v35  ;;  %vm844_vm3 = vcmp.eq.s32.totalorder %v3700_v36, %v3686_v35  ;;  %v386_v25 = vadd.f32 %v5046_v59, %v5045_v57  ;;  %vm845_vm4 = vcmp.eq.s32.totalorder %v3716_v58, %v3686_v35  ;;  %v5059_v59 = vld [vmem:[#allocation33_spill] sm:$0xff]  ;;  %v361_v58 = vld [vmem:[%s4020_s28] sm:$0xff] }
 0x11f   : > { %vm846_vm5 = vcmp.eq.s32.totalorder %v3735_v34, %v3686_v35 }
 0x120   : > { %v3602_v23 = vpop.f32.mrf.mxu2  ;;  %420 = vadd.xlane.f32.xlu0 %v419_v41  ;;  %429 = vadd.xlane.f32.xlu1 %v428_v39  ;;  %v5044_v39 = vld [vmem:[#allocation37_spill] sm:$0xff] }
 0x121   : > { %v3609_v4 = vpop.f32.mrf.mxu1  ;;  %v583_v42 = vadd.f32 %v5044_v39, %v5043_v37  ;;  %v5056_v37 = vld [vmem:[#allocation41_spill] sm:$0xff] }
 0x123   : > { %v630_v43 = vadd.f32 %v3584_v48, %v583_v42 }
 0x124   : > { %v3667_v28 = vpop.f32.mrf.mxu0  ;;  %v670_v62 = vpop.f32.mrf.mxu3 }
 0x125   : > { %v671_v10 = vadd.f32 %v670_v62, %v624_v32 }
 0x127   : > { %v718_v60 = vadd.f32 %v5042_v54, %v671_v10  ;;  %v5053_v54 = vld [vmem:[#allocation31_spill] sm:$0xff] }
 0x128   : > { %v3623_v52 = vpop.f32.mrf.mxu2 }
 0x129   : > { %v3629_v11 = vpop.f32.mrf.mxu1 }
 0x12c   : > { %v714_v63 = vpop.f32.mrf.mxu0  ;;  %v673_v46 = vpop.f32.mrf.mxu3 }
 0x12d   : > { %v715_v53 = vadd.f32 %v714_v63, %v668_v14  ;;  %v674_v2 = vadd.f32 %v673_v46, %v627_v38  ;;  %v5048_v63 = vld [vmem:[#allocation16_spill] sm:$0xff]  ;;  %v5052_v38 = vld [vmem:[#allocation47_spill] sm:$0xff] }
 0x12e   : > { %v5049_v46 = vld [vmem:[#allocation32_spill] sm:$0xff] }
 0x12f   : > { %v721_v62 = vadd.f32 %v5047_v5, %v674_v2  ;;  %v5055_v2 = vld [vmem:[#allocation27_spill] sm:$0xff] }
 0x130   : > { %v3643_v1 = vpop.f32.mrf.mxu2 }
 0x131   : > { %v3650_v17 = vpop.f32.mrf.mxu1 }
 0x134   : > { %v676_v16 = vpop.f32.mrf.mxu3 }
 0x135   : > { %v677_v40 = vadd.f32 %v676_v16, %v630_v43 }
 0x137   : > { %v724_v45 = vadd.f32 %v3576_v19, %v677_v40  ;;  %v5057_v19 = vld [vmem:[#allocation17_spill] sm:$0xff] }
 0x138   : > { %v3660_v20 = vpop.f32.mrf.mxu2 }
 0x139   : > { %v3663_v22 = vpop.f32.mrf.mxu1 }
 0x13c   : > { %v679_v10 = vpop.f32.mrf.mxu3 }
 0x140   : > { %v3669_v30 = vpop.f32.mrf.mxu2 }
 0x141   : > { %v3671_v24 = vpop.f32.mrf.mxu1 }
 0x148   : > { %v3676_v9 = vpop.f32.mrf.mxu2 }
 0x149   : > { %v761_v26 = vpop.f32.mrf.mxu1 }
 0x14a   : > { %v762_v7 = vadd.f32 %v761_v26, %v715_v53  ;;  %v387_v26 = vadd.f32 %v386_v25, %v5048_v63  ;;  %v5060_v25 = vld [vmem:[#allocation42_spill] sm:$0xff] }
 0x14b   : > { %v589_v43 = vadd.f32 %v5060_v25, %v5059_v59  ;;  %v5069_v59 = vld [vmem:[#allocation11_spill] sm:$0xff] }
 0x150   : > { %v808_v8 = vpop.f32.mrf.mxu2 }
 0x151   : > { %v3690_v12 = vadd.f32 %v808_v8, %v762_v7  ;;  %v764_v21 = vpop.f32.mrf.mxu1  ;;  %v5050_v7 = vld [vmem:[#allocation40_spill] sm:$0xff] }
 0x152   : > { %v765_v55 = vadd.f32 %v764_v21, %v718_v60  ;;  %v586_v8 = vadd.f32 %v5050_v7, %v5049_v46  ;;  %v571_v60 = vadd.f32 %v5053_v54, %v5052_v38  ;;  %v5063_v46 = vld [vmem:[#allocation9_spill] sm:$0xff]  ;;  %v5064_v7 = vld [vmem:[#allocation10_spill] sm:$0xff] }
 0x153   : > { %v853_v49 = vsel %vm843_vm1, %v3690_v12, 0.0  ;;  %v5067_v54 = vld [vmem:[#allocation14_spill] sm:$0xff] }
 0x154   : > { %v872_v41 = vsel %vm4994_vm2, %v853_v49, 0.0  ;;  %v633_v44 = vadd.f32 %v3602_v23, %v586_v8  ;;  %v5051_v49 = vld [vmem:[#allocation12_spill] sm:$0xff]  ;;  %v618_v39 = vadd.f32 %v5056_v37, %v571_v60  ;;  %v376_v8 = vadd.f32 %v5064_v7, %v5063_v46  ;;  %v5074_v46 = vld [vmem:[#allocation15_spill] sm:$0xff] }
 0x155   : > { %873 = vadd.xlane.f32.xlu0 %v872_v41  ;;  %v388_v41 = vadd.f32 %v387_v26, %v5051_v49  ;;  %v636_v26 = vadd.f32 %v3623_v52, %v589_v43  ;;  %v3781_v37 = vadd.s32 24, %v3678_v31  ;;  %v5070_v43 = vld [vmem:[#allocation13_spill] sm:$0xff] }
 0x156   : > { %v680_v42 = vadd.f32 %v679_v10, %v633_v44  ;;  %v665_v10 = vadd.f32 %v3646_v47, %v618_v39  ;;  %v5065_v44 = vld [vmem:[#allocation22_spill] sm:$0xff] }
 0x157   : > { %v5068_v47 = vld [vmem:[#allocation18_spill] sm:$0xff]  ;;  %vm842_vm7 = vcmp.eq.s32.totalorder %v3781_v37, %v3686_v35  ;;  %v3038_v37 = vld [vmem:[#allocation2 + $0x210] sm:$0xff] }
 0x158   : > { %v811_v61 = vpop.f32.mrf.mxu2 }
 0x159   : > { %v3706_v15 = vadd.f32 %v811_v61, %v765_v55  ;;  %v767_v18 = vpop.f32.mrf.mxu1  ;;  %v5054_v61 = vld [vmem:[#allocation43_spill] sm:$0xff] }
 0x15a   : > { %v768_v13 = vadd.f32 %v767_v18, %v721_v62  ;;  %v565_v16 = vadd.f32 %v5055_v2, %v5054_v61  ;;  %v377_v2 = vadd.f32 %v376_v8, %v5068_v47  ;;  %v5075_v8 = vld [vmem:[#allocation19_spill] sm:$0xff]  ;;  %v5079_v47 = vld [vmem:[#allocation25_spill] sm:$0xff] }
 0x15b   : > { %v854_v29 = vsel %vm844_vm3, %v3706_v15, 0.0 }
 0x15c   : > { %v875_v56 = vsel %vm4994_vm2, %v854_v29, 0.0  ;;  %v389_v29 = vadd.f32 %v388_v41, %v5057_v19  ;;  %v5066_v41 = vld [vmem:[#allocation23_spill] sm:$0xff]  ;;  %v3789_v19 = vadd.s32 8, %v3678_v31 }
 0x15d   : > { %876 = vadd.xlane.f32.xlu1 %v875_v56  ;;  %v5058_v56 = vld [vmem:[#allocation36_spill] sm:$0xff]  ;;  %v391_v52 = vsel %vm4993_vm0, %v5066_v41, 0.0 }
 0x15e   : > { %v612_v57 = vadd.f32 %v5058_v56, %v565_v16  ;;  %vm840_vm8 = vcmp.eq.s32.totalorder %v3789_v19, %v3686_v35  ;;  %v3042_v19 = vld [vmem:[#allocation2 + $0x130] sm:$0xff] }
 0x160   : > { %v814_v14 = vpop.f32.mrf.mxu2  ;;  %v659_v49 = vadd.f32 %v3598_v6, %v612_v57  ;;  %v3795_v57 = vadd.s32 72, %v3678_v31 }
 0x161   : > { %v3725_v53 = vadd.f32 %v814_v14, %v768_v13  ;;  %v770_v32 = vpop.f32.mrf.mxu1  ;;  %v5061_v13 = vld [vmem:[#allocation5_spill] sm:$0xff]  ;;  %v5062_v14 = vld [vmem:[#allocation6_spill] sm:$0xff] }
 0x162   : > { %v771_v55 = vadd.f32 %v770_v32, %v724_v45  ;;  %v395_v63 = vadd.f32 %v5062_v14, %v5061_v13  ;;  %v3762_v32 = vadd.s32 64, %v3678_v31  ;;  %v390_v45 = vadd.f32 %v389_v29, %v5065_v44  ;;  %v5072_v13 = vld [vmem:[#allocation29_spill] sm:$0xff] }
 0x163   : > { %v855_v48 = vsel %vm845_vm4, %v3725_v53, 0.0  ;;  %v706_v6 = vadd.f32 %v3635_v0, %v659_v49  ;;  %vm848_vm9 = vcmp.eq.s32.totalorder %v3795_v57, %v3686_v35 }
 0x164   : > { %v878_v21 = vsel %vm4994_vm2, %v855_v48, 0.0  ;;  %v682_v48 = vpop.f32.mrf.mxu3  ;;  %v396_v60 = vadd.f32 %v395_v63, %v5067_v54  ;;  %vm847_vm6 = vcmp.eq.s32.totalorder %v3762_v32, %v3686_v35  ;;  %v5077_v54 = vld [vmem:[#allocation24_spill] sm:$0xff] }
 0x165   : > { %879 = vadd.xlane.f32.xlu2 %v878_v21  ;;  %v727_v21 = vadd.f32 %v3590_v27, %v680_v42  ;;  %v712_v27 = vadd.f32 %v3667_v28, %v665_v10  ;;  %v753_v28 = vadd.f32 %v3650_v17, %v706_v6 }
 0x166   : > { %v397_v25 = vadd.f32 %v396_v60, %v5069_v59  ;;  %v5083_v59 = vld [vmem:[#allocation48_spill] sm:$0xff] }
 0x167   : > { %v759_v39 = vadd.f32 %v3671_v24, %v712_v27  ;;  %v5080_v27 = vld [vmem:[#allocation39_spill] sm:$0xff] }
 0x168   : > { %v817_v18 = vpop.f32.mrf.mxu2  ;;  %v398_v7 = vadd.f32 %v397_v25, %v5074_v46 }
 0x169   : > { %v3747_v23 = vadd.f32 %v817_v18, %v771_v55  ;;  %v773_v5 = vpop.f32.mrf.mxu1  ;;  %v683_v55 = vadd.f32 %v682_v48, %v636_v26  ;;  %v392_v18 = vadd.f32 %v391_v52, %v390_v45  ;;  %v3798_v24 = vadd.f32 %v3676_v9, %v759_v39  ;;  %v5073_v9 = vld [vmem:[#allocation38_spill] sm:$0xff]  ;;  %v5076_v52 = vld [vmem:[#allocation20_spill] sm:$0xff] }
 0x16a   : > { %v774_v38 = vadd.f32 %v773_v5, %v727_v21  ;;  %v378_v5 = vadd.f32 %v377_v2, %v5070_v43  ;;  %v382_v2 = vsel %vm4993_vm0, %v5079_v47, 0.0  ;;  %v5082_v39 = vld [vmem:[#allocation34_spill] sm:$0xff] }
 0x16b   : > { %v856_v62 = vsel %vm846_vm5, %v3747_v23, 0.0  ;;  %v730_v29 = vadd.f32 %v3609_v4, %v683_v55  ;;  %v3805_v4 = vadd.f32 %v3660_v20, %v753_v28  ;;  %v852_v20 = vsel %vm842_vm7, %v3798_v24, 0.0  ;;  %v5078_v55 = vld [vmem:[#allocation21_spill] sm:$0xff] }
 0x16c   : > { %v881_v40 = vsel %vm4994_vm2, %v856_v62, 0.0  ;;  %v5071_v62 = vld [vmem:[#allocation45_spill] sm:$0xff]  ;;  %v379_v10 = vadd.f32 %v378_v5, %v5075_v8  ;;  %v869_v45 = vsel %vm4994_vm2, %v852_v20, 0.0 }
 0x16d   : > { %882 = vadd.xlane.f32.xlu0 %v881_v40  ;;  %v568_v17 = vadd.f32 %v5072_v13, %v5071_v62  ;;  %v850_v48 = vsel %vm840_vm8, %v3805_v4, 0.0 }
 0x16e   : > { %v863_v41 = vsel %vm4994_vm2, %v850_v48, 0.0  ;;  %v380_v60 = vadd.f32 %v379_v10, %v5077_v54  ;;  %v3093_v10 = vmov 0  }
 0x16f   : > { %v615_v63 = vadd.f32 %v5073_v9, %v568_v17  ;;  %2987 = vset.pattern.permute.xlu2 %v3093_v10  ;;  %2986 = vset.pattern.permute.xlu1 %v3093_v10 }
 0x170   : > { %v820_v61 = vpop.f32.mrf.mxu2  ;;  %2985 = vset.pattern.permute.xlu0 %v3093_v10 }
 0x171   : > { %v3777_v16 = vadd.f32 %v820_v61, %v774_v38  ;;  %v776_v56 = vpop.f32.mrf.mxu1  ;;  %v662_v49 = vadd.f32 %v3619_v33, %v615_v63  ;;  %v399_v38 = vadd.f32 %v398_v7, %v5076_v52  ;;  %v400_v61 = vsel %vm4993_vm0, %v5078_v55, 0.0 }
 0x172   : > { %v777_v14 = vadd.f32 %v776_v56, %v730_v29  ;;  %v383_v29 = vadd.f32 %v382_v2, %v380_v60  ;;  %v3845_v56 = vadd.s32 16, %v3678_v31 }
 0x173   : > { %v857_v42 = vsel %vm847_vm6, %v3777_v16, 0.0  ;;  %v401_v28 = vadd.f32 %v400_v61, %v399_v38 }
 0x174   : > { %v884_v0 = vsel %vm4994_vm2, %v857_v42, 0.0  ;;  %v709_v42 = vadd.f32 %v3657_v3, %v662_v49  ;;  %vm841_vm10 = vcmp.eq.s32.totalorder %v3845_v56, %v3686_v35  ;;  %v3039_v56 = vld [vmem:[#allocation2 + $0x1d8] sm:$0xff] }
 0x175   : > { %885 = vadd.xlane.f32.xlu2 %v884_v0  ;;  %393 = vadd.xlane.f32.xlu0 %v392_v18  ;;  %v5081_v18 = vld [vmem:[#allocation26_spill] sm:$0xff] }
 0x176   : > { %v562_v6 = vadd.f32 %v5081_v18, %v5080_v27  ;;  %v756_v0 = vadd.f32 %v3663_v22, %v709_v42 }
 0x178   : > { %v823_v26 = vpop.f32.mrf.mxu2  ;;  %v609_v33 = vadd.f32 %v5082_v39, %v562_v6  ;;  %v3850_v43 = vadd.f32 %v3669_v30, %v756_v0 }
 0x179   : > { %v3814_v40 = vadd.f32 %v823_v26, %v777_v14 }
 0x17a   : > { %v656_v25 = vadd.f32 %v5083_v59, %v609_v33  ;;  %v851_v3 = vsel %vm841_vm10, %v3850_v43, 0.0 }
 0x17b   : > { %v858_v21 = vsel %vm848_vm9, %v3814_v40, 0.0  ;;  %v866_v22 = vsel %vm4994_vm2, %v851_v3, 0.0 }
 0x17c   : > { %v887_v44 = vsel %vm4994_vm2, %v858_v21, 0.0  ;;  %v703_v5 = vadd.f32 %v3607_v50, %v656_v25 }
 0x17d   : > { %888 = vadd.xlane.f32.xlu1 %v887_v44  ;;  %870 = vadd.xlane.f32.xlu2 %v869_v45 }
 0x17e   : > { %864 = vadd.xlane.f32.xlu0 %v863_v41  ;;  %v750_v62 = vadd.f32 %v3629_v11, %v703_v5 }
 0x180   : > { %v3862_v13 = vadd.f32 %v3643_v1, %v750_v62 }
 0x182   : > { %v849_v50 = vsel %vm4995_vm11, %v3862_v13, 0.0 }
 0x183   : > { %v860_v30 = vsel %vm4994_vm2, %v849_v50, 0.0  ;;  %v3871_v17 = vpop.xlane.xlu0 %465 }
 0x185   : > { %402 = vadd.xlane.f32.xlu1 %v401_v28  ;;  %384 = vadd.xlane.f32.xlu2 %v383_v29 }
 0x189   : > { %v3875_v14 = vpop.xlane.xlu2 %438 }
 0x18a   : > { %v896_v46 = vmul.f32 0.0012755102, %v3875_v14 }
 0x18b   : > { %v3873_v11 = vpop.xlane.xlu0 %456  ;;  %v3879_v9 = vpop.xlane.xlu1 %447 }
 0x18c   : > { %v916_v48 = vmul.f32 %v896_v46, %v896_v46  ;;  %v897_v38 = vmul.f32 0.0012755102, %v3879_v9  ;;  %v898_v33 = vmul.f32 0.0012755102, %v3873_v11 }
 0x18d   : > { %867 = vadd.xlane.f32.xlu1 %v866_v22 }
 0x18e   : > { %v917_v61 = vmul.f32 %v897_v38, %v897_v38  ;;  %v918_v3 = vmul.f32 %v898_v33, %v898_v33 }
 0x191   : > { %v3881_v63 = vpop.xlane.xlu2 %411 }
 0x193   : > { %v3877_v1 = vpop.xlane.xlu0 %420  ;;  %v3885_v21 = vpop.xlane.xlu1 %429 }
 0x194   : > { %v894_v26 = vmul.f32 0.0012755102, %v3877_v1  ;;  %v895_v60 = vmul.f32 0.0012755102, %v3885_v21 }
 0x195   : > { %861 = vadd.xlane.f32.xlu1 %v860_v30  ;;  %v899_v30 = vmul.f32 0.0012755102, %v3871_v17 }
 0x196   : > { %v914_v7 = vmul.f32 %v894_v26, %v894_v26  ;;  %v915_v18 = vmul.f32 %v895_v60, %v895_v60  ;;  %v893_v26 = vmul.f32 0.0012755102, %v3881_v63 }
 0x197   : > { %v919_v38 = vmul.f32 %v899_v30, %v899_v30 }
 0x198   : > { %v913_v60 = vmul.f32 %v893_v26, %v893_v26 }
 0x1c8   : > { %v874_v20 = vpop.xlane.xlu0 %873 }
 0x1c9   : > { %v904_v8 = vmul.f32 0.0012755102, %v874_v20 }
 0x1cb   : > { %v924_v44 = vsub.f32 %v904_v8, %v914_v7 }
 0x1cd   : > { %v3887_v52 = vadd.f32 1e-05, %v924_v44 }
 0x1cf   : > { %vm996_vm0 = vweird.f32 %v3887_v52 }
 0x1d0   : > { %v877_v47 = vpop.xlane.xlu1 %876 }
 0x1d1   : > { %v905_v6 = vmul.f32 0.0012755102, %v877_v47 }
 0x1d3   : > { %v925_v0 = vsub.f32 %v905_v6, %v915_v18 }
 0x1d5   : > { %v3901_v46 = vadd.f32 1e-05, %v925_v0 }
 0x1d8   : > { %v880_v45 = vpop.xlane.xlu2 %879 }
 0x1d9   : > { %v906_v49 = vmul.f32 0.0012755102, %v880_v45 }
 0x1db   : > { %v926_v41 = vsub.f32 %v906_v49, %v916_v48  ;;  %v936_v49 = vld [vmem:[%s4968_s2 + $0x30] sm:$0xff] }
 0x1dd   : > { %v946_v54 = vadd.f32 1e-05, %v926_v41 }
 0x1df   : > { %2988 = vrsqrt.f32 %v946_v54  ;;  %vm1016_vm13 = vweird.f32 %v946_v54 }
 0x1e0   : > { %2990 = vrsqrt.f32 %v3887_v52  ;;  %v883_v55 = vpop.xlane.xlu0 %882 }
 0x1e1   : > { %v907_v2 = vmul.f32 0.0012755102, %v883_v55 }
 0x1e3   : > { %v927_v27 = vsub.f32 %v907_v2, %v917_v61 }
 0x1e5   : > { %v2989_v39 = vpop.eup %2988  ;;  %v947_v42 = vadd.f32 1e-05, %v927_v27 }
 0x1e6   : > { %v3893_v28 = vpop.eup %2990  ;;  %v1011_v29 = vmul.f32 %v2989_v39, %v946_v54  ;;  %vm1017_vm12 = vweird.f32 %v2989_v39 }
 0x1e7   : > { %2992 = vrsqrt.f32 %v947_v42  ;;  %v991_v62 = vmul.f32 %v3893_v28, %v3887_v52  ;;  %vm1018_vm14 = vmor %vm1016_vm13, %vm1017_vm12  ;;  %vm1026_vm12 = vweird.f32 %v947_v42 }
 0x1e8   : > { %v1012_v59 = vmul.f32 %v2989_v39, %v1011_v29  ;;  %v886_v25 = vpop.xlane.xlu2 %885  ;;  %v3895_v5 = vpop.xlane.xlu0 %393 }
 0x1e9   : > { %v908_v22 = vmul.f32 0.0012755102, %v886_v25  ;;  %v891_v8 = vmul.f32 0.0012755102, %v3895_v5  ;;  %v992_v48 = vmul.f32 %v3893_v28, %v991_v62 }
 0x1ea   : > { %v1013_v50 = vmul.f32 0.5, %v1012_v59 }
 0x1eb   : > { %v928_v20 = vsub.f32 %v908_v22, %v918_v3  ;;  %v911_v61 = vmul.f32 %v891_v8, %v891_v8  ;;  %v993_v18 = vmul.f32 0.5, %v992_v48  ;;  %v937_v48 = vld [vmem:[%s4968_s2 + $0x38] sm:$0xff] }
 0x1ec   : > { %v1014_v7 = vsub.f32 1.5, %v1013_v50 }
 0x1ed   : > { %v2993_v10 = vpop.eup %2992  ;;  %v3905_v44 = vadd.f32 1e-05, %v928_v20  ;;  %v994_v30 = vsub.f32 1.5, %v993_v18 }
 0x1ee   : > { %v1021_v45 = vmul.f32 %v2993_v10, %v947_v42  ;;  %v1015_v41 = vmul.f32 %v2989_v39, %v1014_v7  ;;  %vm1027_vm15 = vweird.f32 %v2993_v10 }
 0x1ef   : > { %2994 = vrsqrt.f32 %v3905_v44  ;;  %vm1028_vm13 = vmor %vm1026_vm12, %vm1027_vm15 }
 0x1f0   : > { %2996 = vrsqrt.f32 %v3901_v46  ;;  %v1022_v55 = vmul.f32 %v2993_v10, %v1021_v45  ;;  %v889_v47 = vpop.xlane.xlu1 %888  ;;  %v871_v2 = vpop.xlane.xlu2 %870  ;;  %v1019_v27 = vsel %vm1018_vm14, %v2989_v39, %v1015_v41  ;;  %vm997_vm14 = vweird.f32 %v3893_v28 }
 0x1f1   : > { %v909_v54 = vmul.f32 0.0012755102, %v889_v47  ;;  %v903_v6 = vmul.f32 0.0012755102, %v871_v2  ;;  %v865_v33 = vpop.xlane.xlu0 %864  ;;  %v1056_v29 = vmul.f32 %v1019_v27, %v936_v49  ;;  %vm3934_vm12 = vmor %vm996_vm0, %vm997_vm14  ;;  %vm1036_vm0 = vweird.f32 %v3905_v44 }
 0x1f2   : > { %v1023_v0 = vmul.f32 0.5, %v1022_v55  ;;  %v901_v59 = vmul.f32 0.0012755102, %v865_v33  ;;  %v995_v55 = vmul.f32 %v3893_v28, %v994_v30 }
 0x1f3   : > { %v929_v25 = vsub.f32 %v909_v54, %v919_v38  ;;  %v923_v3 = vsub.f32 %v903_v6, %v913_v60  ;;  %1092 = vperm.xlu2 %2987, %v1056_v29   ;;  %v934_v54 = vld [vmem:[%s4968_s2 + $0x20] sm:$0xff] }
 0x1f4   : > { %v1024_v62 = vsub.f32 1.5, %v1023_v0  ;;  %v921_v22 = vsub.f32 %v901_v59, %v911_v61  ;;  %v999_v52 = vsel %vm3934_vm12, %v3893_v28, %v995_v55  ;;  %v938_v29 = vld [vmem:[%s4968_s2 + $0x40] sm:$0xff] }
 0x1f5   : > { %v2995_v50 = vpop.eup %2994  ;;  %v3912_v26 = vadd.f32 1e-05, %v929_v25  ;;  %v3914_v20 = vadd.f32 1e-05, %v923_v3  ;;  %v1054_v30 = vmul.f32 %v999_v52, %v934_v54  ;;  %v939_v54 = vld [vmem:[%s4968_s2 + $0x48] sm:$0xff] }
 0x1f6   : > { %v3916_v39 = vpop.eup %2996  ;;  %v1031_v7 = vmul.f32 %v2995_v50, %v3905_v44  ;;  %v3919_v8 = vadd.f32 1e-05, %v921_v22  ;;  %v1025_v45 = vmul.f32 %v2993_v10, %v1024_v62  ;;  %vm1037_vm15 = vweird.f32 %v2995_v50 }
 0x1f7   : > { %2998 = vrsqrt.f32 %v3912_v26  ;;  %v1001_v42 = vmul.f32 %v3916_v39, %v3901_v46  ;;  %vm1007_vm11 = vweird.f32 %v3916_v39 }
 0x1f8   : > { %v1032_v49 = vmul.f32 %v2995_v50, %v1031_v7  ;;  %3000 = vrsqrt.f32 %v3914_v20  ;;  %v3926_v41 = vpop.xlane.xlu1 %402  ;;  %v1029_v38 = vsel %vm1028_vm13, %v2993_v10, %v1025_v45  ;;  %vm1038_vm13 = vmor %vm1036_vm0, %vm1037_vm15  ;;  %v3954_v28 = vpop.xlane.xlu2 %384  ;;  %vm1046_vm15 = vweird.f32 %v3912_v26 }
 0x1f9   : > { %3002 = vrsqrt.f32 %v3919_v8  ;;  %v1057_v60 = vmul.f32 %v1029_v38, %v937_v48  ;;  %v1002_v27 = vmul.f32 %v3916_v39, %v1001_v42  ;;  %v892_v18 = vmul.f32 0.0012755102, %v3926_v41 }
 0x1fa   : > { %v1033_v61 = vmul.f32 0.5, %v1032_v49  ;;  %v890_v55 = vmul.f32 0.0012755102, %v3954_v28 }
 0x1fb   : > { %1097 = vperm.xlu1 %2986, %v1057_v60   ;;  %v1003_v7 = vmul.f32 0.5, %v1002_v27  ;;  %v912_v48 = vmul.f32 %v892_v18, %v892_v18 }
 0x1fc   : > { %v1034_v47 = vsub.f32 1.5, %v1033_v61 }
 0x1fd   : > { %v2999_v10 = vpop.eup %2998 }
 0x1fe   : > { %v3946_v6 = vpop.eup %3000  ;;  %v1041_v33 = vmul.f32 %v2999_v10, %v3912_v26  ;;  %v1035_v0 = vmul.f32 %v2995_v50, %v1034_v47  ;;  %vm1047_vm14 = vweird.f32 %v2999_v10  ;;  %v931_v26 = vld [vmem:[%s4968_s2 + $0x8] sm:$0xff] }
 0x1ff   : > { %v3003_v59 = vpop.eup %3002  ;;  %v981_v38 = vmul.f32 %v3946_v6, %v3914_v20  ;;  %vm1048_vm0 = vmor %vm1046_vm15, %vm1047_vm14  ;;  %vm1006_vm14 = vweird.f32 %v3901_v46 }
 0x200   : > { %v1042_v25 = vmul.f32 %v2999_v10, %v1041_v33  ;;  %v961_v3 = vmul.f32 %v3003_v59, %v3919_v8  ;;  %v868_v62 = vpop.xlane.xlu1 %867  ;;  %v1039_v22 = vsel %vm1038_vm13, %v2995_v50, %v1035_v0  ;;  %v1004_v50 = vsub.f32 1.5, %v1003_v7  ;;  %vm1008_vm15 = vmor %vm1006_vm14, %vm1007_vm11 }
 0x201   : > { %v902_v44 = vmul.f32 0.0012755102, %v868_v62  ;;  %v1058_v45 = vmul.f32 %v1039_v22, %v938_v29  ;;  %v982_v27 = vmul.f32 %v3946_v6, %v981_v38  ;;  %vm967_vm12 = vweird.f32 %v3003_v59  ;;  %v935_v38 = vld [vmem:[%s4968_s2 + $0x28] sm:$0xff] }
 0x202   : > { %v1043_v49 = vmul.f32 0.5, %v1042_v25  ;;  %v962_v42 = vmul.f32 %v3003_v59, %v961_v3  ;;  %v910_v33 = vmul.f32 %v890_v55, %v890_v55  ;;  %vm966_vm13 = vweird.f32 %v3919_v8 }
 0x203   : > { %v922_v60 = vsub.f32 %v902_v44, %v912_v48  ;;  %1102 = vperm.xlu0 %2985, %v1058_v45   ;;  %1082 = vperm.xlu1 %2986, %v1054_v30   ;;  %vm968_vm2 = vmor %vm966_vm13, %vm967_vm12  ;;  %v983_v22 = vmul.f32 0.5, %v982_v27  ;;  %v1005_v7 = vmul.f32 %v3916_v39, %v1004_v50  ;;  %vm986_vm12 = vweird.f32 %v3914_v20 }
 0x204   : > { %v1044_v61 = vsub.f32 1.5, %v1043_v49  ;;  %v963_v47 = vmul.f32 0.5, %v962_v42 }
 0x205   : > { %v942_v2 = vadd.f32 1e-05, %v922_v60  ;;  %v984_v49 = vsub.f32 1.5, %v983_v22 }
 0x206   : > { %v964_v18 = vsub.f32 1.5, %v963_v47  ;;  %v1045_v52 = vmul.f32 %v2999_v10, %v1044_v61 }
 0x207   : > { %3004 = vrsqrt.f32 %v942_v2  ;;  %v985_v61 = vmul.f32 %v3946_v6, %v984_v49  ;;  %vm976_vm13 = vweird.f32 %v942_v2  ;;  %v3043_v49 = vld [vmem:[#allocation2 + $0xf8] sm:$0xff] }
 0x208   : > { %v862_v29 = vpop.xlane.xlu1 %861  ;;  %v965_v0 = vmul.f32 %v3003_v59, %v964_v18  ;;  %v1049_v25 = vsel %vm1048_vm0, %v2999_v10, %v1045_v52  ;;  %v933_v18 = vld [vmem:[%s4968_s2 + $0x18] sm:$0xff] }
 0x209   : > { %v900_v3 = vmul.f32 0.0012755102, %v862_v29  ;;  %v1059_v62 = vmul.f32 %v1049_v25, %v939_v54 }
 0x20a   : > { %v969_v30 = vsel %vm968_vm2, %v3003_v59, %v965_v0  ;;  %v1009_v59 = vsel %vm1008_vm15, %v3916_v39, %v1005_v7  ;;  %vm987_vm2 = vweird.f32 %v3946_v6  ;;  %v932_v39 = vld [vmem:[%s4968_s2 + $0x10] sm:$0xff]  ;;  %v930_v0 = vld [vmem:[%s4968_s2] sm:$0xff] }
 0x20b   : > { %v920_v48 = vsub.f32 %v900_v3, %v910_v33  ;;  %v1051_v44 = vmul.f32 %v969_v30, %v931_v26  ;;  %1107 = vperm.xlu2 %2987, %v1059_v62   ;;  %v1055_v60 = vmul.f32 %v1009_v59, %v935_v38  ;;  %vm988_vm0 = vmor %vm986_vm12, %vm987_vm2  ;;  %v3046_v38 = vld [vmem:[#allocation2 + $0x50] sm:$0xff]  ;;  %v3047_v59 = vld [vmem:[#allocation2 + $0x18] sm:$0xff] }
 0x20c   : > { %v989_v54 = vsel %vm988_vm0, %v3946_v6, %v985_v61 }
 0x20d   : > { %v3005_v8 = vpop.eup %3004  ;;  %v940_v45 = vadd.f32 1e-05, %v920_v48  ;;  %1067 = vperm.xlu0 %2985, %v1051_v44   ;;  %v1053_v29 = vmul.f32 %v989_v54, %v933_v18  ;;  %v3040_v44 = vld [vmem:[#allocation2 + $0x1a0] sm:$0xff] }
 0x20e   : > { %v971_v10 = vmul.f32 %v3005_v8, %v942_v2  ;;  %vm977_vm11 = vweird.f32 %v3005_v8 }
 0x20f   : > { %3006 = vrsqrt.f32 %v940_v45  ;;  %vm978_vm14 = vmor %vm976_vm13, %vm977_vm11  ;;  %vm956_vm2 = vweird.f32 %v940_v45 }
 0x210   : > { %v972_v42 = vmul.f32 %v3005_v8, %v971_v10  ;;  %v3045_v10 = vld [vmem:[#allocation2 + $0x88] sm:$0xff] }
 0x212   : > { %v973_v55 = vmul.f32 0.5, %v972_v42  ;;  %v364_v42 = vld [vmem:[%s4020_s28 + $0x18] sm:$0xff] }
 0x213   : > { %1087 = vperm.xlu2 %2987, %v1055_v60   ;;  %v365_v60 = vld [vmem:[%s4020_s28 + $0x20] sm:$0xff] }
 0x214   : > { %v974_v46 = vsub.f32 1.5, %v973_v55 }
 0x215   : > { %v3007_v47 = vpop.eup %3006 }
 0x216   : > { %v951_v50 = vmul.f32 %v3007_v47, %v940_v45  ;;  %v975_v27 = vmul.f32 %v3005_v8, %v974_v46  ;;  %vm957_vm15 = vweird.f32 %v3007_v47  ;;  %v3041_v45 = vld [vmem:[#allocation2 + $0x168] sm:$0xff] }
 0x217   : > { %vm958_vm12 = vmor %vm956_vm2, %vm957_vm15 }
 0x218   : > { %v952_v52 = vmul.f32 %v3007_v47, %v951_v50  ;;  %v979_v20 = vsel %vm978_vm14, %v3005_v8, %v975_v27  ;;  %v362_v8 = vld [vmem:[%s4020_s28 + $0x8] sm:$0xff] }
 0x219   : > { %v1052_v33 = vmul.f32 %v979_v20, %v932_v39 }
 0x21a   : > { %v953_v26 = vmul.f32 0.5, %v952_v52 }
 0x21b   : > { %1072 = vperm.xlu1 %2986, %v1052_v33   ;;  %1077 = vperm.xlu2 %2987, %v1053_v29  }
 0x21c   : > { %v954_v2 = vsub.f32 1.5, %v953_v26 }
 0x21e   : > { %v955_v25 = vmul.f32 %v3007_v47, %v954_v2 }
 0x220   : > { %v959_v3 = vsel %vm958_vm12, %v3007_v47, %v955_v25 }
 0x221   : > { %v1050_v6 = vmul.f32 %v959_v3, %v930_v0 }
 0x223   : > { %1062 = vperm.xlu2 %2987, %v1050_v6  }
 0x24d   : > { %v1093_v62 = vpop.permute.xlu2 %1092 }
 0x265   : > { %v1108_v22 = vpop.permute.xlu2 %1107 }
 0x266   : > { %2780 = vmatpush.msk.msrb.mxu3 %vm848_vm9, %v1108_v22 }
 0x26d   : > { %v1098_v30 = vpop.permute.xlu1 %1097  ;;  %v1088_v7 = vpop.permute.xlu2 %1087 }
 0x275   : > { %v1103_v48 = vpop.permute.xlu0 %1102  ;;  %v1083_v57 = vpop.permute.xlu1 %1082 }
 0x276   : > { %2781 = vmatpush.msk.msrb.mxu3 %vm847_vm6, %v1103_v48  ;;  %v1078_v32 = vpop.permute.xlu2 %1077 }
 0x278   : > { %2782 = vmatpush.msk.msrb.mxu3 %vm846_vm5, %v1098_v30 }
 0x27a   : > { %2783 = vmatpush.msk.msrb.mxu3 %vm845_vm4, %v1093_v62 }
 0x27c   : > { %2784 = vmatpush.msk.msrb.mxu3 %vm844_vm3, %v1088_v7  ;;  %vm5087_vm3 = vcmask 654336  }
 0x27d   : > { %vm5088_vm4 = vmmov %vm5087_vm3 }
 0x27e   : > { %2785 = vmatpush.msk.msrb.mxu3 %vm843_vm1, %v1083_v57  ;;  %v1063_v34 = vpop.permute.xlu2 %1062  ;;  %vm5086_vm1 = vcmp.eq.s32.totalorder %v3678_v31, %v3686_v35  ;;  %v3044_v31 = vld [vmem:[#allocation2 + $0xc0] sm:$0xff]  ;;  %v363_v35 = vld [vmem:[%s4020_s28 + $0x10] sm:$0xff]  ;;  %vm5089_vm5 = vmmov %vm5087_vm3 }
 0x27f   : > { %v1068_v51 = vpop.permute.xlu0 %1067  ;;  %vm5090_vm6 = vmmov %vm5087_vm3 }
 0x280   : > { %2786 = vmatpush.msk.msrb.mxu3 %vm842_vm7, %v1078_v32  ;;  %vm5091_vm7 = vmmov %vm5087_vm3 }
 0x281   : > { %vm5093_vm9 = vmmov %vm5087_vm3 }
 0x282   : > { %vm5095_vm11 = vmmov %vm5087_vm3 }
 0x283   : > { %vm5096_vm0 = vmmov %vm5087_vm3 }
 0x284   : > { %vm5097_vm13 = vmmov %vm5096_vm0 }
 0x285   : > { %vm5098_vm14 = vmmov %vm5096_vm0 }
 0x286   : > { %vm5099_vm15 = vmmov %vm5096_vm0 }
 0x287   : > { %vm5100_vm2 = vmmov %vm5096_vm0 }
 0x288   : > { %vm5101_vm12 = vmmov %vm5096_vm0 }
 0x28d   : > { %v1073_v36 = vpop.permute.xlu1 %1072 }
 0x28e   : > { %2787 = vmatpush.msk.msrb.mxu3 %vm841_vm10, %v1073_v36  ;;  %vm5094_vm10 = vmmov %vm5087_vm3 }
 0x290   : > { %2788 = vmatpush.msk.msrb.mxu3 %vm840_vm8, %v1068_v51  ;;  %vm5092_vm8 = vmmov %vm5087_vm3 }
 0x292   : > { %2789 = vmatpush.msk.msrb.mxu3 %vm5086_vm1, %v1063_v34  ;;  %vm5102_vm1 = vmmov %vm5096_vm0 }
 0x293   : > { %2790 = vmatmul.msk.f32.vlgmr.msrb.gmra.mxu3 %vm5087_vm3, %v361_v58  ;;  %vm5103_vm3 = vmmov %vm5096_vm0 }
 0x294   : > { %1464 = vmatpush.msra.mxu3 %v3038_v37 }
 0x296   : > { %1465 = vmatpush.msra.mxu3 %v3039_v56 }
 0x298   : > { %1466 = vmatpush.msra.mxu3 %v3040_v44 }
 0x29a   : > { %1467 = vmatpush.msra.mxu3 %v3041_v45 }
 0x29b   : > { %2791 = vmatmul.msk.f32.gmra.mxu3 %vm5088_vm4, %v362_v8  ;;  %vm5104_vm4 = vmmov %vm5096_vm0 }
 0x29c   : > { %1468 = vmatpush.msra.mxu3 %v3042_v19 }
 0x29e   : > { %1469 = vmatpush.msra.mxu3 %v3043_v49 }
 0x2a0   : > { %1470 = vmatpush.msra.mxu3 %v3044_v31 }
 0x2a2   : > { %1471 = vmatpush.msra.mxu3 %v3045_v10 }
 0x2a3   : > { %2792 = vmatmul.msk.f32.gmra.mxu3 %vm5089_vm5, %v363_v35  ;;  %vm5105_vm5 = vmmov %vm5096_vm0 }
 0x2a4   : > { %1472 = vmatpush.msra.mxu3 %v3046_v38 }
 0x2a6   : > { %1473 = vmatpush.msra.mxu3 %v3047_v59 }
 0x2a8   : > { %1712 = vmatpush.msrb.mxu3 %v3871_v17  ;;  %v366_v17 = vld [vmem:[%s4020_s28 + $0x28] sm:$0xff] }
 0x2aa   : > { %1713 = vmatpush.msrb.mxu3 %v3873_v11  ;;  %v367_v11 = vld [vmem:[%s4020_s28 + $0x30] sm:$0xff] }
 0x2ab   : > { %2793 = vmatmul.msk.f32.gmra.mxu3 %vm5090_vm6, %v364_v42  ;;  %vm5106_vm6 = vmmov %vm5096_vm0 }
 0x2ac   : > { %1714 = vmatpush.msrb.mxu3 %v3879_v9  ;;  %v370_v9 = vld [vmem:[%s4020_s28 + $0x48] sm:$0xff] }
 0x2ae   : > { %1715 = vmatpush.msrb.mxu3 %v3875_v14  ;;  %v368_v14 = vld [vmem:[%s4020_s28 + $0x38] sm:$0xff] }
 0x2b0   : > { %1716 = vmatpush.msrb.mxu3 %v3885_v21  ;;  %v372_v21 = vld [vmem:[%s4020_s28 + $0x58] sm:$0xff] }
 0x2b2   : > { %1717 = vmatpush.msrb.mxu3 %v3877_v1  ;;  %v369_v1 = vld [vmem:[%s4020_s28 + $0x40] sm:$0xff] }
 0x2b3   : > { %2794 = vmatmul.msk.f32.gmra.mxu3 %vm5091_vm7, %v365_v60  ;;  %vm5107_vm7 = vmmov %vm5096_vm0 }
 0x2b4   : > { %1718 = vmatpush.msrb.mxu3 %v3881_v63  ;;  %v371_v63 = vld [vmem:[%s4020_s28 + $0x50] sm:$0xff] }
 0x2b6   : > { %1719 = vmatpush.msrb.mxu3 %v3926_v41  ;;  %v374_v41 = vld [vmem:[%s4020_s28 + $0x68] sm:$0xff] }
 0x2b8   : > { %1720 = vmatpush.msrb.mxu3 %v3895_v5  ;;  %v373_v5 = vld [vmem:[%s4020_s28 + $0x60] sm:$0xff] }
 0x2ba   : > { %1721 = vmatpush.msrb.mxu3 %v3954_v28  ;;  %v375_v28 = vld [vmem:[%s4020_s28 + $0x70] sm:$0xff] }
 0x2bb   : > { %2795 = vmatmul.msk.f32.gmra.mxu3 %vm5092_vm8, %v366_v17  ;;  %vm5108_vm8 = vmmov %vm5096_vm0 }
 0x2c3   : > { %2796 = vmatmul.msk.f32.gmra.mxu3 %vm5093_vm9, %v367_v11  ;;  %vm5109_vm9 = vmmov %vm5096_vm0 }
 0x2cb   : > { %2797 = vmatmul.msk.f32.gmra.mxu3 %vm5094_vm10, %v368_v14  ;;  %vm5110_vm10 = vmmov %vm5096_vm0 }
 0x2d3   : > { %2798 = vmatmul.msk.f32.gmra.mxu3 %vm5095_vm11, %v369_v1  ;;  %vm5111_vm11 = vmmov %vm5096_vm0 }
 0x2db   : > { %2799 = vmatmul.msk.f32.gmra.mxu3 %vm5096_vm0, %v370_v9 }
 0x2e3   : > { %2800 = vmatmul.msk.f32.gmra.mxu3 %vm5097_vm13, %v371_v63  ;;  %vm5112_vm13 = vmmov %vm5096_vm0 }
 0x2eb   : > { %2801 = vmatmul.msk.f32.gmra.mxu3 %vm5098_vm14, %v372_v21  ;;  %vm5113_vm14 = vmmov %vm5096_vm0 }
 0x2f3   : > { %2802 = vmatmul.msk.f32.gmra.mxu3 %vm5099_vm15, %v373_v5  ;;  %vm5114_vm15 = vmmov %vm5096_vm0 }
 0x2fb   : > { %2803 = vmatmul.msk.f32.gmra.mxu3 %vm5100_vm2, %v374_v41  ;;  %vm5115_vm2 = vmmov %vm5096_vm0 }
 0x303   : > { %2804 = vmatmul.msk.f32.gmra.mxu3 %vm5101_vm12, %v375_v28  ;;  %vm5116_vm12 = vmmov %vm5096_vm0 }
 0x316   : > { %v4071_v55 = vpop.f32.mrf.mxu3 }
 0x317   : > { %2805 = vmatmul.msk.f32.vlgmr.msra.gmra.mxu0 %vm5102_vm1, %v4071_v55  ;;  %2820 = vmatmul.msk.f32.vlgmr.msrb.gmra.mxu1 %vm5103_vm3, %v4071_v55  ;;  %vm5117_vm1 = vmmov %vm5096_vm0 }
 0x318   : > { %2835 = vmatmul.msk.f32.vlgmr.msrb.gmra.mxu2 %vm5104_vm4, %v4071_v55  ;;  %2850 = vmatmul.msk.f32.vlgmr.msra.gmra.mxu3 %vm5105_vm5, %v4071_v55  ;;  %vm5118_vm3 = vmmov %vm5096_vm0 }
 0x319   : > { %1774 = vmatpush.msra.mxu0 %v3814_v40  ;;  %vm5119_vm4 = vmmov %vm5096_vm0 }
 0x31a   : > { %vm5120_vm5 = vmmov %vm5096_vm0 }
 0x31b   : > { %1775 = vmatpush.msra.mxu0 %v3777_v16 }
 0x31d   : > { %1776 = vmatpush.msra.mxu0 %v3747_v23 }
 0x31e   : > { %v4084_v61 = vpop.f32.mrf.mxu3 }
 0x31f   : > { %1777 = vmatpush.msra.mxu0 %v3725_v53  ;;  %2821 = vmatmul.msk.f32.gmra.mxu1 %vm5106_vm6, %v4084_v61  ;;  %vm5121_vm6 = vmmov %vm5096_vm0 }
 0x320   : > { %2806 = vmatmul.msk.f32.gmra.mxu0 %vm5107_vm7, %v4084_v61  ;;  %2836 = vmatmul.msk.f32.gmra.mxu2 %vm5108_vm8, %v4084_v61  ;;  %vm5122_vm7 = vmmov %vm5096_vm0 }
 0x321   : > { %2851 = vmatmul.msk.f32.gmra.mxu3 %vm5109_vm9, %v4084_v61  ;;  %1778 = vmatpush.msra.mxu0 %v3706_v15  ;;  %vm5123_vm8 = vmmov %vm5096_vm0 }
 0x322   : > { %vm5124_vm9 = vmmov %vm5096_vm0 }
 0x323   : > { %1779 = vmatpush.msra.mxu0 %v3690_v12 }
 0x325   : > { %1780 = vmatpush.msra.mxu0 %v3798_v24 }
 0x326   : > { %v4098_v23 = vpop.f32.mrf.mxu3 }
 0x327   : > { %1781 = vmatpush.msra.mxu0 %v3850_v43  ;;  %2822 = vmatmul.msk.f32.gmra.mxu1 %vm5110_vm10, %v4098_v23  ;;  %vm5125_vm10 = vmmov %vm5096_vm0 }
 0x328   : > { %2807 = vmatmul.msk.f32.gmra.mxu0 %vm5111_vm11, %v4098_v23  ;;  %2837 = vmatmul.msk.f32.gmra.mxu2 %vm5096_vm0, %v4098_v23  ;;  %vm5126_vm11 = vmmov %vm5096_vm0 }
 0x329   : > { %2852 = vmatmul.msk.f32.gmra.mxu3 %vm5112_vm13, %v4098_v23  ;;  %1782 = vmatpush.msra.mxu0 %v3805_v4  ;;  %vm5127_vm13 = vmmov %vm5096_vm0 }
 0x32b   : > { %1783 = vmatpush.msra.mxu0 %v3862_v13 }
 0x32e   : > { %v4111_v12 = vpop.f32.mrf.mxu3 }
 0x32f   : > { %2823 = vmatmul.msk.f32.gmra.mxu1 %vm5114_vm15, %v4111_v12  ;;  %vm5129_vm15 = vmmov %vm5096_vm0 }
 0x330   : > { %2808 = vmatmul.msk.f32.gmra.mxu0 %vm5113_vm14, %v4111_v12  ;;  %2838 = vmatmul.msk.f32.gmra.mxu2 %vm5115_vm2, %v4111_v12  ;;  %vm5128_vm14 = vmmov %vm5096_vm0 }
 0x331   : > { %2853 = vmatmul.msk.f32.gmra.mxu3 %vm5116_vm12, %v4111_v12  ;;  %vm5130_vm2 = vmmov %vm5096_vm0 }
 0x332   : > { %vm5131_vm12 = vmmov %vm5096_vm0 }
 0x336   : > { %v4121_v15 = vpop.f32.mrf.mxu3 }
 0x337   : > { %2824 = vmatmul.msk.f32.gmra.mxu1 %vm5118_vm3, %v4121_v15  ;;  %vm5133_vm3 = vmmov %vm5096_vm0 }
 0x338   : > { %2809 = vmatmul.msk.f32.gmra.mxu0 %vm5117_vm1, %v4121_v15  ;;  %2839 = vmatmul.msk.f32.gmra.mxu2 %vm5119_vm4, %v4121_v15  ;;  %vm5132_vm1 = vmmov %vm5096_vm0 }
 0x339   : > { %2854 = vmatmul.msk.f32.gmra.mxu3 %vm5120_vm5, %v4121_v15  ;;  %vm5134_vm4 = vmmov %vm5096_vm0 }
 0x33a   : > { %vm5135_vm5 = vmmov %vm5096_vm0 }
 0x33e   : > { %v4131_v53 = vpop.f32.mrf.mxu3 }
 0x33f   : > { %2825 = vmatmul.msk.f32.gmra.mxu1 %vm5122_vm7, %v4131_v53  ;;  %vm5137_vm7 = vmmov %vm5096_vm0 }
 0x340   : > { %2810 = vmatmul.msk.f32.gmra.mxu0 %vm5121_vm6, %v4131_v53  ;;  %2840 = vmatmul.msk.f32.gmra.mxu2 %vm5123_vm8, %v4131_v53  ;;  %vm5136_vm6 = vmmov %vm5096_vm0 }
 0x341   : > { %2855 = vmatmul.msk.f32.gmra.mxu3 %vm5124_vm9, %v4131_v53  ;;  %vm5138_vm8 = vmmov %vm5096_vm0 }
 0x342   : > { %vm5139_vm9 = vmmov %vm5096_vm0 }
 0x346   : > { %v4141_v16 = vpop.f32.mrf.mxu3 }
 0x347   : > { %2826 = vmatmul.msk.f32.gmra.mxu1 %vm5126_vm11, %v4141_v16  ;;  %vm5141_vm11 = vmmov %vm5096_vm0 }
 0x348   : > { %2811 = vmatmul.msk.f32.gmra.mxu0 %vm5125_vm10, %v4141_v16  ;;  %2841 = vmatmul.msk.f32.gmra.mxu2 %vm5096_vm0, %v4141_v16  ;;  %vm5140_vm10 = vmmov %vm5096_vm0 }
 0x349   : > { %2856 = vmatmul.msk.f32.gmra.mxu3 %vm5127_vm13, %v4141_v16  ;;  %vm5142_vm13 = vmmov %vm5096_vm0 }
 0x34e   : > { %v4151_v24 = vpop.f32.mrf.mxu3 }
 0x34f   : > { %2827 = vmatmul.msk.f32.gmra.mxu1 %vm5129_vm15, %v4151_v24  ;;  %vm5144_vm15 = vmmov %vm5096_vm0 }
 0x350   : > { %2812 = vmatmul.msk.f32.gmra.mxu0 %vm5128_vm14, %v4151_v24  ;;  %2842 = vmatmul.msk.f32.gmra.mxu2 %vm5130_vm2, %v4151_v24  ;;  %vm5143_vm14 = vmmov %vm5096_vm0 }
 0x351   : > { %2857 = vmatmul.msk.f32.gmra.mxu3 %vm5131_vm12, %v4151_v24  ;;  %vm5145_vm2 = vmmov %vm5096_vm0 }
 0x352   : > { %vm5146_vm12 = vmmov %vm5096_vm0 }
 0x356   : > { %v4161_v4 = vpop.f32.mrf.mxu3 }
 0x357   : > { %2828 = vmatmul.msk.f32.gmra.mxu1 %vm5133_vm3, %v4161_v4  ;;  %vm5148_vm3 = vmmov %vm5096_vm0 }
 0x358   : > { %2813 = vmatmul.msk.f32.gmra.mxu0 %vm5132_vm1, %v4161_v4  ;;  %2843 = vmatmul.msk.f32.gmra.mxu2 %vm5134_vm4, %v4161_v4  ;;  %vm5147_vm1 = vmmov %vm5096_vm0 }
 0x359   : > { %2858 = vmatmul.msk.f32.gmra.mxu3 %vm5135_vm5, %v4161_v4  ;;  %vm5149_vm4 = vmmov %vm5096_vm0 }
 0x35a   : > { %vm5150_vm5 = vmmov %vm5096_vm0 }
 0x35e   : > { %v4171_v40 = vpop.f32.mrf.mxu3 }
 0x35f   : > { %2829 = vmatmul.msk.f32.gmra.mxu1 %vm5137_vm7, %v4171_v40  ;;  %vm5152_vm7 = vmmov %vm5096_vm0 }
 0x360   : > { %2814 = vmatmul.msk.f32.gmra.mxu0 %vm5136_vm6, %v4171_v40  ;;  %2844 = vmatmul.msk.f32.gmra.mxu2 %vm5138_vm8, %v4171_v40  ;;  %vm5151_vm6 = vmmov %vm5096_vm0 }
 0x361   : > { %2859 = vmatmul.msk.f32.gmra.mxu3 %vm5139_vm9, %v4171_v40  ;;  %vm5153_vm8 = vmmov %vm5096_vm0 }
 0x362   : > { %vm5154_vm9 = vmmov %vm5096_vm0 }
 0x366   : > { %v4181_v43 = vpop.f32.mrf.mxu3 }
 0x367   : > { %2830 = vmatmul.msk.f32.gmra.mxu1 %vm5141_vm11, %v4181_v43  ;;  %vm5156_vm11 = vmmov %vm5096_vm0 }
 0x368   : > { %2815 = vmatmul.msk.f32.gmra.mxu0 %vm5140_vm10, %v4181_v43  ;;  %2845 = vmatmul.msk.f32.gmra.mxu2 %vm5096_vm0, %v4181_v43  ;;  %vm5155_vm10 = vmmov %vm5096_vm0 }
 0x369   : > { %2860 = vmatmul.msk.f32.gmra.mxu3 %vm5142_vm13, %v4181_v43  ;;  %vm5157_vm13 = vmmov %vm5096_vm0 }
 0x36e   : > { %v4191_v13 = vpop.f32.mrf.mxu3 }
 0x36f   : > { %2831 = vmatmul.msk.f32.gmra.mxu1 %vm5144_vm15, %v4191_v13  ;;  %vm5159_vm15 = vmmov %vm5096_vm0 }
 0x370   : > { %2816 = vmatmul.msk.f32.gmra.mxu0 %vm5143_vm14, %v4191_v13  ;;  %2846 = vmatmul.msk.f32.gmra.mxu2 %vm5145_vm2, %v4191_v13  ;;  %vm5158_vm14 = vmmov %vm5096_vm0 }
 0x371   : > { %2861 = vmatmul.msk.f32.gmra.mxu3 %vm5146_vm12, %v4191_v13  ;;  %vm5160_vm2 = vmmov %vm5096_vm0 }
 0x372   : > { %vm5161_vm12 = vmmov %vm5096_vm0 }
 0x376   : > { %v4201_v46 = vpop.f32.mrf.mxu3 }
 0x377   : > { %2832 = vmatmul.msk.f32.gmra.mxu1 %vm5148_vm3, %v4201_v46  ;;  %vm5163_vm3 = vmmov %vm5096_vm0 }
 0x378   : > { %2817 = vmatmul.msk.f32.gmra.mxu0 %vm5147_vm1, %v4201_v46  ;;  %2847 = vmatmul.msk.f32.gmra.mxu2 %vm5149_vm4, %v4201_v46  ;;  %vm5162_vm1 = vmmov %vm5096_vm0 }
 0x379   : > { %2862 = vmatmul.msk.f32.gmra.mxu3 %vm5150_vm5, %v4201_v46  ;;  %vm5164_vm4 = vmmov %vm5096_vm0 }
 0x37a   : > { %vm5165_vm5 = vmmov %vm5096_vm0 }
 0x37e   : > { %v4211_v47 = vpop.f32.mrf.mxu3 }
 0x37f   : > { %2833 = vmatmul.msk.f32.gmra.mxu1 %vm5152_vm7, %v4211_v47  ;;  %vm5167_vm7 = vmmov %vm5096_vm0 }
 0x380   : > { %2818 = vmatmul.msk.f32.gmra.mxu0 %vm5151_vm6, %v4211_v47  ;;  %2848 = vmatmul.msk.f32.gmra.mxu2 %vm5153_vm8, %v4211_v47  ;;  %vm5166_vm6 = vmmov %vm5096_vm0 }
 0x381   : > { %2863 = vmatmul.msk.f32.gmra.mxu3 %vm5154_vm9, %v4211_v47  ;;  %vm5168_vm8 = vmmov %vm5096_vm0 }
 0x382   : > { %vm5169_vm9 = vmmov %vm5096_vm0 }
 0x386   : > { %v4221_v50 = vpop.f32.mrf.mxu3 }
 0x387   : > { %2834 = vmatmul.msk.f32.gmra.mxu1 %vm5156_vm11, %v4221_v50  ;;  %vm5171_vm11 = vmmov %vm5096_vm0 }
 0x388   : > { %2819 = vmatmul.msk.f32.gmra.mxu0 %vm5155_vm10, %v4221_v50  ;;  %2849 = vmatmul.msk.f32.gmra.mxu2 %vm5096_vm0, %v4221_v50  ;;  %vm5170_vm10 = vmmov %vm5096_vm0 }
 0x389   : > { %2864 = vmatmul.msk.f32.gmra.mxu3 %vm5157_vm13, %v4221_v50  ;;  %vm5172_vm13 = vmmov %vm5096_vm0 }
 0x38f   : > { %2880 = vmatmul.msk.f32.vlgmr.msra.gmra.mxu1 %vm5159_vm15, %v4071_v55  ;;  %vm5174_vm15 = vmmov %vm5096_vm0 }
 0x390   : > { %2865 = vmatmul.msk.f32.vlgmr.msrb.gmra.mxu0 %vm5158_vm14, %v4071_v55  ;;  %2895 = vmatmul.msk.f32.vlgmr.msra.gmra.mxu2 %vm5160_vm2, %v4071_v55  ;;  %vm5173_vm14 = vmmov %vm5096_vm0 }
 0x391   : > { %2910 = vmatmul.msk.f32.vlgmr.msrb.gmra.mxu3 %vm5161_vm12, %v4071_v55  ;;  %vm5175_vm2 = vmmov %vm5096_vm0 }
 0x392   : > { %vm5176_vm12 = vmmov %vm5096_vm0 }
 0x394   : > { %v4239_v39 = vpop.f32.mrf.mxu0  ;;  %v4311_v26 = vpop.f32.mrf.mxu1 }
 0x397   : > { %2881 = vmatmul.msk.f32.gmra.mxu1 %vm5163_vm3, %v4084_v61  ;;  %vm5178_vm3 = vmmov %vm5096_vm0 }
 0x398   : > { %2866 = vmatmul.msk.f32.gmra.mxu0 %vm5162_vm1, %v4084_v61  ;;  %2896 = vmatmul.msk.f32.gmra.mxu2 %vm5164_vm4, %v4084_v61  ;;  %vm5177_vm1 = vmmov %vm5096_vm0 }
 0x399   : > { %2911 = vmatmul.msk.f32.gmra.mxu3 %vm5165_vm5, %v4084_v61  ;;  %vm5179_vm4 = vmmov %vm5096_vm0 }
 0x39a   : > { %vm5180_vm5 = vmmov %vm5096_vm0 }
 0x39b   : > { %v4313_v2 = vpop.f32.mrf.mxu2  ;;  %v4315_v0 = vpop.f32.mrf.mxu3 }
 0x39c   : > { %v4327_v3 = vpop.f32.mrf.mxu1 }
 0x39d   : > { %v4249_v27 = vpop.f32.mrf.mxu0 }
 0x39f   : > { %2882 = vmatmul.msk.f32.gmra.mxu1 %vm5167_vm7, %v4098_v23  ;;  %vm5182_vm7 = vmmov %vm5096_vm0 }
 0x3a0   : > { %2867 = vmatmul.msk.f32.gmra.mxu0 %vm5166_vm6, %v4098_v23  ;;  %2897 = vmatmul.msk.f32.gmra.mxu2 %vm5168_vm8, %v4098_v23  ;;  %vm5181_vm6 = vmmov %vm5096_vm0 }
 0x3a1   : > { %2912 = vmatmul.msk.f32.gmra.mxu3 %vm5169_vm9, %v4098_v23  ;;  %vm5183_vm8 = vmmov %vm5096_vm0 }
 0x3a2   : > { %vm5184_vm9 = vmmov %vm5096_vm0 }
 0x3a3   : > { %v4329_v6 = vpop.f32.mrf.mxu2 }
 0x3a4   : > { %v4335_v62 = vpop.f32.mrf.mxu3  ;;  %v4351_v30 = vpop.f32.mrf.mxu1 }
 0x3a5   : > { %v4259_v18 = vpop.f32.mrf.mxu0 }
 0x3a7   : > { %2883 = vmatmul.msk.f32.gmra.mxu1 %vm5171_vm11, %v4111_v12  ;;  %vm5187_vm11 = vmmov %vm5096_vm0 }
 0x3a8   : > { %2868 = vmatmul.msk.f32.gmra.mxu0 %vm5170_vm10, %v4111_v12  ;;  %2898 = vmatmul.msk.f32.gmra.mxu2 %vm5096_vm0, %v4111_v12  ;;  %vm5186_vm10 = vmmov %vm5096_vm0 }
 0x3a9   : > { %2913 = vmatmul.msk.f32.gmra.mxu3 %vm5172_vm13, %v4111_v12  ;;  %vm5188_vm13 = vmmov %vm5096_vm0 }
 0x3ab   : > { %v4353_v7 = vpop.f32.mrf.mxu2 }
 0x3ac   : > { %v4355_v48 = vpop.f32.mrf.mxu3  ;;  %v4367_v32 = vpop.f32.mrf.mxu1 }
 0x3ad   : > { %v4269_v54 = vpop.f32.mrf.mxu0 }
 0x3af   : > { %2884 = vmatmul.msk.f32.gmra.mxu1 %vm5174_vm15, %v4121_v15  ;;  %vm5191_vm15 = vmmov %vm5096_vm0 }
 0x3b0   : > { %2869 = vmatmul.msk.f32.gmra.mxu0 %vm5173_vm14, %v4121_v15  ;;  %2899 = vmatmul.msk.f32.gmra.mxu2 %vm5175_vm2, %v4121_v15  ;;  %vm5190_vm14 = vmmov %vm5096_vm0 }
 0x3b1   : > { %2914 = vmatmul.msk.f32.gmra.mxu3 %vm5176_vm12, %v4121_v15  ;;  %vm5192_vm2 = vmmov %vm5096_vm0 }
 0x3b2   : > { %vm5193_vm12 = vmmov %vm5096_vm0 }
 0x3b3   : > { %v4369_v36 = vpop.f32.mrf.mxu2 }
 0x3b4   : > { %v4371_v51 = vpop.f32.mrf.mxu3  ;;  %v4385_v37 = vpop.f32.mrf.mxu1 }
 0x3b5   : > { %v4279_v52 = vpop.f32.mrf.mxu0 }
 0x3b7   : > { %2885 = vmatmul.msk.f32.gmra.mxu1 %vm5178_vm3, %v4131_v53  ;;  %vm5195_vm3 = vmmov %vm5096_vm0 }
 0x3b8   : > { %2870 = vmatmul.msk.f32.gmra.mxu0 %vm5177_vm1, %v4131_v53  ;;  %2900 = vmatmul.msk.f32.gmra.mxu2 %vm5179_vm4, %v4131_v53  ;;  %vm5194_vm1 = vmmov %vm5096_vm0 }
 0x3b9   : > { %2915 = vmatmul.msk.f32.gmra.mxu3 %vm5180_vm5, %v4131_v53  ;;  %vm5196_vm4 = vmmov %vm5096_vm0 }
 0x3ba   : > { %vm5197_vm5 = vmmov %vm5096_vm0 }
 0x3bb   : > { %v4387_v56 = vpop.f32.mrf.mxu2 }
 0x3bc   : > { %v4389_v44 = vpop.f32.mrf.mxu3  ;;  %v4401_v45 = vpop.f32.mrf.mxu1 }
 0x3bd   : > { %v4289_v20 = vpop.f32.mrf.mxu0 }
 0x3bf   : > { %2886 = vmatmul.msk.f32.gmra.mxu1 %vm5182_vm7, %v4141_v16  ;;  %vm5200_vm7 = vmmov %vm5096_vm0 }
 0x3c0   : > { %2871 = vmatmul.msk.f32.gmra.mxu0 %vm5181_vm6, %v4141_v16  ;;  %2901 = vmatmul.msk.f32.gmra.mxu2 %vm5183_vm8, %v4141_v16  ;;  %vm5199_vm6 = vmmov %vm5096_vm0 }
 0x3c1   : > { %2916 = vmatmul.msk.f32.gmra.mxu3 %vm5184_vm9, %v4141_v16  ;;  %vm5201_vm8 = vmmov %vm5096_vm0 }
 0x3c2   : > { %vm5202_vm9 = vmmov %vm5096_vm0 }
 0x3c3   : > { %v4407_v19 = vpop.f32.mrf.mxu2 }
 0x3c4   : > { %v4409_v49 = vpop.f32.mrf.mxu3 }
 0x3c5   : > { %v4299_v33 = vpop.f32.mrf.mxu0 }
 0x3c6   : > { %5185 = vst [vmem:[#allocation28_spill] sm:$0xff] %v4299_v33 }
 0x3c7   : > { %2887 = vmatmul.msk.f32.gmra.mxu1 %vm5187_vm11, %v4151_v24  ;;  %vm5205_vm11 = vmmov %vm5096_vm0 }
 0x3c8   : > { %2872 = vmatmul.msk.f32.gmra.mxu0 %vm5186_vm10, %v4151_v24  ;;  %2902 = vmatmul.msk.f32.gmra.mxu2 %vm5096_vm0, %v4151_v24  ;;  %vm5204_vm10 = vmmov %vm5096_vm0 }
 0x3c9   : > { %2917 = vmatmul.msk.f32.gmra.mxu3 %vm5188_vm13, %v4151_v24  ;;  %vm5206_vm13 = vmmov %vm5096_vm0 }
 0x3cc   : > { %v4477_v28 = vpop.f32.mrf.mxu3 }
 0x3cd   : > { %v4309_v29 = vpop.f32.mrf.mxu0  ;;  %5246 = vst [vmem:[#allocation17_spill] sm:$0xff] %v4477_v28 }
 0x3ce   : > { %5189 = vst [vmem:[#allocation35_spill] sm:$0xff] %v4309_v29 }
 0x3cf   : > { %2888 = vmatmul.msk.f32.gmra.mxu1 %vm5191_vm15, %v4161_v4  ;;  %vm5209_vm15 = vmmov %vm5096_vm0 }
 0x3d0   : > { %2873 = vmatmul.msk.f32.gmra.mxu0 %vm5190_vm14, %v4161_v4  ;;  %2903 = vmatmul.msk.f32.gmra.mxu2 %vm5192_vm2, %v4161_v4  ;;  %vm5208_vm14 = vmmov %vm5096_vm0 }
 0x3d1   : > { %2918 = vmatmul.msk.f32.gmra.mxu3 %vm5193_vm12, %v4161_v4  ;;  %vm5210_vm2 = vmmov %vm5096_vm0 }
 0x3d2   : > { %vm5211_vm12 = vmmov %vm5096_vm0 }
 0x3d5   : > { %v4325_v25 = vpop.f32.mrf.mxu0 }
 0x3d7   : > { %2889 = vmatmul.msk.f32.gmra.mxu1 %vm5195_vm3, %v4171_v40  ;;  %vm5214_vm3 = vmmov %vm5096_vm0 }
 0x3d8   : > { %2874 = vmatmul.msk.f32.gmra.mxu0 %vm5194_vm1, %v4171_v40  ;;  %2904 = vmatmul.msk.f32.gmra.mxu2 %vm5196_vm4, %v4171_v40  ;;  %vm5213_vm1 = vmmov %vm5096_vm0 }
 0x3d9   : > { %2919 = vmatmul.msk.f32.gmra.mxu3 %vm5197_vm5, %v4171_v40  ;;  %vm5215_vm4 = vmmov %vm5096_vm0 }
 0x3da   : > { %vm5216_vm5 = vmmov %vm5096_vm0 }
 0x3dd   : > { %v4341_v22 = vpop.f32.mrf.mxu0 }
 0x3de   : > { %5198 = vst [vmem:[#allocation44_spill] sm:$0xff] %v4341_v22 }
 0x3df   : > { %2890 = vmatmul.msk.f32.gmra.mxu1 %vm5200_vm7, %v4181_v43  ;;  %vm5219_vm7 = vmmov %vm5096_vm0 }
 0x3e0   : > { %2875 = vmatmul.msk.f32.gmra.mxu0 %vm5199_vm6, %v4181_v43  ;;  %2905 = vmatmul.msk.f32.gmra.mxu2 %vm5201_vm8, %v4181_v43  ;;  %vm5218_vm6 = vmmov %vm5096_vm0 }
 0x3e1   : > { %2920 = vmatmul.msk.f32.gmra.mxu3 %vm5202_vm9, %v4181_v43  ;;  %vm5220_vm8 = vmmov %vm5096_vm0 }
 0x3e2   : > { %vm5221_vm9 = vmmov %vm5096_vm0 }
 0x3e5   : > { %v4357_v57 = vpop.f32.mrf.mxu0 }
 0x3e6   : > { %5203 = vst [vmem:[#allocation30_spill] sm:$0xff] %v4357_v57 }
 0x3e7   : > { %2891 = vmatmul.msk.f32.gmra.mxu1 %vm5205_vm11, %v4191_v13  ;;  %vm5224_vm11 = vmmov %vm5096_vm0 }
 0x3e8   : > { %2876 = vmatmul.msk.f32.gmra.mxu0 %vm5204_vm10, %v4191_v13  ;;  %2906 = vmatmul.msk.f32.gmra.mxu2 %vm5096_vm0, %v4191_v13  ;;  %vm5223_vm10 = vmmov %vm5096_vm0 }
 0x3e9   : > { %2921 = vmatmul.msk.f32.gmra.mxu3 %vm5206_vm13, %v4191_v13  ;;  %vm5225_vm13 = vmmov %vm5096_vm0 }
 0x3ed   : > { %v4373_v58 = vpop.f32.mrf.mxu0 }
 0x3ee   : > { %5207 = vst [vmem:[#allocation37_spill] sm:$0xff] %v4373_v58 }
 0x3ef   : > { %2892 = vmatmul.msk.f32.gmra.mxu1 %vm5209_vm15, %v4201_v46  ;;  %vm5227_vm15 = vmmov %vm5096_vm0 }
 0x3f0   : > { %2877 = vmatmul.msk.f32.gmra.mxu0 %vm5208_vm14, %v4201_v46  ;;  %2907 = vmatmul.msk.f32.gmra.mxu2 %vm5210_vm2, %v4201_v46  ;;  %vm5226_vm14 = vmmov %vm5096_vm0 }
 0x3f1   : > { %2922 = vmatmul.msk.f32.gmra.mxu3 %vm5211_vm12, %v4201_v46  ;;  %vm5228_vm2 = vmmov %vm5096_vm0 }
 0x3f2   : > { %vm5230_vm12 = vmmov %vm5096_vm0 }
 0x3f5   : > { %v4383_v34 = vpop.f32.mrf.mxu0 }
 0x3f6   : > { %5212 = vst [vmem:[#allocation7_spill] sm:$0xff] %v4383_v34 }
 0x3f7   : > { %2893 = vmatmul.msk.f32.gmra.mxu1 %vm5214_vm3, %v4211_v47  ;;  %vm5234_vm3 = vmmov %vm5096_vm0 }
 0x3f8   : > { %2878 = vmatmul.msk.f32.gmra.mxu0 %vm5213_vm1, %v4211_v47  ;;  %2908 = vmatmul.msk.f32.gmra.mxu2 %vm5215_vm4, %v4211_v47  ;;  %vm5232_vm1 = vmmov %vm5096_vm0 }
 0x3f9   : > { %2923 = vmatmul.msk.f32.gmra.mxu3 %vm5216_vm5, %v4211_v47  ;;  %vm5236_vm4 = vmmov %vm5096_vm0 }
 0x3fa   : > { %vm5238_vm5 = vmmov %vm5096_vm0 }
 0x3fd   : > { %v4399_v8 = vpop.f32.mrf.mxu0 }
 0x3fe   : > { %5217 = vst [vmem:[#allocation8_spill] sm:$0xff] %v4399_v8 }
 0x3ff   : > { %2894 = vmatmul.msk.f32.gmra.mxu1 %vm5219_vm7, %v4221_v50  ;;  %vm5242_vm7 = vmmov %vm5096_vm0 }
 0x400   : > { %2879 = vmatmul.msk.f32.gmra.mxu0 %vm5218_vm6, %v4221_v50  ;;  %2909 = vmatmul.msk.f32.gmra.mxu2 %vm5220_vm8, %v4221_v50  ;;  %vm5240_vm6 = vmmov %vm5096_vm0 }
 0x401   : > { %2924 = vmatmul.msk.f32.gmra.mxu3 %vm5221_vm9, %v4221_v50  ;;  %vm5244_vm8 = vmmov %vm5096_vm0 }
 0x402   : > { %vm5247_vm9 = vmmov %vm5096_vm0 }
 0x405   : > { %v4415_v31 = vpop.f32.mrf.mxu0 }
 0x406   : > { %5222 = vst [vmem:[#allocation46_spill] sm:$0xff] %v4415_v31 }
 0x408   : > { %2925 = vmatmul.msk.f32.vlgmr.msra.gmra.mxu0 %vm5223_vm10, %v4071_v55  ;;  %vm5249_vm10 = vmmov %vm5096_vm0 }
 0x40d   : > { %v4419_v35 = vpop.f32.mrf.mxu0 }
 0x410   : > { %2926 = vmatmul.msk.f32.gmra.mxu0 %vm5224_vm11, %v4084_v61  ;;  %vm5250_vm11 = vmmov %vm5096_vm0 }
 0x415   : > { %v4423_v10 = vpop.f32.mrf.mxu0 }
 0x418   : > { %2927 = vmatmul.msk.f32.gmra.mxu0 %vm5096_vm0, %v4098_v23 }
 0x41d   : > { %v4427_v38 = vpop.f32.mrf.mxu0 }
 0x420   : > { %2928 = vmatmul.msk.f32.gmra.mxu0 %vm5225_vm13, %v4111_v12  ;;  %vm5253_vm13 = vmmov %vm5096_vm0 }
 0x425   : > { %v4431_v59 = vpop.f32.mrf.mxu0 }
 0x428   : > { %2929 = vmatmul.msk.f32.gmra.mxu0 %vm5226_vm14, %v4121_v15  ;;  %vm5254_vm14 = vmmov %vm5096_vm0 }
 0x42d   : > { %v4435_v42 = vpop.f32.mrf.mxu0 }
 0x430   : > { %2930 = vmatmul.msk.f32.gmra.mxu0 %vm5227_vm15, %v4131_v53  ;;  %vm5256_vm15 = vmmov %vm5096_vm0 }
 0x435   : > { %v4439_v60 = vpop.f32.mrf.mxu0 }
 0x438   : > { %2931 = vmatmul.msk.f32.gmra.mxu0 %vm5228_vm2, %v4141_v16  ;;  %vm5258_vm2 = vmmov %vm5096_vm0 }
 0x43d   : > { %v4443_v17 = vpop.f32.mrf.mxu0 }
 0x43e   : > { %5229 = vst [vmem:[#allocation16_spill] sm:$0xff] %v4443_v17 }
 0x440   : > { %2932 = vmatmul.msk.f32.gmra.mxu0 %vm5230_vm12, %v4151_v24  ;;  %vm5260_vm12 = vmmov %vm5096_vm0 }
 0x445   : > { %v4447_v11 = vpop.f32.mrf.mxu0 }
 0x446   : > { %5231 = vst [vmem:[#allocation32_spill] sm:$0xff] %v4447_v11 }
 0x448   : > { %2933 = vmatmul.msk.f32.gmra.mxu0 %vm5232_vm1, %v4161_v4  ;;  %vm5262_vm1 = vmmov %vm5096_vm0 }
 0x44d   : > { %v4451_v14 = vpop.f32.mrf.mxu0 }
 0x44e   : > { %5233 = vst [vmem:[#allocation40_spill] sm:$0xff] %v4451_v14 }
 0x450   : > { %2934 = vmatmul.msk.f32.gmra.mxu0 %vm5234_vm3, %v4171_v40  ;;  %vm5263_vm3 = vmmov %vm5096_vm0 }
 0x455   : > { %v4455_v1 = vpop.f32.mrf.mxu0 }
 0x456   : > { %5235 = vst [vmem:[#allocation12_spill] sm:$0xff] %v4455_v1 }
 0x458   : > { %2935 = vmatmul.msk.f32.gmra.mxu0 %vm5236_vm4, %v4181_v43  ;;  %vm5264_vm4 = vmmov %vm5096_vm0 }
 0x45d   : > { %v4459_v9 = vpop.f32.mrf.mxu0 }
 0x45e   : > { %5237 = vst [vmem:[#allocation47_spill] sm:$0xff] %v4459_v9  ;;  %v4481_v9 = vpop.f32.mrf.mxu3 }
 0x45f   : > { %5248 = vst [vmem:[#allocation36_spill] sm:$0xff] %v4481_v9 }
 0x460   : > { %2936 = vmatmul.msk.f32.gmra.mxu0 %vm5238_vm5, %v4191_v13  ;;  %vm5265_vm5 = vmmov %vm5096_vm0 }
 0x465   : > { %v4463_v63 = vpop.f32.mrf.mxu0 }
 0x466   : > { %5239 = vst [vmem:[#allocation31_spill] sm:$0xff] %v4463_v63  ;;  %v4485_v1 = vpop.f32.mrf.mxu3 }
 0x468   : > { %2937 = vmatmul.msk.f32.gmra.mxu0 %vm5240_vm6, %v4201_v46  ;;  %vm5266_vm6 = vmmov %vm5096_vm0 }
 0x46d   : > { %v4467_v21 = vpop.f32.mrf.mxu0 }
 0x46e   : > { %5241 = vst [vmem:[#allocation43_spill] sm:$0xff] %v4467_v21 }
 0x470   : > { %2938 = vmatmul.msk.f32.gmra.mxu0 %vm5242_vm7, %v4211_v47  ;;  %vm5267_vm7 = vmmov %vm5096_vm0 }
 0x475   : > { %v4471_v5 = vpop.f32.mrf.mxu0 }
 0x476   : > { %5243 = vst [vmem:[#allocation27_spill] sm:$0xff] %v4471_v5 }
 0x478   : > { %2939 = vmatmul.msk.f32.gmra.mxu0 %vm5244_vm8, %v4221_v50 }
 0x47d   : > { %v4475_v41 = vpop.f32.mrf.mxu0 }
 0x47e   : > { %5245 = vst [vmem:[#allocation41_spill] sm:$0xff] %v4475_v41 }
 0x485   : > { %v1785_v8 = vpop.f32.mrf.mxu0 }
 0x486   : > { %v1830_v34 = vmul.f32 %v1785_v8, %v4071_v55  ;;  %v4489_v8 = vpop.f32.mrf.mxu3 }
 0x487   : > { %5251 = vst [vmem:[#allocation33_spill] sm:$0xff] %v4489_v8 }
 0x488   : > { %v1845_v31 = vsel %vm5247_vm9, %v1830_v34, 0.0 }
 0x489   : > { %1846 = vadd.xlane.f32.xlu1 %v1845_v31 }
 0x48d   : > { %v1788_v21 = vpop.f32.mrf.mxu0 }
 0x48e   : > { %v1831_v57 = vmul.f32 %v1788_v21, %v4084_v61  ;;  %v4494_v21 = vpop.f32.mrf.mxu3 }
 0x48f   : > { %5252 = vst [vmem:[#allocation42_spill] sm:$0xff] %v4494_v21 }
 0x490   : > { %v1848_v5 = vsel %vm5249_vm10, %v1831_v57, 0.0 }
 0x491   : > { %1849 = vadd.xlane.f32.xlu0 %v1848_v5 }
 0x495   : > { %v1791_v22 = vpop.f32.mrf.mxu0 }
 0x496   : > { %v1832_v41 = vmul.f32 %v1791_v22, %v4098_v23 }
 0x498   : > { %v1851_v63 = vsel %vm5250_vm11, %v1832_v41, 0.0  ;;  %v4499_v41 = vpop.f32.mrf.mxu3 }
 0x499   : > { %1852 = vadd.xlane.f32.xlu2 %v1851_v63  ;;  %5255 = vst [vmem:[#allocation5_spill] sm:$0xff] %v4499_v41 }
 0x49d   : > { %v1794_v55 = vpop.f32.mrf.mxu0 }
 0x49e   : > { %v1833_v34 = vmul.f32 %v1794_v55, %v4111_v12 }
 0x4a0   : > { %v1854_v31 = vsel %vm5096_vm0, %v1833_v34, 0.0 }
 0x4a1   : > { %1855 = vadd.xlane.f32.xlu1 %v1854_v31 }
 0x4a5   : > { %v1797_v61 = vpop.f32.mrf.mxu0 }
 0x4a6   : > { %v1834_v57 = vmul.f32 %v1797_v61, %v4121_v15  ;;  %v4503_v15 = vpop.f32.mrf.mxu3 }
 0x4a7   : > { %5257 = vst [vmem:[#allocation6_spill] sm:$0xff] %v4503_v15 }
 0x4a8   : > { %v1857_v5 = vsel %vm5253_vm13, %v1834_v57, 0.0 }
 0x4a9   : > { %1858 = vadd.xlane.f32.xlu2 %v1857_v5 }
 0x4ad   : > { %v1800_v23 = vpop.f32.mrf.mxu0 }
 0x4ae   : > { %v1835_v22 = vmul.f32 %v1800_v23, %v4131_v53  ;;  %v4507_v5 = vpop.f32.mrf.mxu3 }
 0x4af   : > { %5259 = vst [vmem:[#allocation9_spill] sm:$0xff] %v4507_v5 }
 0x4b0   : > { %v1860_v63 = vsel %vm5254_vm14, %v1835_v22, 0.0 }
 0x4b1   : > { %1861 = vadd.xlane.f32.xlu0 %v1860_v63 }
 0x4b5   : > { %v1803_v12 = vpop.f32.mrf.mxu0 }
 0x4b6   : > { %v1836_v55 = vmul.f32 %v1803_v12, %v4141_v16  ;;  %v4512_v12 = vpop.f32.mrf.mxu3 }
 0x4b7   : > { %5261 = vst [vmem:[#allocation10_spill] sm:$0xff] %v4512_v12 }
 0x4b8   : > { %v1863_v34 = vsel %vm5256_vm15, %v1836_v55, 0.0 }
 0x4b9   : > { %1864 = vadd.xlane.f32.xlu1 %v1863_v34 }
 0x4bd   : > { %v1806_v31 = vpop.f32.mrf.mxu0 }
 0x4be   : > { %v1837_v61 = vmul.f32 %v1806_v31, %v4151_v24 }
 0x4c0   : > { %v1866_v57 = vsel %vm5258_vm2, %v1837_v61, 0.0  ;;  %v1723_v61 = vpop.f32.mrf.mxu3 }
 0x4c1   : > { %1867 = vadd.xlane.f32.xlu2 %v1866_v57 }
 0x4c5   : > { %v1809_v53 = vpop.f32.mrf.mxu0 }
 0x4c6   : > { %v1838_v23 = vmul.f32 %v1809_v53, %v4161_v4 }
 0x4c8   : > { %v1869_v22 = vsel %vm5260_vm12, %v1838_v23, 0.0  ;;  %v1726_v23 = vpop.f32.mrf.mxu3 }
 0x4c9   : > { %1870 = vadd.xlane.f32.xlu0 %v1869_v22 }
 0x4cd   : > { %v1812_v16 = vpop.f32.mrf.mxu0 }
 0x4ce   : > { %v1839_v63 = vmul.f32 %v1812_v16, %v4171_v40 }
 0x4d0   : > { %v1872_v55 = vsel %vm5262_vm1, %v1839_v63, 0.0 }
 0x4d1   : > { %1873 = vadd.xlane.f32.xlu1 %v1872_v55  ;;  %v1729_v55 = vpop.f32.mrf.mxu3 }
 0x4d5   : > { %v1815_v24 = vpop.f32.mrf.mxu0 }
 0x4d6   : > { %v1840_v34 = vmul.f32 %v1815_v24, %v4181_v43 }
 0x4d8   : > { %v1875_v31 = vsel %vm5263_vm3, %v1840_v34, 0.0 }
 0x4d9   : > { %1876 = vadd.xlane.f32.xlu2 %v1875_v31  ;;  %v1732_v31 = vpop.f32.mrf.mxu3 }
 0x4dd   : > { %v1818_v57 = vpop.f32.mrf.mxu0 }
 0x4de   : > { %v1841_v4 = vmul.f32 %v1818_v57, %v4191_v13 }
 0x4e0   : > { %v1878_v53 = vsel %vm5264_vm4, %v1841_v4, 0.0  ;;  %v1890_v4 = vmul.f32 0.0012755102, %v1723_v61 }
 0x4e1   : > { %1879 = vadd.xlane.f32.xlu0 %v1878_v53  ;;  %v1735_v15 = vpop.f32.mrf.mxu3 }
 0x4e5   : > { %v1821_v40 = vpop.f32.mrf.mxu0 }
 0x4e6   : > { %v1842_v22 = vmul.f32 %v1821_v40, %v4201_v46  ;;  %v1920_v46 = vmul.f32 %v1890_v4, %v1890_v4 }
 0x4e8   : > { %v1881_v16 = vsel %vm5265_vm5, %v1842_v22, 0.0 }
 0x4e9   : > { %1882 = vadd.xlane.f32.xlu1 %v1881_v16  ;;  %v4525_v16 = vmul.f32 0.0012755102, %v1726_v23 }
 0x4ed   : > { %v1824_v63 = vpop.f32.mrf.mxu0 }
 0x4ee   : > { %v1843_v43 = vmul.f32 %v1824_v63, %v4211_v47  ;;  %v4527_v47 = vpop.f32.mrf.mxu1  ;;  %v4529_v63 = vpop.f32.mrf.mxu2 }
 0x4ef   : > { %5268 = vst [vmem:[#allocation22_spill] sm:$0xff] %v4527_v47 }
 0x4f0   : > { %v1884_v24 = vsel %vm5266_vm6, %v1843_v43, 0.0  ;;  %5269 = vst [vmem:[#allocation23_spill] sm:$0xff] %v4529_v63 }
 0x4f1   : > { %1885 = vadd.xlane.f32.xlu2 %v1884_v24 }
 0x4f5   : > { %v1827_v34 = vpop.f32.mrf.mxu0 }
 0x4f6   : > { %v1844_v13 = vmul.f32 %v1827_v34, %v4221_v50  ;;  %v1921_v50 = vmul.f32 %v4525_v16, %v4525_v16  ;;  %v4541_v8 = vpop.f32.mrf.mxu2 }
 0x4f7   : > { %5271 = vst [vmem:[#allocation18_spill] sm:$0xff] %v4541_v8 }
 0x4f8   : > { %v1887_v57 = vsel %vm5267_vm7, %v1844_v13, 0.0  ;;  %v4533_v13 = vmul.f32 0.0012755102, %v1729_v55 }
 0x4f9   : > { %1888 = vadd.xlane.f32.xlu0 %v1887_v57 }
 0x4fa   : > { %v1922_v12 = vmul.f32 %v4533_v13, %v4533_v13 }
 0x4fc   : > { %v1847_v53 = vpop.xlane.xlu1 %1846 }
 0x4fd   : > { %v1905_v40 = vmul.f32 0.0012755102, %v1847_v53  ;;  %v4535_v53 = vpop.f32.mrf.mxu3 }
 0x4ff   : > { %v1935_v22 = vsub.f32 %v1905_v40, %v1920_v46 }
 0x501   : > { %v1965_v5 = vadd.f32 1e-05, %v1935_v22  ;;  %v4537_v22 = vpop.f32.mrf.mxu1 }
 0x502   : > { %5270 = vst [vmem:[#allocation14_spill] sm:$0xff] %v4537_v22 }
 0x503   : > { %3008 = vrsqrt.f32 %v1965_v5  ;;  %vm1986_vm9 = vweird.f32 %v1965_v5 }
 0x504   : > { %v1850_v43 = vpop.xlane.xlu0 %1849 }
 0x505   : > { %v1906_v24 = vmul.f32 0.0012755102, %v1850_v43  ;;  %v1741_v8 = vpop.f32.mrf.mxu3 }
 0x507   : > { %v1936_v61 = vsub.f32 %v1906_v24, %v1921_v50 }
 0x509   : > { %v3009_v34 = vpop.eup %3008  ;;  %v1966_v57 = vadd.f32 1e-05, %v1936_v61  ;;  %v4549_v61 = vmul.f32 0.0012755102, %v1732_v31  ;;  %v4554_v22 = vpop.f32.mrf.mxu1 }
 0x50a   : > { %v1981_v23 = vmul.f32 %v3009_v34, %v1965_v5  ;;  %vm1987_vm8 = vweird.f32 %v3009_v34 }
 0x50b   : > { %3010 = vrsqrt.f32 %v1966_v57  ;;  %vm1988_vm10 = vmor %vm1986_vm9, %vm1987_vm8  ;;  %v1923_v11 = vmul.f32 %v4549_v61, %v4549_v61  ;;  %vm1996_vm0 = vweird.f32 %v1966_v57 }
 0x50c   : > { %v1982_v46 = vmul.f32 %v3009_v34, %v1981_v23  ;;  %v1853_v40 = vpop.xlane.xlu2 %1852 }
 0x50d   : > { %v1907_v21 = vmul.f32 0.0012755102, %v1853_v40  ;;  %v1950_v40 = vld [vmem:[%s4547_s30] sm:$0xff] }
 0x50e   : > { %v1983_v43 = vmul.f32 0.5, %v1982_v46 }
 0x50f   : > { %v1937_v50 = vsub.f32 %v1907_v21, %v1922_v12 }
 0x510   : > { %v1984_v55 = vsub.f32 1.5, %v1983_v43 }
 0x511   : > { %v3011_v24 = vpop.eup %3010  ;;  %v1967_v23 = vadd.f32 1e-05, %v1937_v50  ;;  %v4564_v50 = vmul.f32 0.0012755102, %v1735_v15  ;;  %v4575_v33 = vpop.f32.mrf.mxu1 }
 0x512   : > { %v1991_v41 = vmul.f32 %v3011_v24, %v1966_v57  ;;  %v1985_v58 = vmul.f32 %v3009_v34, %v1984_v55  ;;  %vm1997_vm11 = vweird.f32 %v3011_v24  ;;  %5272 = vst [vmem:[#allocation11_spill] sm:$0xff] %v4575_v33 }
 0x513   : > { %3012 = vrsqrt.f32 %v1967_v23  ;;  %vm1998_vm13 = vmor %vm1996_vm0, %vm1997_vm11  ;;  %vm2006_vm15 = vweird.f32 %v1967_v23 }
 0x514   : > { %v1992_v21 = vmul.f32 %v3011_v24, %v1991_v41  ;;  %v1856_v12 = vpop.xlane.xlu1 %1855  ;;  %v1989_v46 = vsel %vm1988_vm10, %v3009_v34, %v1985_v58  ;;  %v4562_v41 = vpop.f32.mrf.mxu2 }
 0x515   : > { %v1908_v9 = vmul.f32 0.0012755102, %v1856_v12  ;;  %v2130_v43 = vmul.f32 %v1989_v46, %v1950_v40 }
 0x516   : > { %v1993_v31 = vmul.f32 0.5, %v1992_v21  ;;  %v1951_v21 = vld [vmem:[%s4547_s30 + $0x8] sm:$0xff] }
 0x517   : > { %v1938_v5 = vsub.f32 %v1908_v9, %v1923_v11  ;;  %2192 = vperm.xlu1 %2986, %v2130_v43   ;;  %v2160_v40 = vmul.f32 %v2130_v43, %v1890_v4  ;;  %v2145_v9 = vld [vmem:[%s4560_s8] sm:$0xff]  ;;  %v2146_v4 = vld [vmem:[%s4560_s8 + $0x8] sm:$0xff] }
 0x518   : > { %v1994_v58 = vsub.f32 1.5, %v1993_v31  ;;  %v1924_v31 = vmul.f32 %v4564_v50, %v4564_v50 }
 0x519   : > { %v3013_v34 = vpop.eup %3012  ;;  %v4566_v55 = vadd.f32 1e-05, %v1938_v5  ;;  %v2175_v28 = vsub.f32 %v2145_v9, %v2160_v40 }
 0x51a   : > { %v2001_v11 = vmul.f32 %v3013_v34, %v1967_v23  ;;  %v1995_v12 = vmul.f32 %v3011_v24, %v1994_v58  ;;  %v1744_v58 = vpop.f32.mrf.mxu3  ;;  %vm2007_vm14 = vweird.f32 %v3013_v34 }
 0x51b   : > { %3014 = vrsqrt.f32 %v4566_v55  ;;  %vm2008_vm2 = vmor %vm2006_vm15, %vm2007_vm14  ;;  %vm2016_vm1 = vweird.f32 %v4566_v55 }
 0x51c   : > { %v2002_v46 = vmul.f32 %v3013_v34, %v2001_v11  ;;  %v1859_v29 = vpop.xlane.xlu2 %1858  ;;  %v1999_v17 = vsel %vm1998_vm13, %v3011_v24, %v1995_v12  ;;  %v4578_v24 = vmul.f32 0.0012755102, %v4535_v53 }
 0x51d   : > { %v1909_v15 = vmul.f32 0.0012755102, %v1859_v29  ;;  %v2131_v5 = vmul.f32 %v1999_v17, %v1951_v21  ;;  %v4580_v17 = vpop.f32.mrf.mxu2  ;;  %v1952_v21 = vld [vmem:[%s4547_s30 + $0x10] sm:$0xff] }
 0x51e   : > { %v2003_v63 = vmul.f32 0.5, %v2002_v46  ;;  %5273 = vst [vmem:[#allocation13_spill] sm:$0xff] %v4580_v17  ;;  %v1925_v53 = vmul.f32 %v4578_v24, %v4578_v24 }
 0x51f   : > { %v1939_v43 = vsub.f32 %v1909_v15, %v1924_v31  ;;  %2372 = vperm.xlu1 %2986, %v2175_v28   ;;  %2197 = vperm.xlu2 %2987, %v2131_v5   ;;  %v2161_v57 = vmul.f32 %v2131_v5, %v4525_v16  ;;  %v2147_v5 = vld [vmem:[%s4560_s8 + $0x10] sm:$0xff] }
 0x520   : > { %v2004_v47 = vsub.f32 1.5, %v2003_v63 }
 0x521   : > { %v3015_v11 = vpop.eup %3014  ;;  %v1969_v29 = vadd.f32 1e-05, %v1939_v43  ;;  %v2176_v40 = vsub.f32 %v2146_v4, %v2161_v57  ;;  %v4588_v57 = vmul.f32 0.0012755102, %v1741_v8 }
 0x522   : > { %v2005_v9 = vmul.f32 %v3013_v34, %v2004_v47  ;;  %v2011_v28 = vmul.f32 %v3015_v11, %v4566_v55  ;;  %vm2017_vm12 = vweird.f32 %v3015_v11  ;;  %v1747_v17 = vpop.f32.mrf.mxu3 }
 0x523   : > { %3016 = vrsqrt.f32 %v1969_v29  ;;  %2377 = vperm.xlu0 %2985, %v2176_v40   ;;  %vm2018_vm3 = vmor %vm2016_vm1, %vm2017_vm12  ;;  %vm2026_vm5 = vweird.f32 %v1969_v29 }
 0x524   : > { %v2012_v16 = vmul.f32 %v3015_v11, %v2011_v28  ;;  %v1862_v63 = vpop.xlane.xlu0 %1861  ;;  %v2009_v12 = vsel %vm2008_vm2, %v3013_v34, %v2005_v9  ;;  %v1953_v9 = vld [vmem:[%s4547_s30 + $0x18] sm:$0xff] }
 0x525   : > { %v1910_v46 = vmul.f32 0.0012755102, %v1862_v63  ;;  %v2132_v31 = vmul.f32 %v2009_v12, %v1952_v21  ;;  %v4592_v63 = vpop.f32.mrf.mxu1  ;;  %v1926_v12 = vmul.f32 %v4588_v57, %v4588_v57 }
 0x526   : > { %v2013_v15 = vmul.f32 0.5, %v2012_v16  ;;  %5274 = vst [vmem:[#allocation45_spill] sm:$0xff] %v4592_v63  ;;  %v1955_v63 = vld [vmem:[%s4547_s30 + $0x28] sm:$0xff] }
 0x527   : > { %v1940_v4 = vsub.f32 %v1910_v46, %v1925_v53  ;;  %v2162_v47 = vmul.f32 %v2132_v31, %v4533_v13  ;;  %v4594_v13 = vpop.f32.mrf.mxu2 }
 0x528   : > { %v2014_v23 = vsub.f32 1.5, %v2013_v15  ;;  %5275 = vst [vmem:[#allocation29_spill] sm:$0xff] %v4594_v13 }
 0x529   : > { %v3017_v43 = vpop.eup %3016  ;;  %v1970_v40 = vadd.f32 1e-05, %v1940_v4  ;;  %v2177_v28 = vsub.f32 %v2147_v5, %v2162_v47 }
 0x52a   : > { %v2021_v34 = vmul.f32 %v3017_v43, %v1969_v29  ;;  %v2015_v33 = vmul.f32 %v3015_v11, %v2014_v23  ;;  %vm2027_vm4 = vweird.f32 %v3017_v43 }
 0x52b   : > { %3018 = vrsqrt.f32 %v1970_v40  ;;  %2382 = vperm.xlu2 %2987, %v2177_v28   ;;  %2202 = vperm.xlu0 %2985, %v2132_v31   ;;  %v4598_v31 = vmul.f32 0.0012755102, %v1744_v58  ;;  %vm2028_vm6 = vmor %vm2026_vm5, %vm2027_vm4  ;;  %vm2036_vm8 = vweird.f32 %v1970_v40 }
 0x52c   : > { %v2022_v21 = vmul.f32 %v3017_v43, %v2021_v34  ;;  %v1865_v16 = vpop.xlane.xlu1 %1864  ;;  %v2019_v8 = vsel %vm2018_vm3, %v3015_v11, %v2015_v33  ;;  %v2148_v33 = vld [vmem:[%s4560_s8 + $0x18] sm:$0xff]  ;;  %v1954_v11 = vld [vmem:[%s4547_s30 + $0x20] sm:$0xff] }
 0x52d   : > { %v1911_v55 = vmul.f32 0.0012755102, %v1865_v16  ;;  %v2133_v53 = vmul.f32 %v2019_v8, %v1953_v9  ;;  %v1750_v16 = vpop.f32.mrf.mxu3  ;;  %v1927_v58 = vmul.f32 %v4598_v31, %v4598_v31 }
 0x52e   : > { %v2023_v46 = vmul.f32 0.5, %v2022_v21 }
 0x52f   : > { %v1941_v15 = vsub.f32 %v1911_v55, %v1926_v12  ;;  %2207 = vperm.xlu1 %2986, %v2133_v53   ;;  %v2163_v23 = vmul.f32 %v2133_v53, %v4549_v61  ;;  %v4603_v12 = vpop.f32.mrf.mxu1  ;;  %v4607_v29 = vpop.f32.mrf.mxu2 }
 0x530   : > { %v2024_v5 = vsub.f32 1.5, %v2023_v46  ;;  %5276 = vst [vmem:[#allocation38_spill] sm:$0xff] %v4603_v12 }
 0x531   : > { %v3019_v4 = vpop.eup %3018  ;;  %v1971_v47 = vadd.f32 1e-05, %v1941_v15  ;;  %v2178_v46 = vsub.f32 %v2148_v33, %v2163_v23  ;;  %5277 = vst [vmem:[#allocation15_spill] sm:$0xff] %v4607_v29  ;;  %v2149_v33 = vld [vmem:[%s4560_s8 + $0x20] sm:$0xff] }
 0x532   : > { %v2031_v28 = vmul.f32 %v3019_v4, %v1970_v40  ;;  %v2025_v34 = vmul.f32 %v3017_v43, %v2024_v5  ;;  %vm2037_vm7 = vweird.f32 %v3019_v4 }
 0x533   : > { %3020 = vrsqrt.f32 %v1971_v47  ;;  %vm2038_vm9 = vmor %vm2036_vm8, %vm2037_vm7  ;;  %vm2046_vm11 = vweird.f32 %v1971_v47 }
 0x534   : > { %v2032_v9 = vmul.f32 %v3019_v4, %v2031_v28  ;;  %v1868_v21 = vpop.xlane.xlu2 %1867  ;;  %v2029_v8 = vsel %vm2028_vm6, %v3017_v43, %v2025_v34  ;;  %v4609_v43 = vmul.f32 0.0012755102, %v1747_v17 }
 0x535   : > { %v1912_v55 = vmul.f32 0.0012755102, %v1868_v21  ;;  %v2134_v61 = vmul.f32 %v2029_v8, %v1954_v11 }
 0x536   : > { %v2033_v53 = vmul.f32 0.5, %v2032_v9 }
 0x537   : > { %v1942_v15 = vsub.f32 %v1912_v55, %v1927_v58  ;;  %2387 = vperm.xlu1 %2986, %v2178_v46   ;;  %2212 = vperm.xlu0 %2985, %v2134_v61   ;;  %v2164_v13 = vmul.f32 %v2134_v61, %v4564_v50  ;;  %v1928_v58 = vmul.f32 %v4609_v43, %v4609_v43  ;;  %v4616_v50 = vpop.f32.mrf.mxu1  ;;  %v4618_v61 = vpop.f32.mrf.mxu2 }
 0x538   : > { %v2034_v5 = vsub.f32 1.5, %v2033_v53  ;;  %v1753_v53 = vpop.f32.mrf.mxu3  ;;  %5278 = vst [vmem:[#allocation19_spill] sm:$0xff] %v4616_v50 }
 0x539   : > { %v3021_v28 = vpop.eup %3020  ;;  %v1972_v34 = vadd.f32 1e-05, %v1942_v15  ;;  %v2179_v17 = vsub.f32 %v2149_v33, %v2164_v13  ;;  %5279 = vst [vmem:[#allocation20_spill] sm:$0xff] %v4618_v61  ;;  %v1956_v33 = vld [vmem:[%s4547_s30 + $0x30] sm:$0xff] }
 0x53a   : > { %v2041_v21 = vmul.f32 %v3021_v28, %v1971_v47  ;;  %v2035_v23 = vmul.f32 %v3019_v4, %v2034_v5  ;;  %vm2047_vm10 = vweird.f32 %v3021_v28 }
 0x53b   : > { %3022 = vrsqrt.f32 %v1972_v34  ;;  %vm2048_vm0 = vmor %vm2046_vm11, %vm2047_vm10  ;;  %vm2056_vm14 = vweird.f32 %v1972_v34 }
 0x53c   : > { %v2042_v11 = vmul.f32 %v3021_v28, %v2041_v21  ;;  %v1871_v9 = vpop.xlane.xlu0 %1870  ;;  %v2039_v8 = vsel %vm2038_vm9, %v3019_v4, %v2035_v23  ;;  %v4620_v21 = vmul.f32 0.0012755102, %v1750_v16 }
 0x53d   : > { %v1913_v55 = vmul.f32 0.0012755102, %v1871_v9  ;;  %v2135_v46 = vmul.f32 %v2039_v8, %v1955_v63  ;;  %v2150_v9 = vld [vmem:[%s4560_s8 + $0x28] sm:$0xff] }
 0x53e   : > { %v2043_v15 = vmul.f32 0.5, %v2042_v11 }
 0x53f   : > { %v1943_v40 = vsub.f32 %v1913_v55, %v1928_v58  ;;  %2217 = vperm.xlu2 %2987, %v2135_v46   ;;  %2392 = vperm.xlu0 %2985, %v2179_v17   ;;  %v2165_v63 = vmul.f32 %v2135_v46, %v4578_v24  ;;  %v1929_v17 = vmul.f32 %v4620_v21, %v4620_v21  ;;  %v4627_v50 = vpop.f32.mrf.mxu1 }
 0x540   : > { %v2044_v5 = vsub.f32 1.5, %v2043_v15  ;;  %v1756_v47 = vpop.f32.mrf.mxu3  ;;  %5280 = vst [vmem:[#allocation24_spill] sm:$0xff] %v4627_v50 }
 0x541   : > { %v3023_v4 = vpop.eup %3022  ;;  %v1973_v23 = vadd.f32 1e-05, %v1943_v40  ;;  %v2180_v16 = vsub.f32 %v2150_v9, %v2165_v63  ;;  %v1957_v9 = vld [vmem:[%s4547_s30 + $0x38] sm:$0xff] }
 0x542   : > { %v2051_v13 = vmul.f32 %v3023_v4, %v1972_v34  ;;  %v2045_v11 = vmul.f32 %v3021_v28, %v2044_v5  ;;  %vm2057_vm13 = vweird.f32 %v3023_v4 }
 0x543   : > { %3024 = vrsqrt.f32 %v1973_v23  ;;  %vm2058_vm15 = vmor %vm2056_vm14, %vm2057_vm13  ;;  %vm2066_vm12 = vweird.f32 %v1973_v23 }
 0x544   : > { %v2052_v8 = vmul.f32 %v3023_v4, %v2051_v13  ;;  %v1874_v58 = vpop.xlane.xlu1 %1873  ;;  %v2049_v55 = vsel %vm2048_vm0, %v3021_v28, %v2045_v11  ;;  %v4629_v13 = vmul.f32 0.0012755102, %v1753_v53 }
 0x545   : > { %v1914_v15 = vmul.f32 0.0012755102, %v1874_v58  ;;  %v2136_v61 = vmul.f32 %v2049_v55, %v1956_v33  ;;  %v4632_v58 = vpop.f32.mrf.mxu2  ;;  %v2151_v33 = vld [vmem:[%s4560_s8 + $0x30] sm:$0xff] }
 0x546   : > { %v2053_v40 = vmul.f32 0.5, %v2052_v8  ;;  %5281 = vst [vmem:[#allocation21_spill] sm:$0xff] %v4632_v58  ;;  %v4638_v58 = vmul.f32 0.0012755102, %v1756_v47 }
 0x547   : > { %v1944_v24 = vsub.f32 %v1914_v15, %v1929_v17  ;;  %2222 = vperm.xlu1 %2986, %v2136_v61   ;;  %2397 = vperm.xlu2 %2987, %v2180_v16   ;;  %v2166_v11 = vmul.f32 %v2136_v61, %v4588_v57  ;;  %v1930_v16 = vmul.f32 %v4629_v13, %v4629_v13 }
 0x548   : > { %v2054_v46 = vsub.f32 1.5, %v2053_v40  ;;  %v1931_v47 = vmul.f32 %v4638_v58, %v4638_v58 }
 0x549   : > { %v3025_v5 = vpop.eup %3024  ;;  %v1974_v28 = vadd.f32 1e-05, %v1944_v24  ;;  %v2181_v40 = vsub.f32 %v2151_v33, %v2166_v11  ;;  %v2152_v11 = vld [vmem:[%s4560_s8 + $0x38] sm:$0xff]  ;;  %v4643_v33 = vpop.f32.mrf.mxu1 }
 0x54a   : > { %v2061_v63 = vmul.f32 %v3025_v5, %v1973_v23  ;;  %v2055_v8 = vmul.f32 %v3023_v4, %v2054_v46  ;;  %vm2067_vm2 = vweird.f32 %v3025_v5  ;;  %5282 = vst [vmem:[#allocation25_spill] sm:$0xff] %v4643_v33 }
 0x54b   : > { %3026 = vrsqrt.f32 %v1974_v28  ;;  %vm2068_vm1 = vmor %vm2066_vm12, %vm2067_vm2  ;;  %vm2076_vm4 = vweird.f32 %v1974_v28 }
 0x54c   : > { %v2062_v55 = vmul.f32 %v3025_v5, %v2061_v63  ;;  %v1877_v17 = vpop.xlane.xlu2 %1876  ;;  %v2059_v15 = vsel %vm2058_vm15, %v3023_v4, %v2055_v8  ;;  %v1759_v8 = vpop.f32.mrf.mxu3 }
 0x54d   : > { %v1915_v53 = vmul.f32 0.0012755102, %v1877_v17  ;;  %v2137_v24 = vmul.f32 %v2059_v15, %v1957_v9  ;;  %v1958_v17 = vld [vmem:[%s4547_s30 + $0x40] sm:$0xff]  ;;  %v4645_v9 = vpop.f32.mrf.mxu2 }
 0x54e   : > { %v2063_v57 = vmul.f32 0.5, %v2062_v55  ;;  %5283 = vst [vmem:[#allocation39_spill] sm:$0xff] %v4645_v9  ;;  %v1959_v9 = vld [vmem:[%s4547_s30 + $0x48] sm:$0xff] }
 0x54f   : > { %v1945_v61 = vsub.f32 %v1915_v53, %v1930_v16  ;;  %2402 = vperm.xlu1 %2986, %v2181_v40   ;;  %2227 = vperm.xlu0 %2985, %v2137_v24   ;;  %v2167_v4 = vmul.f32 %v2137_v24, %v4598_v31 }
 0x550   : > { %v2064_v34 = vsub.f32 1.5, %v2063_v57 }
 0x551   : > { %v3027_v46 = vpop.eup %3026  ;;  %v1975_v63 = vadd.f32 1e-05, %v1945_v61  ;;  %v2182_v23 = vsub.f32 %v2152_v11, %v2167_v4 }
 0x552   : > { %v2071_v50 = vmul.f32 %v3027_v46, %v1974_v28  ;;  %v2065_v29 = vmul.f32 %v3025_v5, %v2064_v34  ;;  %vm2077_vm3 = vweird.f32 %v3027_v46  ;;  %v4649_v34 = vmul.f32 0.0012755102, %v1759_v8 }
 0x553   : > { %3028 = vrsqrt.f32 %v1975_v63  ;;  %vm2078_vm5 = vmor %vm2076_vm4, %vm2077_vm3  ;;  %vm2086_vm7 = vweird.f32 %v1975_v63 }
 0x554   : > { %v2072_v55 = vmul.f32 %v3027_v46, %v2071_v50  ;;  %v1880_v15 = vpop.xlane.xlu0 %1879  ;;  %v2069_v16 = vsel %vm2068_vm1, %v3025_v5, %v2065_v29  ;;  %v1762_v4 = vpop.f32.mrf.mxu3 }
 0x555   : > { %v1916_v31 = vmul.f32 0.0012755102, %v1880_v15  ;;  %v2138_v53 = vmul.f32 %v2069_v16, %v1958_v17  ;;  %v2153_v15 = vld [vmem:[%s4560_s8 + $0x40] sm:$0xff]  ;;  %v1932_v16 = vmul.f32 %v4649_v34, %v4649_v34  ;;  %v4658_v28 = vpop.f32.mrf.mxu2 }
 0x556   : > { %v2073_v40 = vmul.f32 0.5, %v2072_v55 }
 0x557   : > { %v1946_v24 = vsub.f32 %v1916_v31, %v1931_v47  ;;  %2232 = vperm.xlu2 %2987, %v2138_v53   ;;  %2407 = vperm.xlu0 %2985, %v2182_v23   ;;  %v2168_v29 = vmul.f32 %v2138_v53, %v4609_v43  ;;  %v4656_v43 = vpop.f32.mrf.mxu1 }
 0x558   : > { %v2074_v57 = vsub.f32 1.5, %v2073_v40 }
 0x559   : > { %v3029_v61 = vpop.eup %3028  ;;  %v1976_v50 = vadd.f32 1e-05, %v1946_v24  ;;  %v2183_v31 = vsub.f32 %v2153_v15, %v2168_v29  ;;  %v2154_v29 = vld [vmem:[%s4560_s8 + $0x48] sm:$0xff] }
 0x55a   : > { %v2081_v5 = vmul.f32 %v3029_v61, %v1975_v63  ;;  %v2075_v33 = vmul.f32 %v3027_v46, %v2074_v57  ;;  %vm2087_vm6 = vweird.f32 %v3029_v61 }
 0x55b   : > { %3030 = vrsqrt.f32 %v1976_v50  ;;  %vm2088_vm8 = vmor %vm2086_vm7, %vm2087_vm6  ;;  %vm2096_vm10 = vweird.f32 %v1976_v50 }
 0x55c   : > { %v2082_v17 = vmul.f32 %v3029_v61, %v2081_v5  ;;  %v1883_v11 = vpop.xlane.xlu1 %1882  ;;  %v2079_v55 = vsel %vm2078_vm5, %v3027_v46, %v2075_v33  ;;  %v4660_v46 = vmul.f32 0.0012755102, %v1762_v4  ;;  %v1960_v5 = vld [vmem:[%s4547_s30 + $0x50] sm:$0xff]  ;;  %vm5284_vm5 = vcmask 130048  }
 0x55d   : > { %v1917_v47 = vmul.f32 0.0012755102, %v1883_v11  ;;  %v2139_v8 = vmul.f32 %v2079_v55, %v1959_v9  ;;  %vm5285_vm6 = vmmov %vm5284_vm5 }
 0x55e   : > { %v2083_v53 = vmul.f32 0.5, %v2082_v17  ;;  %vm5286_vm7 = vmmov %vm5284_vm5 }
 0x55f   : > { %v1947_v23 = vsub.f32 %v1917_v47, %v1932_v16  ;;  %2237 = vperm.xlu1 %2986, %v2139_v8   ;;  %2412 = vperm.xlu2 %2987, %v2183_v31   ;;  %v2169_v57 = vmul.f32 %v2139_v8, %v4620_v21  ;;  %v1933_v16 = vmul.f32 %v4660_v46, %v4660_v46  ;;  %v4667_v63 = vpop.f32.mrf.mxu1  ;;  %v4669_v8 = vpop.f32.mrf.mxu2 }
 0x560   : > { %v2084_v40 = vsub.f32 1.5, %v2083_v53  ;;  %v1765_v53 = vpop.f32.mrf.mxu3 }
 0x561   : > { %v3031_v24 = vpop.eup %3030  ;;  %v1977_v33 = vadd.f32 1e-05, %v1947_v23  ;;  %v2184_v31 = vsub.f32 %v2154_v29, %v2169_v57 }
 0x562   : > { %v2091_v9 = vmul.f32 %v3031_v24, %v1976_v50  ;;  %v2085_v15 = vmul.f32 %v3029_v61, %v2084_v40  ;;  %vm2097_vm9 = vweird.f32 %v3031_v24 }
 0x563   : > { %3032 = vrsqrt.f32 %v1977_v33  ;;  %vm2098_vm11 = vmor %vm2096_vm10, %vm2097_vm9  ;;  %vm2106_vm13 = vweird.f32 %v1977_v33 }
 0x564   : > { %v2092_v11 = vmul.f32 %v3031_v24, %v2091_v9  ;;  %v1886_v17 = vpop.xlane.xlu2 %1885  ;;  %v2089_v55 = vsel %vm2088_vm8, %v3029_v61, %v2085_v15  ;;  %v4671_v9 = vmul.f32 0.0012755102, %v1765_v53  ;;  %vm5287_vm8 = vmmov %vm5284_vm5 }
 0x565   : > { %v1918_v47 = vmul.f32 0.0012755102, %v1886_v17  ;;  %v2140_v4 = vmul.f32 %v2089_v55, %v1960_v5  ;;  %v1961_v5 = vld [vmem:[%s4547_s30 + $0x58] sm:$0xff]  ;;  %v2155_v17 = vld [vmem:[%s4560_s8 + $0x50] sm:$0xff]  ;;  %vm5288_vm9 = vmmov %vm5284_vm5 }
 0x566   : > { %v2093_v23 = vmul.f32 0.5, %v2092_v11  ;;  %vm5290_vm10 = vmmov %vm5284_vm5 }
 0x567   : > { %v1948_v21 = vsub.f32 %v1918_v47, %v1933_v16  ;;  %2417 = vperm.xlu1 %2986, %v2184_v31   ;;  %2242 = vperm.xlu0 %2985, %v2140_v4   ;;  %v2170_v57 = vmul.f32 %v2140_v4, %v4629_v13  ;;  %v1934_v31 = vmul.f32 %v4671_v9, %v4671_v9  ;;  %v4679_v14 = vpop.f32.mrf.mxu1 }
 0x568   : > { %v2094_v40 = vsub.f32 1.5, %v2093_v23 }
 0x569   : > { %v3033_v61 = vpop.eup %3032  ;;  %v1978_v15 = vadd.f32 1e-05, %v1948_v21  ;;  %v2185_v12 = vsub.f32 %v2155_v17, %v2170_v57 }
 0x56a   : > { %v2101_v29 = vmul.f32 %v3033_v61, %v1977_v33  ;;  %v2095_v11 = vmul.f32 %v3031_v24, %v2094_v40  ;;  %vm2107_vm0 = vweird.f32 %v3033_v61 }
 0x56b   : > { %3034 = vrsqrt.f32 %v1978_v15  ;;  %vm2108_vm14 = vmor %vm2106_vm13, %vm2107_vm0  ;;  %vm2116_vm2 = vweird.f32 %v1978_v15 }
 0x56c   : > { %v2102_v55 = vmul.f32 %v3033_v61, %v2101_v29  ;;  %v1889_v16 = vpop.xlane.xlu0 %1888  ;;  %v2099_v47 = vsel %vm2098_vm11, %v3031_v24, %v2095_v11  ;;  %v4681_v24 = vpop.f32.mrf.mxu2  ;;  %vm5296_vm11 = vmmov %vm5284_vm5 }
 0x56d   : > { %v1919_v23 = vmul.f32 0.0012755102, %v1889_v16  ;;  %v2141_v53 = vmul.f32 %v2099_v47, %v1961_v5  ;;  %v1962_v16 = vld [vmem:[%s4547_s30 + $0x60] sm:$0xff]  ;;  %v2156_v5 = vld [vmem:[%s4560_s8 + $0x58] sm:$0xff]  ;;  %vm5301_vm0 = vmmov %vm5284_vm5 }
 0x56e   : > { %v2103_v21 = vmul.f32 0.5, %v2102_v55  ;;  %vm5308_vm13 = vmmov %vm5301_vm0 }
 0x56f   : > { %v1949_v13 = vsub.f32 %v1919_v23, %v1934_v31  ;;  %2247 = vperm.xlu2 %2987, %v2141_v53   ;;  %2422 = vperm.xlu0 %2985, %v2185_v12   ;;  %v2171_v29 = vmul.f32 %v2141_v53, %v4638_v58 }
 0x570   : > { %v2104_v50 = vsub.f32 1.5, %v2103_v21  ;;  %v2157_v21 = vld [vmem:[%s4560_s8 + $0x60] sm:$0xff] }
 0x571   : > { %v3035_v4 = vpop.eup %3034  ;;  %v1979_v40 = vadd.f32 1e-05, %v1949_v13  ;;  %v2186_v47 = vsub.f32 %v2156_v5, %v2171_v29  ;;  %v4687_v13 = vpop.f32.mrf.mxu1 }
 0x572   : > { %v2111_v11 = vmul.f32 %v3035_v4, %v1978_v15  ;;  %v2105_v57 = vmul.f32 %v3033_v61, %v2104_v50  ;;  %vm2117_vm15 = vweird.f32 %v3035_v4 }
 0x573   : > { %3036 = vrsqrt.f32 %v1979_v40  ;;  %vm2118_vm12 = vmor %vm2116_vm2, %vm2117_vm15  ;;  %vm2126_vm3 = vweird.f32 %v1979_v40 }
 0x574   : > { %v2112_v17 = vmul.f32 %v3035_v4, %v2111_v11  ;;  %v2109_v12 = vsel %vm2108_vm14, %v3033_v61, %v2105_v57  ;;  %v4689_v50 = vpop.f32.mrf.mxu2  ;;  %v1963_v11 = vld [vmem:[%s4547_s30 + $0x68] sm:$0xff]  ;;  %vm5314_vm14 = vmmov %vm5301_vm0 }
 0x575   : > { %v2142_v55 = vmul.f32 %v2109_v12, %v1962_v16  ;;  %v1964_v12 = vld [vmem:[%s4547_s30 + $0x70] sm:$0xff]  ;;  %vm5319_vm15 = vmmov %vm5301_vm0 }
 0x576   : > { %v2113_v31 = vmul.f32 0.5, %v2112_v17  ;;  %vm5325_vm2 = vmmov %vm5301_vm0 }
 0x577   : > { %2252 = vperm.xlu1 %2986, %v2142_v55   ;;  %2427 = vperm.xlu2 %2987, %v2186_v47   ;;  %v2172_v53 = vmul.f32 %v2142_v55, %v4649_v34  ;;  %v2158_v47 = vld [vmem:[%s4560_s8 + $0x68] sm:$0xff] }
 0x578   : > { %v2114_v58 = vsub.f32 1.5, %v2113_v31 }
 0x579   : > { %v3037_v23 = vpop.eup %3036  ;;  %v2187_v16 = vsub.f32 %v2157_v21, %v2172_v53  ;;  %v4695_v53 = vpop.f32.mrf.mxu1 }
 0x57a   : > { %v2121_v33 = vmul.f32 %v3037_v23, %v1979_v40  ;;  %v2115_v29 = vmul.f32 %v3035_v4, %v2114_v58  ;;  %vm2127_vm1 = vweird.f32 %v3037_v23  ;;  %v2198_v21 = vpop.permute.xlu2 %2197 }
 0x57b   : > { %vm2128_vm4 = vmor %vm2126_vm3, %vm2127_vm1 }
 0x57c   : > { %v2122_v61 = vmul.f32 %v3037_v23, %v2121_v33  ;;  %v2119_v5 = vsel %vm2118_vm12, %v3035_v4, %v2115_v29  ;;  %v4697_v33 = vpop.f32.mrf.mxu2  ;;  %vm5331_vm12 = vmmov %vm5301_vm0 }
 0x57d   : > { %v2143_v17 = vmul.f32 %v2119_v5, %v1963_v11  ;;  %v2159_v11 = vld [vmem:[%s4560_s8 + $0x70] sm:$0xff]  ;;  %vm5333_vm1 = vmmov %vm5301_vm0 }
 0x57e   : > { %v2123_v57 = vmul.f32 0.5, %v2122_v61  ;;  %vm5339_vm3 = vmmov %vm5301_vm0 }
 0x57f   : > { %2432 = vperm.xlu1 %2986, %v2187_v16   ;;  %2257 = vperm.xlu0 %2985, %v2143_v17   ;;  %v2173_v15 = vmul.f32 %v2143_v17, %v4660_v46 }
 0x580   : > { %v2124_v34 = vsub.f32 1.5, %v2123_v57 }
 0x581   : > { %v2188_v4 = vsub.f32 %v2158_v47, %v2173_v15  ;;  %v4702_v46 = vpop.f32.mrf.mxu1 }
 0x582   : > { %v2125_v55 = vmul.f32 %v3037_v23, %v2124_v34 }
 0x584   : > { %v2129_v31 = vsel %vm2128_vm4, %v3037_v23, %v2125_v55  ;;  %v4704_v16 = vpop.f32.mrf.mxu2 }
 0x585   : > { %v2144_v58 = vmul.f32 %v2129_v31, %v1964_v12 }
 0x587   : > { %2262 = vperm.xlu2 %2987, %v2144_v58   ;;  %2437 = vperm.xlu0 %2985, %v2188_v4   ;;  %v2174_v40 = vmul.f32 %v2144_v58, %v4671_v9  ;;  %v4714_v9 = vpop.permute.xlu2 %2382  ;;  %v2272_v58 = vmul.f32 %v2198_v21, %v4249_v27  ;;  %v2276_v27 = vmul.f32 %v2198_v21, %v4423_v10 }
 0x589   : > { %v2193_v61 = vpop.permute.xlu1 %2192  ;;  %v2189_v29 = vsub.f32 %v2159_v11, %v2174_v40  ;;  %v2274_v11 = vmul.f32 %v2198_v21, %v4329_v6  ;;  %v2277_v6 = vmul.f32 %v2198_v21, %v4667_v63 }
 0x58a   : > { %v2265_v23 = vmul.f32 %v2193_v61, %v4239_v39  ;;  %v2266_v57 = vmul.f32 %v2193_v61, %v4311_v26  ;;  %v2267_v5 = vmul.f32 %v2193_v61, %v4313_v2  ;;  %v2268_v17 = vmul.f32 %v2193_v61, %v4315_v0 }
 0x58b   : > { %v2269_v12 = vmul.f32 %v2193_v61, %v4419_v35  ;;  %v2270_v2 = vmul.f32 %v2193_v61, %v4656_v43  ;;  %v2271_v47 = vmul.f32 %v2193_v61, %v4658_v28  ;;  %v2273_v35 = vmul.f32 %v2198_v21, %v4327_v3 }
 0x58c   : > { %v2275_v28 = vmul.f32 %v2198_v21, %v4335_v62 }
 0x58f   : > { %2442 = vperm.xlu2 %2987, %v2189_v29  }
 0x591   : > { %v2373_v34 = vpop.permute.xlu1 %2372 }
 0x592   : > { %v2445_v39 = vadd.f32 %v2373_v34, %v2265_v23  ;;  %v2446_v26 = vadd.f32 %v2373_v34, %v2266_v57  ;;  %v2447_v55 = vadd.f32 %v2373_v34, %v2267_v5  ;;  %v2448_v15 = vadd.f32 %v2373_v34, %v2268_v17  ;;  %v4731_v23 = vpop.f32.mrf.mxu1  ;;  %v4733_v57 = vpop.f32.mrf.mxu2 }
 0x593   : > { %v2449_v31 = vadd.f32 %v2373_v34, %v2269_v12  ;;  %v2450_v0 = vadd.f32 %v2373_v34, %v2270_v2  ;;  %v2451_v40 = vadd.f32 %v2373_v34, %v2271_v47  ;;  %v2278_v5 = vmul.f32 %v2198_v21, %v4669_v8 }
 0x594   : > { %2550 = vst [vmem:[%s4712_s12] sm:$0xff] %v2445_v39 }
 0x595   : > { %2551 = vst [vmem:[%s4712_s12 + $0x8] sm:$0xff] %v2446_v26  ;;  %v2378_v4 = vpop.permute.xlu0 %2377 }
 0x596   : > { %2552 = vst [vmem:[%s4712_s12 + $0x10] sm:$0xff] %v2447_v55  ;;  %v2452_v43 = vadd.f32 %v2378_v4, %v2272_v58  ;;  %v2453_v61 = vadd.f32 %v2378_v4, %v2273_v35  ;;  %v2454_v29 = vadd.f32 %v2378_v4, %v2274_v11  ;;  %v2455_v62 = vadd.f32 %v2378_v4, %v2275_v28 }
 0x597   : > { %2553 = vst [vmem:[%s4712_s12 + $0x18] sm:$0xff] %v2448_v15  ;;  %v2456_v17 = vadd.f32 %v2378_v4, %v2276_v27  ;;  %v2457_v10 = vadd.f32 %v2378_v4, %v2277_v6  ;;  %v2458_v34 = vadd.f32 %v2378_v4, %v2278_v5 }
 0x598   : > { %2554 = vst [vmem:[%s4712_s12 + $0x20] sm:$0xff] %v2449_v31 }
 0x599   : > { %2555 = vst [vmem:[%s4712_s12 + $0x28] sm:$0xff] %v2450_v0  ;;  %v2218_v3 = vpop.permute.xlu2 %2217 }
 0x59a   : > { %2556 = vst.msk [vmem:[%s4712_s12 + $0x30] sm:$0xff] %vm5284_vm5, %v2451_v40  ;;  %v4763_v31 = vpop.f32.mrf.mxu1  ;;  %v4765_v58 = vpop.f32.mrf.mxu2  ;;  %v2301_v0 = vmul.f32 %v2218_v3, %v4401_v45  ;;  %v2302_v35 = vmul.f32 %v2218_v3, %v4407_v19  ;;  %v2305_v45 = vmul.f32 %v2218_v3, %v4702_v46  ;;  %v2306_v19 = vmul.f32 %v2218_v3, %v4704_v16 }
 0x59b   : > { %2557 = vst [vmem:[%s4712_s12 + $0x38] sm:$0xff] %v2452_v43  ;;  %v2304_v43 = vmul.f32 %v2218_v3, %v4439_v60 }
 0x59c   : > { %2558 = vst [vmem:[%s4712_s12 + $0x40] sm:$0xff] %v2453_v61 }
 0x59d   : > { %2559 = vst [vmem:[%s4712_s12 + $0x48] sm:$0xff] %v2454_v29  ;;  %v2203_v12 = vpop.permute.xlu0 %2202 }
 0x59e   : > { %2560 = vst [vmem:[%s4712_s12 + $0x50] sm:$0xff] %v2455_v62  ;;  %v2279_v39 = vmul.f32 %v2203_v12, %v4259_v18  ;;  %v2280_v63 = vmul.f32 %v2203_v12, %v4351_v30  ;;  %v2281_v26 = vmul.f32 %v2203_v12, %v4353_v7  ;;  %v2282_v55 = vmul.f32 %v2203_v12, %v4355_v48 }
 0x59f   : > { %2561 = vst [vmem:[%s4712_s12 + $0x58] sm:$0xff] %v2456_v17  ;;  %v2283_v8 = vmul.f32 %v2203_v12, %v4427_v38  ;;  %v2284_v21 = vmul.f32 %v2203_v12, %v4679_v14  ;;  %v2285_v2 = vmul.f32 %v2203_v12, %v4681_v24  ;;  %v2300_v24 = vmul.f32 %v2218_v3, %v4289_v20 }
 0x5a0   : > { %2562 = vst [vmem:[%s4712_s12 + $0x60] sm:$0xff] %v2457_v10  ;;  %v2459_v15 = vadd.f32 %v4714_v9, %v2279_v39  ;;  %v2460_v18 = vadd.f32 %v4714_v9, %v2280_v63  ;;  %v2461_v30 = vadd.f32 %v4714_v9, %v2281_v26  ;;  %v2462_v7 = vadd.f32 %v4714_v9, %v2282_v55 }
 0x5a1   : > { %2563 = vst.msk [vmem:[%s4712_s12 + $0x68] sm:$0xff] %vm5285_vm6, %v2458_v34  ;;  %v2208_v48 = vpop.permute.xlu1 %2207  ;;  %v2463_v38 = vadd.f32 %v4714_v9, %v2283_v8  ;;  %v2398_v14 = vpop.permute.xlu2 %2397  ;;  %v2464_v47 = vadd.f32 %v4714_v9, %v2284_v21  ;;  %v2465_v4 = vadd.f32 %v4714_v9, %v2285_v2  ;;  %v2303_v20 = vmul.f32 %v2218_v3, %v4409_v49 }
 0x5a2   : > { %2564 = vst [vmem:[%s4712_s12 + $0x70] sm:$0xff] %v2459_v15  ;;  %v2480_v40 = vadd.f32 %v2398_v14, %v2300_v24  ;;  %v2481_v11 = vadd.f32 %v2398_v14, %v2301_v0  ;;  %v2482_v28 = vadd.f32 %v2398_v14, %v2302_v35  ;;  %v2484_v61 = vadd.f32 %v2398_v14, %v2304_v43  ;;  %v1623_v17 = vpop.f32.mrf.mxu1  ;;  %v1685_v10 = vpop.f32.mrf.mxu2 }
 0x5a3   : > { %2565 = vst [vmem:[%s4712_s12 + $0x78] sm:$0xff] %v2460_v18  ;;  %v2483_v9 = vadd.f32 %v2398_v14, %v2303_v20  ;;  %v2286_v29 = vmul.f32 %v2208_v48, %v4269_v54  ;;  %v2485_v60 = vadd.f32 %v2398_v14, %v2305_v45  ;;  %v2287_v6 = vmul.f32 %v2208_v48, %v4367_v32  ;;  %v5292_v45 = vld [vmem:[#allocation22_spill] sm:$0xff] }
 0x5a4   : > { %2566 = vst [vmem:[%s4712_s12 + $0x80] sm:$0xff] %v2461_v30  ;;  %v2486_v62 = vadd.f32 %v2398_v14, %v2306_v19  ;;  %v2288_v46 = vmul.f32 %v2208_v48, %v4369_v36  ;;  %v2289_v16 = vmul.f32 %v2208_v48, %v4371_v51  ;;  %v2290_v54 = vmul.f32 %v2208_v48, %v4431_v59 }
 0x5a5   : > { %2567 = vst [vmem:[%s4712_s12 + $0x88] sm:$0xff] %v2462_v7  ;;  %v2291_v34 = vmul.f32 %v2208_v48, %v4687_v13  ;;  %v2292_v12 = vmul.f32 %v2208_v48, %v4689_v50 }
 0x5a6   : > { %2568 = vst [vmem:[%s4712_s12 + $0x90] sm:$0xff] %v2463_v38 }
 0x5a7   : > { %2569 = vst [vmem:[%s4712_s12 + $0x98] sm:$0xff] %v2464_v47 }
 0x5a8   : > { %2570 = vst.msk [vmem:[%s4712_s12 + $0xa0] sm:$0xff] %vm5286_vm7, %v2465_v4  ;;  %v5289_v4 = vld [vmem:[#allocation40_spill] sm:$0xff] }
 0x5a9   : > { %2585 = vst [vmem:[%s4712_s12 + $0x118] sm:$0xff] %v2480_v40  ;;  %v2388_v49 = vpop.permute.xlu1 %2387  ;;  %v2213_v27 = vpop.permute.xlu0 %2212 }
 0x5aa   : > { %2586 = vst [vmem:[%s4712_s12 + $0x120] sm:$0xff] %v2481_v11  ;;  %v2466_v5 = vadd.f32 %v2388_v49, %v2286_v29  ;;  %v2467_v3 = vadd.f32 %v2388_v49, %v2287_v6  ;;  %v2468_v32 = vadd.f32 %v2388_v49, %v2288_v46  ;;  %v2469_v36 = vadd.f32 %v2388_v49, %v2289_v16  ;;  %v4811_v7 = vpop.f32.mrf.mxu1 }
 0x5ab   : > { %2587 = vst [vmem:[%s4712_s12 + $0x128] sm:$0xff] %v2482_v28  ;;  %v2470_v39 = vadd.f32 %v2388_v49, %v2290_v54  ;;  %v2471_v51 = vadd.f32 %v2388_v49, %v2291_v34  ;;  %v2293_v63 = vmul.f32 %v2213_v27, %v4279_v52  ;;  %v2472_v55 = vadd.f32 %v2388_v49, %v2292_v12 }
 0x5ac   : > { %2588 = vst [vmem:[%s4712_s12 + $0x130] sm:$0xff] %v2483_v9  ;;  %v2294_v13 = vmul.f32 %v2213_v27, %v4385_v37  ;;  %v2295_v8 = vmul.f32 %v2213_v27, %v4387_v56  ;;  %v2296_v50 = vmul.f32 %v2213_v27, %v4389_v44  ;;  %v2297_v52 = vmul.f32 %v2213_v27, %v4435_v42  ;;  %v4813_v44 = vpop.f32.mrf.mxu2 }
 0x5ad   : > { %2589 = vst [vmem:[%s4712_s12 + $0x138] sm:$0xff] %v2484_v61  ;;  %v2298_v18 = vmul.f32 %v2213_v27, %v4695_v53  ;;  %v2299_v30 = vmul.f32 %v2213_v27, %v4697_v33  ;;  %v5293_v61 = vld [vmem:[#allocation23_spill] sm:$0xff] }
 0x5ae   : > { %2590 = vst [vmem:[%s4712_s12 + $0x140] sm:$0xff] %v2485_v60 }
 0x5af   : > { %2591 = vst.msk [vmem:[%s4712_s12 + $0x148] sm:$0xff] %vm5287_vm8, %v2486_v62  ;;  %v5294_v62 = vld [vmem:[#allocation17_spill] sm:$0xff] }
 0x5b0   : > { %2571 = vst [vmem:[%s4712_s12 + $0xa8] sm:$0xff] %v2466_v5 }
 0x5b1   : > { %2572 = vst [vmem:[%s4712_s12 + $0xb0] sm:$0xff] %v2467_v3  ;;  %v2233_v59 = vpop.permute.xlu2 %2232  ;;  %v2393_v26 = vpop.permute.xlu0 %2392  ;;  %v5295_v3 = vld [vmem:[#allocation16_spill] sm:$0xff] }
 0x5b2   : > { %2573 = vst [vmem:[%s4712_s12 + $0xb8] sm:$0xff] %v2468_v32  ;;  %v2473_v21 = vadd.f32 %v2393_v26, %v2293_v63  ;;  %v2474_v2 = vadd.f32 %v2393_v26, %v2294_v13  ;;  %v2475_v15 = vadd.f32 %v2393_v26, %v2295_v8  ;;  %v2476_v37 = vadd.f32 %v2393_v26, %v2296_v50  ;;  %v4834_v60 = vpop.f32.mrf.mxu1  ;;  %v5299_v13 = vld [vmem:[#allocation18_spill] sm:$0xff]  ;;  %v5300_v8 = vld [vmem:[#allocation36_spill] sm:$0xff] }
 0x5b3   : > { %2574 = vst [vmem:[%s4712_s12 + $0xc0] sm:$0xff] %v2469_v36  ;;  %v2477_v56 = vadd.f32 %v2393_v26, %v2297_v52  ;;  %v2478_v48 = vadd.f32 %v2393_v26, %v2298_v18  ;;  %v2321_v42 = vmul.f32 %v2233_v59, %v4325_v25  ;;  %v2479_v38 = vadd.f32 %v2393_v26, %v2299_v30  ;;  %v5302_v50 = vld [vmem:[#allocation32_spill] sm:$0xff] }
 0x5b4   : > { %2575 = vst [vmem:[%s4712_s12 + $0xc8] sm:$0xff] %v2470_v39  ;;  %v2322_v33 = vmul.f32 %v2233_v59, %v4554_v22  ;;  %v2323_v24 = vmul.f32 %v2233_v59, %v4562_v41  ;;  %v2324_v47 = vmul.f32 %v2233_v59, %v4485_v1  ;;  %v2325_v35 = vmul.f32 %v2233_v59, %v5289_v4  ;;  %v5291_v1 = vld [vmem:[#allocation28_spill] sm:$0xff]  ;;  %v4836_v6 = vpop.f32.mrf.mxu2 }
 0x5b5   : > { %2576 = vst [vmem:[%s4712_s12 + $0xd0] sm:$0xff] %v2471_v51  ;;  %v2326_v20 = vmul.f32 %v2233_v59, %v1623_v17  ;;  %v2327_v22 = vmul.f32 %v2233_v59, %v1685_v10  ;;  %v5297_v51 = vld [vmem:[#allocation35_spill] sm:$0xff] }
 0x5b6   : > { %2577 = vst.msk [vmem:[%s4712_s12 + $0xd8] sm:$0xff] %vm5288_vm9, %v2472_v55 }
 0x5b7   : > { %2578 = vst [vmem:[%s4712_s12 + $0xe0] sm:$0xff] %v2473_v21 }
 0x5b8   : > { %2579 = vst [vmem:[%s4712_s12 + $0xe8] sm:$0xff] %v2474_v2 }
 0x5b9   : > { %2580 = vst [vmem:[%s4712_s12 + $0xf0] sm:$0xff] %v2475_v15  ;;  %v2223_v53 = vpop.permute.xlu1 %2222  ;;  %v2413_v14 = vpop.permute.xlu2 %2412 }
 0x5ba   : > { %2581 = vst [vmem:[%s4712_s12 + $0xf8] sm:$0xff] %v2476_v37  ;;  %v2501_v0 = vadd.f32 %v2413_v14, %v2321_v42  ;;  %v2502_v25 = vadd.f32 %v2413_v14, %v2322_v33  ;;  %v2503_v40 = vadd.f32 %v2413_v14, %v2323_v24  ;;  %v2504_v11 = vadd.f32 %v2413_v14, %v2324_v47  ;;  %v1632_v15 = vpop.f32.mrf.mxu1  ;;  %v5303_v33 = vld [vmem:[#allocation37_spill] sm:$0xff] }
 0x5bb   : > { %2582 = vst [vmem:[%s4712_s12 + $0x100] sm:$0xff] %v2477_v56  ;;  %v2505_v41 = vadd.f32 %v2413_v14, %v2325_v35  ;;  %v2506_v43 = vadd.f32 %v2413_v14, %v2326_v20  ;;  %v2307_v28 = vmul.f32 %v2223_v53, %v5291_v1  ;;  %v2308_v9 = vmul.f32 %v2223_v53, %v5292_v45  ;;  %v5305_v35 = vld [vmem:[#allocation15_spill] sm:$0xff] }
 0x5bc   : > { %2583 = vst [vmem:[%s4712_s12 + $0x108] sm:$0xff] %v2478_v48  ;;  %v2507_v19 = vadd.f32 %v2413_v14, %v2327_v22  ;;  %v2309_v49 = vmul.f32 %v2223_v53, %v5293_v61  ;;  %v2310_v46 = vmul.f32 %v2223_v53, %v5294_v62  ;;  %v2311_v17 = vmul.f32 %v2223_v53, %v5295_v3  ;;  %v1694_v18 = vpop.f32.mrf.mxu2  ;;  %v5307_v20 = vld [vmem:[#allocation31_spill] sm:$0xff] }
 0x5bd   : > { %2584 = vst.msk [vmem:[%s4712_s12 + $0x110] sm:$0xff] %vm5290_vm10, %v2479_v38  ;;  %v2312_v54 = vmul.f32 %v2223_v53, %v4731_v23  ;;  %v2313_v34 = vmul.f32 %v2223_v53, %v4733_v57  ;;  %v5298_v23 = vld [vmem:[#allocation14_spill] sm:$0xff] }
 0x5be   : > { %2606 = vst [vmem:[%s4712_s12 + $0x1c0] sm:$0xff] %v2501_v0  ;;  %v5304_v0 = vld [vmem:[#allocation38_spill] sm:$0xff] }
 0x5bf   : > { %2607 = vst [vmem:[%s4712_s12 + $0x1c8] sm:$0xff] %v2502_v25 }
 0x5c0   : > { %2608 = vst [vmem:[%s4712_s12 + $0x1d0] sm:$0xff] %v2503_v40  ;;  %v5306_v40 = vld [vmem:[#allocation5_spill] sm:$0xff] }
 0x5c1   : > { %2609 = vst [vmem:[%s4712_s12 + $0x1d8] sm:$0xff] %v2504_v11  ;;  %v2403_v27 = vpop.permute.xlu1 %2402  ;;  %v2228_v29 = vpop.permute.xlu0 %2227 }
 0x5c2   : > { %2610 = vst [vmem:[%s4712_s12 + $0x1e0] sm:$0xff] %v2505_v41  ;;  %v2487_v5 = vadd.f32 %v2403_v27, %v2307_v28  ;;  %v2488_v16 = vadd.f32 %v2403_v27, %v2308_v9  ;;  %v2489_v10 = vadd.f32 %v2403_v27, %v2309_v49  ;;  %v2490_v32 = vadd.f32 %v2403_v27, %v2310_v46  ;;  %v5310_v46 = vld [vmem:[#allocation11_spill] sm:$0xff] }
 0x5c3   : > { %2611 = vst [vmem:[%s4712_s12 + $0x1e8] sm:$0xff] %v2506_v43  ;;  %v2491_v36 = vadd.f32 %v2403_v27, %v2311_v17  ;;  %v2492_v12 = vadd.f32 %v2403_v27, %v2312_v54  ;;  %v2493_v39 = vadd.f32 %v2403_v27, %v2313_v34  ;;  %v2314_v63 = vmul.f32 %v2228_v29, %v5297_v51  ;;  %v5312_v17 = vld [vmem:[#allocation33_spill] sm:$0xff]  ;;  %v5313_v34 = vld [vmem:[#allocation12_spill] sm:$0xff] }
 0x5c4   : > { %2612 = vst.msk [vmem:[%s4712_s12 + $0x1f0] sm:$0xff] %vm5296_vm11, %v2507_v19  ;;  %v2315_v55 = vmul.f32 %v2228_v29, %v5298_v23  ;;  %v2316_v57 = vmul.f32 %v2228_v29, %v5299_v13  ;;  %v2317_v21 = vmul.f32 %v2228_v29, %v5300_v8  ;;  %v2318_v2 = vmul.f32 %v2228_v29, %v5302_v50  ;;  %v4875_v19 = vpop.f32.mrf.mxu1  ;;  %v4877_v61 = vpop.f32.mrf.mxu2  ;;  %v5316_v50 = vld [vmem:[#allocation45_spill] sm:$0xff] }
 0x5c5   : > { %2592 = vst [vmem:[%s4712_s12 + $0x150] sm:$0xff] %v2487_v5  ;;  %v2319_v37 = vmul.f32 %v2228_v29, %v4763_v31  ;;  %v2320_v42 = vmul.f32 %v2228_v29, %v4765_v58  ;;  %v5309_v29 = vld [vmem:[#allocation44_spill] sm:$0xff] }
 0x5c6   : > { %2593 = vst [vmem:[%s4712_s12 + $0x158] sm:$0xff] %v2488_v16  ;;  %v5311_v16 = vld [vmem:[#allocation13_spill] sm:$0xff] }
 0x5c7   : > { %2594 = vst [vmem:[%s4712_s12 + $0x160] sm:$0xff] %v2489_v10 }
 0x5c8   : > { %2595 = vst [vmem:[%s4712_s12 + $0x168] sm:$0xff] %v2490_v32 }
 0x5c9   : > { %2596 = vst [vmem:[%s4712_s12 + $0x170] sm:$0xff] %v2491_v36  ;;  %v2248_v59 = vpop.permute.xlu2 %2247  ;;  %v2408_v26 = vpop.permute.xlu0 %2407 }
 0x5ca   : > { %2597 = vst [vmem:[%s4712_s12 + $0x178] sm:$0xff] %v2492_v12  ;;  %v2494_v52 = vadd.f32 %v2408_v26, %v2314_v63  ;;  %v2495_v30 = vadd.f32 %v2408_v26, %v2315_v55  ;;  %v2496_v56 = vadd.f32 %v2408_v26, %v2316_v57  ;;  %v2497_v48 = vadd.f32 %v2408_v26, %v2317_v21 }
 0x5cb   : > { %2598 = vst.msk [vmem:[%s4712_s12 + $0x180] sm:$0xff] %vm5301_vm0, %v2493_v39  ;;  %v2498_v38 = vadd.f32 %v2408_v26, %v2318_v2  ;;  %v2499_v53 = vadd.f32 %v2408_v26, %v2319_v37  ;;  %v2500_v14 = vadd.f32 %v2408_v26, %v2320_v42  ;;  %v2342_v24 = vmul.f32 %v2248_v59, %v5303_v33 }
 0x5cc   : > { %2599 = vst [vmem:[%s4712_s12 + $0x188] sm:$0xff] %v2494_v52  ;;  %v2343_v4 = vmul.f32 %v2248_v59, %v5304_v0  ;;  %v2344_v25 = vmul.f32 %v2248_v59, %v5305_v35  ;;  %v2345_v58 = vmul.f32 %v2248_v59, %v5306_v40  ;;  %v2346_v11 = vmul.f32 %v2248_v59, %v5307_v20  ;;  %v4897_v57 = vpop.f32.mrf.mxu1  ;;  %v4899_v8 = vpop.f32.mrf.mxu2  ;;  %v5317_v52 = vld [vmem:[#allocation29_spill] sm:$0xff] }
 0x5cd   : > { %2600 = vst [vmem:[%s4712_s12 + $0x190] sm:$0xff] %v2495_v30  ;;  %v2347_v41 = vmul.f32 %v2248_v59, %v1632_v15  ;;  %v2348_v45 = vmul.f32 %v2248_v59, %v1694_v18  ;;  %v5318_v15 = vld [vmem:[#allocation42_spill] sm:$0xff] }
 0x5ce   : > { %2601 = vst [vmem:[%s4712_s12 + $0x198] sm:$0xff] %v2496_v56  ;;  %v5320_v56 = vld [vmem:[#allocation47_spill] sm:$0xff] }
 0x5cf   : > { %2602 = vst [vmem:[%s4712_s12 + $0x1a0] sm:$0xff] %v2497_v48 }
 0x5d0   : > { %2603 = vst [vmem:[%s4712_s12 + $0x1a8] sm:$0xff] %v2498_v38 }
 0x5d1   : > { %v2238_v47 = vpop.permute.xlu1 %2237  ;;  %v2428_v31 = vpop.permute.xlu2 %2427  ;;  %2604 = vst [vmem:[%s4712_s12 + $0x1b0] sm:$0xff] %v2499_v53 }
 0x5d2   : > { %2605 = vst.msk [vmem:[%s4712_s12 + $0x1b8] sm:$0xff] %vm5308_vm13, %v2500_v14  ;;  %v2522_v22 = vadd.f32 %v2428_v31, %v2342_v24  ;;  %v2523_v43 = vadd.f32 %v2428_v31, %v2343_v4  ;;  %v2524_v1 = vadd.f32 %v2428_v31, %v2344_v25  ;;  %v2525_v28 = vadd.f32 %v2428_v31, %v2345_v58  ;;  %v5321_v4 = vld [vmem:[#allocation46_spill] sm:$0xff]  ;;  %v5322_v25 = vld [vmem:[#allocation25_spill] sm:$0xff]  ;;  %v5323_v58 = vld [vmem:[#allocation39_spill] sm:$0xff] }
 0x5d3   : > { %v2526_v9 = vadd.f32 %v2428_v31, %v2346_v11  ;;  %v2527_v49 = vadd.f32 %v2428_v31, %v2347_v41  ;;  %v2528_v27 = vadd.f32 %v2428_v31, %v2348_v45  ;;  %v2328_v62 = vmul.f32 %v2238_v47, %v5309_v29  ;;  %v5324_v11 = vld [vmem:[#allocation10_spill] sm:$0xff] }
 0x5d4   : > { %2627 = vst [vmem:[%s4712_s12 + $0x268] sm:$0xff] %v2522_v22  ;;  %v2329_v5 = vmul.f32 %v2238_v47, %v5310_v46  ;;  %v2330_v3 = vmul.f32 %v2238_v47, %v5311_v16  ;;  %v2331_v10 = vmul.f32 %v2238_v47, %v5312_v17  ;;  %v2332_v36 = vmul.f32 %v2238_v47, %v5313_v34  ;;  %v1641_v41 = vpop.f32.mrf.mxu1 }
 0x5d5   : > { %2628 = vst [vmem:[%s4712_s12 + $0x270] sm:$0xff] %v2523_v43  ;;  %v2333_v63 = vmul.f32 %v2238_v47, %v4811_v7  ;;  %v2334_v26 = vmul.f32 %v2238_v47, %v4813_v44  ;;  %v5315_v7 = vld [vmem:[#allocation30_spill] sm:$0xff]  ;;  %v5326_v43 = vld [vmem:[#allocation41_spill] sm:$0xff] }
 0x5d6   : > { %2629 = vst [vmem:[%s4712_s12 + $0x278] sm:$0xff] %v2524_v1 }
 0x5d7   : > { %2630 = vst [vmem:[%s4712_s12 + $0x280] sm:$0xff] %v2525_v28 }
 0x5d8   : > { %2631 = vst [vmem:[%s4712_s12 + $0x288] sm:$0xff] %v2526_v9 }
 0x5d9   : > { %v2418_v54 = vpop.permute.xlu1 %2417  ;;  %v2243_v32 = vpop.permute.xlu0 %2242  ;;  %2632 = vst [vmem:[%s4712_s12 + $0x290] sm:$0xff] %v2527_v49 }
 0x5da   : > { %v2508_v12 = vadd.f32 %v2418_v54, %v2328_v62  ;;  %v2509_v39 = vadd.f32 %v2418_v54, %v2329_v5  ;;  %v2510_v51 = vadd.f32 %v2418_v54, %v2330_v3  ;;  %2633 = vst.msk [vmem:[%s4712_s12 + $0x298] sm:$0xff] %vm5314_vm14, %v2528_v27  ;;  %v2511_v59 = vadd.f32 %v2418_v54, %v2331_v10  ;;  %v1703_v49 = vpop.f32.mrf.mxu2  ;;  %v5327_v3 = vld [vmem:[#allocation7_spill] sm:$0xff] }
 0x5db   : > { %v2512_v23 = vadd.f32 %v2418_v54, %v2332_v36  ;;  %v2513_v55 = vadd.f32 %v2418_v54, %v2333_v63  ;;  %v2514_v13 = vadd.f32 %v2418_v54, %v2334_v26  ;;  %v2335_v21 = vmul.f32 %v2243_v32, %v5315_v7  ;;  %v5328_v10 = vld [vmem:[#allocation19_spill] sm:$0xff]  ;;  %v5330_v36 = vld [vmem:[#allocation6_spill] sm:$0xff] }
 0x5dc   : > { %2613 = vst [vmem:[%s4712_s12 + $0x1f8] sm:$0xff] %v2508_v12  ;;  %v2336_v2 = vmul.f32 %v2243_v32, %v5316_v50  ;;  %v2337_v44 = vmul.f32 %v2243_v32, %v5317_v52  ;;  %v2338_v18 = vmul.f32 %v2243_v32, %v5318_v15  ;;  %v2339_v48 = vmul.f32 %v2243_v32, %v5320_v56 }
 0x5dd   : > { %2614 = vst [vmem:[%s4712_s12 + $0x200] sm:$0xff] %v2509_v39  ;;  %v2340_v14 = vmul.f32 %v2243_v32, %v4834_v60  ;;  %v2341_v24 = vmul.f32 %v2243_v32, %v4836_v6  ;;  %v5329_v32 = vld [vmem:[#allocation20_spill] sm:$0xff] }
 0x5de   : > { %2615 = vst [vmem:[%s4712_s12 + $0x208] sm:$0xff] %v2510_v51  ;;  %v5332_v51 = vld [vmem:[#allocation43_spill] sm:$0xff] }
 0x5df   : > { %2616 = vst [vmem:[%s4712_s12 + $0x210] sm:$0xff] %v2511_v59 }
 0x5e0   : > { %2617 = vst [vmem:[%s4712_s12 + $0x218] sm:$0xff] %v2512_v23 }
 0x5e1   : > { %2618 = vst [vmem:[%s4712_s12 + $0x220] sm:$0xff] %v2513_v55  ;;  %v2263_v37 = vpop.permute.xlu2 %2262  ;;  %v2423_v30 = vpop.permute.xlu0 %2422 }
 0x5e2   : > { %2619 = vst.msk [vmem:[%s4712_s12 + $0x228] sm:$0xff] %vm5319_vm15, %v2514_v13  ;;  %v2515_v42 = vadd.f32 %v2423_v30, %v2335_v21  ;;  %v2516_v38 = vadd.f32 %v2423_v30, %v2336_v2  ;;  %v2517_v53 = vadd.f32 %v2423_v30, %v2337_v44  ;;  %v2518_v33 = vadd.f32 %v2423_v30, %v2338_v18  ;;  %v5334_v44 = vld [vmem:[#allocation8_spill] sm:$0xff] }
 0x5e3   : > { %v2519_v47 = vadd.f32 %v2423_v30, %v2339_v48  ;;  %v2520_v31 = vadd.f32 %v2423_v30, %v2340_v14  ;;  %v2521_v0 = vadd.f32 %v2423_v30, %v2341_v24  ;;  %v2363_v35 = vmul.f32 %v2263_v37, %v5321_v4  ;;  %v5337_v30 = vld [vmem:[#allocation9_spill] sm:$0xff] }
 0x5e4   : > { %2620 = vst [vmem:[%s4712_s12 + $0x230] sm:$0xff] %v2515_v42  ;;  %v2364_v40 = vmul.f32 %v2263_v37, %v5322_v25  ;;  %v2365_v20 = vmul.f32 %v2263_v37, %v5323_v58  ;;  %v2366_v6 = vmul.f32 %v2263_v37, %v5324_v11  ;;  %v2367_v1 = vmul.f32 %v2263_v37, %v5326_v43  ;;  %v5338_v42 = vld [vmem:[#allocation27_spill] sm:$0xff] }
 0x5e5   : > { %2621 = vst [vmem:[%s4712_s12 + $0x238] sm:$0xff] %v2516_v38  ;;  %v2368_v27 = vmul.f32 %v2263_v37, %v1641_v41  ;;  %v2369_v62 = vmul.f32 %v2263_v37, %v1703_v49  ;;  %v5336_v37 = vld [vmem:[#allocation21_spill] sm:$0xff] }
 0x5e6   : > { %2622 = vst [vmem:[%s4712_s12 + $0x240] sm:$0xff] %v2517_v53 }
 0x5e7   : > { %2623 = vst [vmem:[%s4712_s12 + $0x248] sm:$0xff] %v2518_v33 }
 0x5e8   : > { %2624 = vst [vmem:[%s4712_s12 + $0x250] sm:$0xff] %v2519_v47 }
 0x5e9   : > { %2625 = vst [vmem:[%s4712_s12 + $0x258] sm:$0xff] %v2520_v31  ;;  %v2253_v60 = vpop.permute.xlu1 %2252  ;;  %v2443_v22 = vpop.permute.xlu2 %2442 }
 0x5ea   : > { %2626 = vst.msk [vmem:[%s4712_s12 + $0x260] sm:$0xff] %vm5325_vm2, %v2521_v0  ;;  %v2543_v28 = vadd.f32 %v2443_v22, %v2363_v35  ;;  %v2544_v45 = vadd.f32 %v2443_v22, %v2364_v40  ;;  %v2545_v9 = vadd.f32 %v2443_v22, %v2365_v20  ;;  %v2546_v29 = vadd.f32 %v2443_v22, %v2366_v6 }
 0x5eb   : > { %v2547_v46 = vadd.f32 %v2443_v22, %v2367_v1  ;;  %v2548_v5 = vadd.f32 %v2443_v22, %v2368_v27  ;;  %v2549_v16 = vadd.f32 %v2443_v22, %v2369_v62  ;;  %v2349_v17 = vmul.f32 %v2253_v60, %v5327_v3 }
 0x5ec   : > { %2648 = vst [vmem:[%s4712_s12 + $0x310] sm:$0xff] %v2543_v28  ;;  %v2350_v54 = vmul.f32 %v2253_v60, %v5328_v10  ;;  %v2351_v34 = vmul.f32 %v2253_v60, %v5329_v32  ;;  %v2352_v12 = vmul.f32 %v2253_v60, %v5330_v36  ;;  %v2353_v63 = vmul.f32 %v2253_v60, %v5332_v51 }
 0x5ed   : > { %2649 = vst [vmem:[%s4712_s12 + $0x318] sm:$0xff] %v2544_v45  ;;  %v2354_v55 = vmul.f32 %v2253_v60, %v4875_v19  ;;  %v2355_v21 = vmul.f32 %v2253_v60, %v4877_v61  ;;  %v5335_v19 = vld [vmem:[#allocation24_spill] sm:$0xff] }
 0x5ee   : > { %2650 = vst [vmem:[%s4712_s12 + $0x320] sm:$0xff] %v2545_v9 }
 0x5ef   : > { %2651 = vst [vmem:[%s4712_s12 + $0x328] sm:$0xff] %v2546_v29 }
 0x5f0   : > { %2652 = vst [vmem:[%s4712_s12 + $0x330] sm:$0xff] %v2547_v46 }
 0x5f1   : > { %2653 = vst [vmem:[%s4712_s12 + $0x338] sm:$0xff] %v2548_v5  ;;  %v2433_v39 = vpop.permute.xlu1 %2432  ;;  %v2258_v7 = vpop.permute.xlu0 %2257 }
 0x5f2   : > { %2654 = vst.msk [vmem:[%s4712_s12 + $0x340] sm:$0xff] %vm5331_vm12, %v2549_v16  ;;  %v2529_v59 = vadd.f32 %v2433_v39, %v2349_v17  ;;  %v2530_v26 = vadd.f32 %v2433_v39, %v2350_v54  ;;  %v2531_v23 = vadd.f32 %v2433_v39, %v2351_v34  ;;  %v2532_v13 = vadd.f32 %v2433_v39, %v2352_v12 }
 0x5f3   : > { %v2533_v50 = vadd.f32 %v2433_v39, %v2353_v63  ;;  %v2534_v2 = vadd.f32 %v2433_v39, %v2354_v55  ;;  %v2535_v52 = vadd.f32 %v2433_v39, %v2355_v21  ;;  %v2356_v15 = vmul.f32 %v2258_v7, %v5334_v44 }
 0x5f4   : > { %2634 = vst [vmem:[%s4712_s12 + $0x2a0] sm:$0xff] %v2529_v59  ;;  %v2357_v18 = vmul.f32 %v2258_v7, %v5335_v19  ;;  %v2358_v61 = vmul.f32 %v2258_v7, %v5336_v37  ;;  %v2359_v56 = vmul.f32 %v2258_v7, %v5337_v30  ;;  %v2360_v38 = vmul.f32 %v2258_v7, %v5338_v42 }
 0x5f5   : > { %2635 = vst [vmem:[%s4712_s12 + $0x2a8] sm:$0xff] %v2530_v26  ;;  %v2361_v24 = vmul.f32 %v2258_v7, %v4897_v57  ;;  %v2362_v31 = vmul.f32 %v2258_v7, %v4899_v8 }
 0x5f6   : > { %2636 = vst [vmem:[%s4712_s12 + $0x2b0] sm:$0xff] %v2531_v23 }
 0x5f7   : > { %2637 = vst [vmem:[%s4712_s12 + $0x2b8] sm:$0xff] %v2532_v13 }
 0x5f8   : > { %2638 = vst [vmem:[%s4712_s12 + $0x2c0] sm:$0xff] %v2533_v50 }
 0x5f9   : > { %2639 = vst [vmem:[%s4712_s12 + $0x2c8] sm:$0xff] %v2534_v2  ;;  %v2438_v48 = vpop.permute.xlu0 %2437 }
 0x5fa   : > { %2640 = vst.msk [vmem:[%s4712_s12 + $0x2d0] sm:$0xff] %vm5333_vm1, %v2535_v52  ;;  %v2536_v53 = vadd.f32 %v2438_v48, %v2356_v15  ;;  %v2537_v14 = vadd.f32 %v2438_v48, %v2357_v18  ;;  %v2538_v33 = vadd.f32 %v2438_v48, %v2358_v61  ;;  %v2539_v47 = vadd.f32 %v2438_v48, %v2359_v56 }
 0x5fb   : > { %v2540_v0 = vadd.f32 %v2438_v48, %v2360_v38  ;;  %v2541_v4 = vadd.f32 %v2438_v48, %v2361_v24  ;;  %v2542_v35 = vadd.f32 %v2438_v48, %v2362_v31 }
 0x5fc   : > { %2641 = vst [vmem:[%s4712_s12 + $0x2d8] sm:$0xff] %v2536_v53 }
 0x5fd   : > { %2642 = vst [vmem:[%s4712_s12 + $0x2e0] sm:$0xff] %v2537_v14 }
 0x5fe   : > { %2643 = vst [vmem:[%s4712_s12 + $0x2e8] sm:$0xff] %v2538_v33 }
 0x5ff   : > { %2644 = vst [vmem:[%s4712_s12 + $0x2f0] sm:$0xff] %v2539_v47 }
 0x600   : > { %2645 = vst [vmem:[%s4712_s12 + $0x2f8] sm:$0xff] %v2540_v0 }
 0x601   : > { %2646 = vst [vmem:[%s4712_s12 + $0x300] sm:$0xff] %v2541_v4 }
 0x602   : > { %2647 = vst.msk [vmem:[%s4712_s12 + $0x308] sm:$0xff] %vm5339_vm3, %v2542_v35 }
 0x603 PF: > { %s16_s18 = sadd.s32 1, %s3088_s18  }
 0x604   : > { %p13_p7 = scmp.ge.s32.totalorder %s16_s18, 6  }
 0x606   :  { %15 = sbr.rel (!%p13_p7) target bundleno = 1 (0x1), region = 81 }
 0x60b   :  { %2679 = vsyncpa [#allocation3], 1 }
 0x60c   :  { %2681 = vsyncpa [#allocation3 + $0x1], 1 }

</bundles_post_ra>
